<compile_context>
chip_gen: v5e
topology: v5e:2x2
jax: 0.10.0
libtpu: 0.0.40
codegen_flags: <defaults>
</compile_context>

<pallas_src>
import functools
import math

import jax
import jax.numpy as jnp
from jax.experimental import pallas as pl
from jax.experimental.pallas import tpu as pltpu


# ------------------------------ fused kernel --------------------------------

def _encoder_head_kernel(x0_ref, mask_ref, i2v_ref,
                         w_qkv_ref, b_qkv_ref, wo_ref, bo_ref,
                         ln1_g_ref, ln1_b_ref, w1_ref, b1_ref, w2_ref, b2_ref,
                         ln2_g_ref, ln2_b_ref,
                         pool_w_ref, pool_b_ref, fc_wh_ref, fc_wi_ref, fc_b_ref,
                         out_ref,
                         x_scr,
                         *, pairs, seq, hidden, n_heads, n_layers, i2v_dim, eps):
    l = pl.program_id(1)                       # layer index (inner, "arbitrary")
    bb2 = 2 * pairs                            # sentence rows in this block
    rows = bb2 * seq
    hd = hidden // n_heads

    def layer_norm(v, g, b):
        mu = jnp.mean(v, axis=-1, keepdims=True)
        var = jnp.mean((v - mu) ** 2, axis=-1, keepdims=True)
        return (v - mu) * jax.lax.rsqrt(var + eps) * g + b

    # ---- initialize persistent activations from the embedded input block ----
    @pl.when(l == 0)
    def _():
        x_scr[...] = x0_ref[...].reshape(rows, hidden)

    x = x_scr[...]                             # (rows, H) f32
    mask3 = mask_ref[...]                      # (2bb, S, S) f32, pre-broadcast

    # ---- fused QKV projection (bf16 MXU operands, f32 accumulation) ----
    xb = x.astype(jnp.bfloat16)
    qkv = jnp.dot(xb, w_qkv_ref[0],
                  preferred_element_type=jnp.float32) + b_qkv_ref[0]   # (rows, 3H)

    # ---- attention: tiny per-head score/context matmuls, ONE output proj ----
    ctx_parts = []
    for h in range(n_heads):
        q = qkv[:, h * hd:(h + 1) * hd].astype(jnp.bfloat16).reshape(bb2, seq, hd)
        k = qkv[:, hidden + h * hd:hidden + (h + 1) * hd
                ].astype(jnp.bfloat16).reshape(bb2, seq, hd)
        v = qkv[:, 2 * hidden + h * hd:2 * hidden + (h + 1) * hd
                ].astype(jnp.bfloat16).reshape(bb2, seq, hd)
        s = jnp.einsum("bqd,bkd->bqk", q, k,
                       preferred_element_type=jnp.float32) + mask3
        s = s - jnp.max(s, axis=-1, keepdims=True)
        p = jnp.exp(s)
        p = p * pl.reciprocal(jnp.sum(p, axis=-1, keepdims=True), approx=True)
        ctx_parts.append(jnp.einsum("bqk,bkd->bqd", p.astype(jnp.bfloat16), v,
                                    preferred_element_type=jnp.float32))
    ctx = jnp.concatenate(ctx_parts, axis=-1).reshape(rows, hidden)    # (rows, H)
    attn = jnp.dot(ctx.astype(jnp.bfloat16), wo_ref[0],
                   preferred_element_type=jnp.float32) + bo_ref[0]
    x = layer_norm(x + attn, ln1_g_ref[0], ln1_b_ref[0])

    # ---- feed-forward ----
    h1 = jnp.dot(x.astype(jnp.bfloat16), w1_ref[0],
                 preferred_element_type=jnp.float32) + b1_ref[0]
    # TODO(synk): BERT uses erf-GELU; tanh approximation keeps lowering simple.
    h1 = jax.nn.gelu(h1, approximate=True)
    ffn = jnp.dot(h1.astype(jnp.bfloat16), w2_ref[0],
                  preferred_element_type=jnp.float32) + b2_ref[0]
    x = layer_norm(x + ffn, ln2_g_ref[0], ln2_b_ref[0])
    x_scr[...] = x                             # persist for the next layer step

    # ---- pooler + recommendation head on the final layer step ----
    @pl.when(l == n_layers - 1)
    def _():
        cls = x.reshape(bb2, seq, hidden)[:, 0, :]                     # (2bb, H)
        pooled = jnp.tanh(jnp.dot(cls.astype(jnp.bfloat16), pool_w_ref[...],
                                  preferred_element_type=jnp.float32)
                          + pool_b_ref[...])                           # (2bb, H)
        i2v = i2v_ref[...].reshape(bb2, i2v_dim)                       # (2bb, I)
        p1, p2 = pooled[:pairs], pooled[pairs:]
        v1, v2 = i2v[:pairs], i2v[pairs:]
        # cat(p1,i1)*cat(p2,i2) == cat(p1*p2, i1*i2); fc dot done as VPU reduce.
        # TODO(synk): nn.Dropout(0.9) — identity in eval mode, no RNG applied here.
        prod_h = jnp.maximum(p1 * p2, 0.0)
        prod_i = jnp.maximum(v1 * v2, 0.0)
        y = (jnp.sum(prod_h * fc_wh_ref[...], axis=-1, keepdims=True)
             + jnp.sum(prod_i * fc_wi_ref[...], axis=-1, keepdims=True)
             + fc_b_ref[...])                                          # (bb, 1)
        # lane-dense (unmasked) store; wrapper slices lane 0
        out_ref[...] = jnp.broadcast_to(y.reshape(1, pairs, 1), (1, pairs, 128))


# ------------------------------ Model forward --------------------------------

def model_forward(params, sentence, *, block_pairs=None):
    (context1, _seq1, mask1, item_ids1), (context2, _seq2, mask2, item_ids2) = sentence
    bert = params["bert"]
    B, S = context1.shape
    H = bert["word_emb"].shape[1]
    n_heads = params["num_heads"]
    n_layers = len(bert["layers"])
    i2v_dim = params["item2vec"].shape[1]
    eps = 1e-12

    bb = block_pairs if block_pairs is not None else min(B, 8)
    assert B % bb == 0, "batch must be divisible by the pair-block size"
    nb = B // bb

    # ---- embeddings: XLA row gathers (no one-hot, no VMEM-resident tables) ----
    def embed(ids):
        ids = ids.astype(jnp.int32)
        x = (jnp.take(bert["word_emb"], ids, axis=0)
             + bert["pos_emb"][None, :S, :]
             + bert["type_emb"][0][None, None, :])
        mu = jnp.mean(x, axis=-1, keepdims=True)
        var = jnp.mean((x - mu) ** 2, axis=-1, keepdims=True)
        return ((x - mu) * jax.lax.rsqrt(var + eps)
                * bert["emb_ln_g"] + bert["emb_ln_b"]).astype(jnp.float32)

    x1, x2 = embed(context1), embed(context2)

    def mask_bias(m):
        mb = ((1.0 - m.astype(jnp.float32)) * -1e4)[:, None, :]    # (B,1,S)
        return jnp.broadcast_to(mb, (B, S, S))                     # hoisted broadcast

    mb1, mb2 = mask_bias(mask1), mask_bias(mask2)
    i2v1 = jnp.take(params["item2vec"], item_ids1.astype(jnp.int32), axis=0)
    i2v2 = jnp.take(params["item2vec"], item_ids2.astype(jnp.int32), axis=0)

    # ---- interleave so each grid block holds [bb sentence-1 ; bb sentence-2] ----
    def pair_block(a1, a2):
        a1 = a1.reshape((nb, bb) + a1.shape[1:])
        a2 = a2.reshape((nb, bb) + a2.shape[1:])
        return jnp.concatenate([a1, a2], axis=1).reshape((2 * B,) + a1.shape[2:])

    x0 = pair_block(x1, x2)                        # (2B, S, H)
    mask3 = pair_block(mb1, mb2)                   # (2B, S, S)
    i2v = pair_block(i2v1, i2v2)[:, None, :]       # (2B, 1, I)

    # ---- per-layer weight stacking; fold 1/sqrt(hd) into Wq/bq; bf16 MXU ops ----
    scale = 1.0 / math.sqrt(H // n_heads)

    def stack(key):
        return jnp.stack([lyr[key] for lyr in bert["layers"]])

    w_qkv = jnp.concatenate([stack("wq") * scale, stack("wk"), stack("wv")],
                            axis=2).astype(jnp.bfloat16)               # (L,H,3H)
    b_qkv = jnp.concatenate([stack("bq") * scale, stack("bk"), stack("bv")],
                            axis=1)[:, None, :]                        # (L,1,3H) f32
    wo = stack("wo").astype(jnp.bfloat16)
    bo = stack("bo")[:, None, :]
    ln1_g = stack("ln1_g")[:, None, :]; ln1_b = stack("ln1_b")[:, None, :]
    w1 = stack("w1").astype(jnp.bfloat16); b1 = stack("b1")[:, None, :]
    w2 = stack("w2").astype(jnp.bfloat16); b2 = stack("b2")[:, None, :]
    ln2_g = stack("ln2_g")[:, None, :]; ln2_b = stack("ln2_b")[:, None, :]

    pool_w = bert["pool_w"].astype(jnp.bfloat16)
    pool_b = bert["pool_b"].reshape(1, H)
    fc_w = params["fc_w"]                                              # (H + I, 1)
    fc_wh = fc_w[:H, 0].reshape(1, H)
    fc_wi = fc_w[H:, 0].reshape(1, i2v_dim)
    fc_b = params["fc_b"].reshape(1, 1)

    rows = 2 * bb * S

    # block-spec helpers: batch-blocked inputs, layer-streamed weights, constants
    def batch_spec(a):
        nd = a.ndim
        return pl.BlockSpec((2 * bb,) + a.shape[1:],
                            lambda i, l, _nd=nd: (i,) + (0,) * (_nd - 1))

    def layer_spec(a):
        nd = a.ndim
        return pl.BlockSpec((1,) + a.shape[1:],
                            lambda i, l, _nd=nd: (l,) + (0,) * (_nd - 1))

    def const_spec(a):
        nd = a.ndim
        return pl.BlockSpec(a.shape, lambda i, l, _nd=nd: (0,) * _nd)

    in_specs = [
        batch_spec(x0), batch_spec(mask3), batch_spec(i2v),
        layer_spec(w_qkv), layer_spec(b_qkv), layer_spec(wo), layer_spec(bo),
        layer_spec(ln1_g), layer_spec(ln1_b),
        layer_spec(w1), layer_spec(b1), layer_spec(w2), layer_spec(b2),
        layer_spec(ln2_g), layer_spec(ln2_b),
        const_spec(pool_w), const_spec(pool_b),
        const_spec(fc_wh), const_spec(fc_wi), const_spec(fc_b),
    ]

    kernel = functools.partial(
        _encoder_head_kernel, pairs=bb, seq=S, hidden=H, n_heads=n_heads,
        n_layers=n_layers, i2v_dim=i2v_dim, eps=eps)

    out = pl.pallas_call(
        kernel,
        out_shape=jax.ShapeDtypeStruct((nb, bb, 128), jnp.float32),
        grid=(nb, n_layers),
        in_specs=in_specs,
        out_specs=pl.BlockSpec((1, bb, 128), lambda i, l: (i, 0, 0)),
        scratch_shapes=[pltpu.VMEM((rows, H), jnp.float32)],
        compiler_params=pltpu.CompilerParams(
            dimension_semantics=("parallel", "arbitrary"),
            vmem_limit_bytes=48 * 1024 * 1024),
    )(x0, mask3, i2v,
      w_qkv, b_qkv, wo, bo, ln1_g, ln1_b, w1, b1, w2, b2, ln2_g, ln2_b,
      pool_w, pool_b, fc_wh, fc_wi, fc_b)

    return out[:, :, 0].reshape(B)                                     # (B,)


# ------------------------------- Param init ---------------------------------

def init_params(key, *, vocab=512, hidden=128, n_layers=3, n_heads=4,
                inter=512, max_pos=16, type_vocab=2, item_vocab=64, i2v_dim=32):
    def nxt():
        nonlocal key
        key, sub = jax.random.split(key)
        return sub

    def w(shape, scale=0.02):
        return scale * jax.random.normal(nxt(), shape, jnp.float32)

    bert = {
        "word_emb": w((vocab, hidden)),
        "pos_emb": w((max_pos, hidden)),
        "type_emb": w((type_vocab, hidden)),
        "emb_ln_g": jnp.ones((hidden,), jnp.float32),
        "emb_ln_b": jnp.zeros((hidden,), jnp.float32),
        "pool_w": w((hidden, hidden)),
        "pool_b": jnp.zeros((hidden,), jnp.float32),
        "layers": [],
    }
    for _ in range(n_layers):
        bert["layers"].append({
            "wq": w((hidden, hidden)), "bq": jnp.zeros((hidden,), jnp.float32),
            "wk": w((hidden, hidden)), "bk": jnp.zeros((hidden,), jnp.float32),
            "wv": w((hidden, hidden)), "bv": jnp.zeros((hidden,), jnp.float32),
            "wo": w((hidden, hidden)), "bo": jnp.zeros((hidden,), jnp.float32),
            "ln1_g": jnp.ones((hidden,), jnp.float32),
            "ln1_b": jnp.zeros((hidden,), jnp.float32),
            "w1": w((hidden, inter)), "b1": jnp.zeros((inter,), jnp.float32),
            "w2": w((inter, hidden)), "b2": jnp.zeros((hidden,), jnp.float32),
            "ln2_g": jnp.ones((hidden,), jnp.float32),
            "ln2_b": jnp.zeros((hidden,), jnp.float32),
        })

    params = {
        "bert": bert,
        "num_heads": n_heads,
        "item2vec": w((item_vocab, i2v_dim), scale=0.1),   # frozen pretrained table
        "fc_w": w((hidden + i2v_dim, 1)),
        "fc_b": jnp.zeros((1,), jnp.float32),
    }
    return params


# ---------------------------------- main -------------------------------------

if __name__ == "__main__":
    params = init_params(jax.random.PRNGKey(0))

    B, S = 4, 8
    k1, k2, k3, k4 = jax.random.split(jax.random.PRNGKey(0), 4)
    context1 = jax.random.randint(k1, (B, S), 0, 512, dtype=jnp.int32)
    context2 = jax.random.randint(k2, (B, S), 0, 512, dtype=jnp.int32)
    seq_len1 = jnp.full((B,), S, jnp.int32)                # unused slot [1]
    seq_len2 = jnp.full((B,), S, jnp.int32)
    mask1 = jnp.ones((B, S), jnp.int32).at[1, 6:].set(0)   # pad last 2 of row 1
    mask2 = jnp.ones((B, S), jnp.int32).at[0, 7:].set(0)
    item_ids1 = jax.random.randint(k3, (B,), 0, 64, dtype=jnp.int32)
    item_ids2 = jax.random.randint(k4, (B,), 0, 64, dtype=jnp.int32)

    sentence = ((context1, seq_len1, mask1, item_ids1),
                (context2, seq_len2, mask2, item_ids2))

    out = model_forward(params, sentence, block_pairs=2)
    out = jax.block_until_ready(out)
    assert out.shape == (B,)
    assert bool(jnp.all(jnp.isfinite(out)))
    print("KERNEL_OK")
</pallas_src>

<mosaic_0001>
module attributes {stable_mosaic.version = 11 : i64} {
  func.func @_encoder_head_kernel(%arg0: i32, %arg1: i32, %arg2: memref<4x8x128xf32, #tpu.memory_space<vmem>>, %arg3: memref<4x8x8xf32, #tpu.memory_space<vmem>>, %arg4: memref<4x1x32xf32, #tpu.memory_space<vmem>>, %arg5: memref<1x128x384xbf16, #tpu.memory_space<vmem>>, %arg6: memref<1x1x384xf32, #tpu.memory_space<vmem>>, %arg7: memref<1x128x128xbf16, #tpu.memory_space<vmem>>, %arg8: memref<1x1x128xf32, #tpu.memory_space<vmem>>, %arg9: memref<1x1x128xf32, #tpu.memory_space<vmem>>, %arg10: memref<1x1x128xf32, #tpu.memory_space<vmem>>, %arg11: memref<1x128x512xbf16, #tpu.memory_space<vmem>>, %arg12: memref<1x1x512xf32, #tpu.memory_space<vmem>>, %arg13: memref<1x512x128xbf16, #tpu.memory_space<vmem>>, %arg14: memref<1x1x128xf32, #tpu.memory_space<vmem>>, %arg15: memref<1x1x128xf32, #tpu.memory_space<vmem>>, %arg16: memref<1x1x128xf32, #tpu.memory_space<vmem>>, %arg17: memref<128x128xbf16, #tpu.memory_space<vmem>>, %arg18: memref<1x128xf32, #tpu.memory_space<vmem>>, %arg19: memref<1x128xf32, #tpu.memory_space<vmem>>, %arg20: memref<1x32xf32, #tpu.memory_space<vmem>>, %arg21: memref<1x1xf32, #tpu.memory_space<vmem>>, %arg22: memref<1x2x128xf32, #tpu.memory_space<vmem>>, %arg23: memref<32x128xf32, #tpu.memory_space<vmem>>) attributes {dimension_semantics = [#tpu.dimension_semantics<parallel>, #tpu.dimension_semantics<arbitrary>], iteration_bounds = array<i64: 2, 3>, scalar_prefetch = 0 : i64, scratch_operands = 1 : i64, tpu.core_type = #tpu.core_type<tc>, window_params = [{transform_indices = @transform_0, window_bounds = array<i64: 4, 8, 128>}, {transform_indices = @transform_1, window_bounds = array<i64: 4, 8, 8>}, {transform_indices = @transform_2, window_bounds = array<i64: 4, 1, 32>}, {transform_indices = @transform_3, window_bounds = array<i64: 1, 128, 384>}, {transform_indices = @transform_4, window_bounds = array<i64: 1, 1, 384>}, {transform_indices = @transform_5, window_bounds = array<i64: 1, 128, 128>}, {transform_indices = @transform_6, window_bounds = array<i64: 1, 1, 128>}, {transform_indices = @transform_7, window_bounds = array<i64: 1, 1, 128>}, {transform_indices = @transform_8, window_bounds = array<i64: 1, 1, 128>}, {transform_indices = @transform_9, window_bounds = array<i64: 1, 128, 512>}, {transform_indices = @transform_10, window_bounds = array<i64: 1, 1, 512>}, {transform_indices = @transform_11, window_bounds = array<i64: 1, 512, 128>}, {transform_indices = @transform_12, window_bounds = array<i64: 1, 1, 128>}, {transform_indices = @transform_13, window_bounds = array<i64: 1, 1, 128>}, {transform_indices = @transform_14, window_bounds = array<i64: 1, 1, 128>}, {pipeline_mode = #tpu.pipeline_mode<synchronous>, transform_indices = @transform_15, window_bounds = array<i64: 128, 128>}, {pipeline_mode = #tpu.pipeline_mode<synchronous>, transform_indices = @transform_16, window_bounds = array<i64: 1, 128>}, {pipeline_mode = #tpu.pipeline_mode<synchronous>, transform_indices = @transform_17, window_bounds = array<i64: 1, 128>}, {pipeline_mode = #tpu.pipeline_mode<synchronous>, transform_indices = @transform_18, window_bounds = array<i64: 1, 32>}, {pipeline_mode = #tpu.pipeline_mode<synchronous>, transform_indices = @transform_19, window_bounds = array<i64: 1, 1>}, {transform_indices = @transform_20, window_bounds = array<i64: 1, 2, 128>}]} {
    %c0_i32 = arith.constant 0 : i32
    %0 = arith.cmpi eq, %arg1, %c0_i32 : i32
    %1 = arith.extui %0 : i1 to i32
    %c0_i32_0 = arith.constant 0 : i32
    %2 = arith.cmpi ne, %1, %c0_i32_0 : i32
    scf.if %2 {
      %c0_77 = arith.constant 0 : index
      %c0_78 = arith.constant 0 : index
      %c0_79 = arith.constant 0 : index
      %202 = vector.load %arg2[%c0_77, %c0_78, %c0_79] : memref<4x8x128xf32, #tpu.memory_space<vmem>>, vector<4x8x128xf32>
      %203 = vector.shape_cast %202 : vector<4x8x128xf32> to vector<32x128xf32>
      %c0_80 = arith.constant 0 : index
      %c0_81 = arith.constant 0 : index
      %204 = vector.load %arg23[%c0_80, %c0_81] : memref<32x128xf32, #tpu.memory_space<vmem>>, vector<32x128xf32>
      tpu.vector_store %arg23[%c0_80, %c0_81], %203 {strides = array<i32>} : memref<32x128xf32, #tpu.memory_space<vmem>>, vector<32x128xf32>,
    } else {
    }
    %c0 = arith.constant 0 : index
    %c0_1 = arith.constant 0 : index
    %3 = vector.load %arg23[%c0, %c0_1] : memref<32x128xf32, #tpu.memory_space<vmem>>, vector<32x128xf32>
    %c0_2 = arith.constant 0 : index
    %c0_3 = arith.constant 0 : index
    %c0_4 = arith.constant 0 : index
    %4 = vector.load %arg3[%c0_2, %c0_3, %c0_4] : memref<4x8x8xf32, #tpu.memory_space<vmem>>, vector<4x8x8xf32>
    %5 = arith.truncf %3 : vector<32x128xf32> to vector<32x128xbf16>
    %c0_5 = arith.constant 0 : index
    %c0_6 = arith.constant 0 : index
    %c0_7 = arith.constant 0 : index
    %6 = vector.load %arg5[%c0_5, %c0_6, %c0_7] : memref<1x128x384xbf16, #tpu.memory_space<vmem>>, vector<1x128x384xbf16>
    %7 = vector.shape_cast %6 : vector<1x128x384xbf16> to vector<128x384xbf16>
    %cst = arith.constant dense<0.000000e+00> : vector<32x384xf32>
    %8 = tpu.matmul %5, %7, %cst {dimension_numbers = #tpu.dot_dimension_numbers<[1], [0], [0], [1], [0, 0, 1, 1], [], []>} : vector<32x128xbf16>, vector<128x384xbf16>, vector<32x384xf32> -> vector<32x384xf32>
    %c0_8 = arith.constant 0 : index
    %c0_9 = arith.constant 0 : index
    %c0_10 = arith.constant 0 : index
    %9 = vector.load %arg6[%c0_8, %c0_9, %c0_10] : memref<1x1x384xf32, #tpu.memory_space<vmem>>, vector<1x1x384xf32>
    %10 = vector.shape_cast %9 : vector<1x1x384xf32> to vector<1x384xf32>
    %11 = vector.broadcast %10 : vector<1x384xf32> to vector<32x384xf32>
    %12 = arith.addf %8, %11 : vector<32x384xf32>
    %13 = vector.extract_strided_slice %12 {offsets = [0, 0], sizes = [32, 32], strides = [1, 1]} : vector<32x384xf32> to vector<32x32xf32>
    %14 = arith.truncf %13 : vector<32x32xf32> to vector<32x32xbf16>
    %15 = vector.shape_cast %14 : vector<32x32xbf16> to vector<4x8x32xbf16>
    %16 = vector.extract_strided_slice %12 {offsets = [0, 128], sizes = [32, 32], strides = [1, 1]} : vector<32x384xf32> to vector<32x32xf32>
    %17 = arith.truncf %16 : vector<32x32xf32> to vector<32x32xbf16>
    %18 = vector.shape_cast %17 : vector<32x32xbf16> to vector<4x8x32xbf16>
    %19 = vector.extract_strided_slice %12 {offsets = [0, 256], sizes = [32, 32], strides = [1, 1]} : vector<32x384xf32> to vector<32x32xf32>
    %20 = arith.truncf %19 : vector<32x32xf32> to vector<32x32xbf16>
    %21 = vector.shape_cast %20 : vector<32x32xbf16> to vector<4x8x32xbf16>
    "tpu.trace_start"() <{level = 10 : i32, message = "bqd,bkd->bqk"}> : () -> ()
    %cst_11 = arith.constant dense<0.000000e+00> : vector<4x8x8xf32>
    %22 = tpu.matmul %15, %18, %cst_11 {dimension_numbers = #tpu.dot_dimension_numbers<[2], [2], [1], [1], [0, 0, 0, 1, 1, 1], [0], [0]>} : vector<4x8x32xbf16>, vector<4x8x32xbf16>, vector<4x8x8xf32> -> vector<4x8x8xf32>
    "tpu.trace_stop"() : () -> ()
    %23 = arith.addf %22, %4 : vector<4x8x8xf32>
    %cst_12 = arith.constant dense<0xFF800000> : vector<4x8xf32>
    %24 = vector.multi_reduction <maximumf>, %23, %cst_12 [2] : vector<4x8x8xf32> to vector<4x8xf32>
    %25 = vector.shape_cast %24 : vector<4x8xf32> to vector<4x8x1xf32>
    %26 = vector.broadcast %25 : vector<4x8x1xf32> to vector<4x8x8xf32>
    %27 = arith.subf %23, %26 : vector<4x8x8xf32>
    %28 = math.exp %27 : vector<4x8x8xf32>
    %cst_13 = arith.constant dense<0.000000e+00> : vector<4x8xf32>
    %29 = vector.multi_reduction <add>, %28, %cst_13 [2] : vector<4x8x8xf32> to vector<4x8xf32>
    %30 = vector.shape_cast %29 : vector<4x8xf32> to vector<4x8x1xf32>
    %31 = tpu.reciprocal %30 {approx = true} : vector<4x8x1xf32> -> vector<4x8x1xf32>
    %32 = vector.broadcast %31 : vector<4x8x1xf32> to vector<4x8x8xf32>
    %33 = arith.mulf %28, %32 : vector<4x8x8xf32>
    %34 = arith.truncf %33 : vector<4x8x8xf32> to vector<4x8x8xbf16>
    "tpu.trace_start"() <{level = 10 : i32, message = "bqk,bkd->bqd"}> : () -> ()
    %cst_14 = arith.constant dense<0.000000e+00> : vector<4x8x32xf32>
    %35 = tpu.matmul %34, %21, %cst_14 {dimension_numbers = #tpu.dot_dimension_numbers<[2], [1], [1], [2], [0, 0, 0, 1, 1, 2], [0], [0]>} : vector<4x8x8xbf16>, vector<4x8x32xbf16>, vector<4x8x32xf32> -> vector<4x8x32xf32>
    "tpu.trace_stop"() : () -> ()
    %36 = vector.extract_strided_slice %12 {offsets = [0, 32], sizes = [32, 32], strides = [1, 1]} : vector<32x384xf32> to vector<32x32xf32>
    %37 = arith.truncf %36 : vector<32x32xf32> to vector<32x32xbf16>
    %38 = vector.shape_cast %37 : vector<32x32xbf16> to vector<4x8x32xbf16>
    %39 = vector.extract_strided_slice %12 {offsets = [0, 160], sizes = [32, 32], strides = [1, 1]} : vector<32x384xf32> to vector<32x32xf32>
    %40 = arith.truncf %39 : vector<32x32xf32> to vector<32x32xbf16>
    %41 = vector.shape_cast %40 : vector<32x32xbf16> to vector<4x8x32xbf16>
    %42 = vector.extract_strided_slice %12 {offsets = [0, 288], sizes = [32, 32], strides = [1, 1]} : vector<32x384xf32> to vector<32x32xf32>
    %43 = arith.truncf %42 : vector<32x32xf32> to vector<32x32xbf16>
    %44 = vector.shape_cast %43 : vector<32x32xbf16> to vector<4x8x32xbf16>
    "tpu.trace_start"() <{level = 10 : i32, message = "bqd,bkd->bqk"}> : () -> ()
    %cst_15 = arith.constant dense<0.000000e+00> : vector<4x8x8xf32>
    %45 = tpu.matmul %38, %41, %cst_15 {dimension_numbers = #tpu.dot_dimension_numbers<[2], [2], [1], [1], [0, 0, 0, 1, 1, 1], [0], [0]>} : vector<4x8x32xbf16>, vector<4x8x32xbf16>, vector<4x8x8xf32> -> vector<4x8x8xf32>
    "tpu.trace_stop"() : () -> ()
    %46 = arith.addf %45, %4 : vector<4x8x8xf32>
    %cst_16 = arith.constant dense<0xFF800000> : vector<4x8xf32>
    %47 = vector.multi_reduction <maximumf>, %46, %cst_16 [2] : vector<4x8x8xf32> to vector<4x8xf32>
    %48 = vector.shape_cast %47 : vector<4x8xf32> to vector<4x8x1xf32>
    %49 = vector.broadcast %48 : vector<4x8x1xf32> to vector<4x8x8xf32>
    %50 = arith.subf %46, %49 : vector<4x8x8xf32>
    %51 = math.exp %50 : vector<4x8x8xf32>
    %cst_17 = arith.constant dense<0.000000e+00> : vector<4x8xf32>
    %52 = vector.multi_reduction <add>, %51, %cst_17 [2] : vector<4x8x8xf32> to vector<4x8xf32>
    %53 = vector.shape_cast %52 : vector<4x8xf32> to vector<4x8x1xf32>
    %54 = tpu.reciprocal %53 {approx = true} : vector<4x8x1xf32> -> vector<4x8x1xf32>
    %55 = vector.broadcast %54 : vector<4x8x1xf32> to vector<4x8x8xf32>
    %56 = arith.mulf %51, %55 : vector<4x8x8xf32>
    %57 = arith.truncf %56 : vector<4x8x8xf32> to vector<4x8x8xbf16>
    "tpu.trace_start"() <{level = 10 : i32, message = "bqk,bkd->bqd"}> : () -> ()
    %cst_18 = arith.constant dense<0.000000e+00> : vector<4x8x32xf32>
    %58 = tpu.matmul %57, %44, %cst_18 {dimension_numbers = #tpu.dot_dimension_numbers<[2], [1], [1], [2], [0, 0, 0, 1, 1, 2], [0], [0]>} : vector<4x8x8xbf16>, vector<4x8x32xbf16>, vector<4x8x32xf32> -> vector<4x8x32xf32>
    "tpu.trace_stop"() : () -> ()
    %59 = vector.extract_strided_slice %12 {offsets = [0, 64], sizes = [32, 32], strides = [1, 1]} : vector<32x384xf32> to vector<32x32xf32>
    %60 = arith.truncf %59 : vector<32x32xf32> to vector<32x32xbf16>
    %61 = vector.shape_cast %60 : vector<32x32xbf16> to vector<4x8x32xbf16>
    %62 = vector.extract_strided_slice %12 {offsets = [0, 192], sizes = [32, 32], strides = [1, 1]} : vector<32x384xf32> to vector<32x32xf32>
    %63 = arith.truncf %62 : vector<32x32xf32> to vector<32x32xbf16>
    %64 = vector.shape_cast %63 : vector<32x32xbf16> to vector<4x8x32xbf16>
    %65 = vector.extract_strided_slice %12 {offsets = [0, 320], sizes = [32, 32], strides = [1, 1]} : vector<32x384xf32> to vector<32x32xf32>
    %66 = arith.truncf %65 : vector<32x32xf32> to vector<32x32xbf16>
    %67 = vector.shape_cast %66 : vector<32x32xbf16> to vector<4x8x32xbf16>
    "tpu.trace_start"() <{level = 10 : i32, message = "bqd,bkd->bqk"}> : () -> ()
    %cst_19 = arith.constant dense<0.000000e+00> : vector<4x8x8xf32>
    %68 = tpu.matmul %61, %64, %cst_19 {dimension_numbers = #tpu.dot_dimension_numbers<[2], [2], [1], [1], [0, 0, 0, 1, 1, 1], [0], [0]>} : vector<4x8x32xbf16>, vector<4x8x32xbf16>, vector<4x8x8xf32> -> vector<4x8x8xf32>
    "tpu.trace_stop"() : () -> ()
    %69 = arith.addf %68, %4 : vector<4x8x8xf32>
    %cst_20 = arith.constant dense<0xFF800000> : vector<4x8xf32>
    %70 = vector.multi_reduction <maximumf>, %69, %cst_20 [2] : vector<4x8x8xf32> to vector<4x8xf32>
    %71 = vector.shape_cast %70 : vector<4x8xf32> to vector<4x8x1xf32>
    %72 = vector.broadcast %71 : vector<4x8x1xf32> to vector<4x8x8xf32>
    %73 = arith.subf %69, %72 : vector<4x8x8xf32>
    %74 = math.exp %73 : vector<4x8x8xf32>
    %cst_21 = arith.constant dense<0.000000e+00> : vector<4x8xf32>
    %75 = vector.multi_reduction <add>, %74, %cst_21 [2] : vector<4x8x8xf32> to vector<4x8xf32>
    %76 = vector.shape_cast %75 : vector<4x8xf32> to vector<4x8x1xf32>
    %77 = tpu.reciprocal %76 {approx = true} : vector<4x8x1xf32> -> vector<4x8x1xf32>
    %78 = vector.broadcast %77 : vector<4x8x1xf32> to vector<4x8x8xf32>
    %79 = arith.mulf %74, %78 : vector<4x8x8xf32>
    %80 = arith.truncf %79 : vector<4x8x8xf32> to vector<4x8x8xbf16>
    "tpu.trace_start"() <{level = 10 : i32, message = "bqk,bkd->bqd"}> : () -> ()
    %cst_22 = arith.constant dense<0.000000e+00> : vector<4x8x32xf32>
    %81 = tpu.matmul %80, %67, %cst_22 {dimension_numbers = #tpu.dot_dimension_numbers<[2], [1], [1], [2], [0, 0, 0, 1, 1, 2], [0], [0]>} : vector<4x8x8xbf16>, vector<4x8x32xbf16>, vector<4x8x32xf32> -> vector<4x8x32xf32>
    "tpu.trace_stop"() : () -> ()
    %82 = vector.extract_strided_slice %12 {offsets = [0, 96], sizes = [32, 32], strides = [1, 1]} : vector<32x384xf32> to vector<32x32xf32>
    %83 = arith.truncf %82 : vector<32x32xf32> to vector<32x32xbf16>
    %84 = vector.shape_cast %83 : vector<32x32xbf16> to vector<4x8x32xbf16>
    %85 = vector.extract_strided_slice %12 {offsets = [0, 224], sizes = [32, 32], strides = [1, 1]} : vector<32x384xf32> to vector<32x32xf32>
    %86 = arith.truncf %85 : vector<32x32xf32> to vector<32x32xbf16>
    %87 = vector.shape_cast %86 : vector<32x32xbf16> to vector<4x8x32xbf16>
    %88 = vector.extract_strided_slice %12 {offsets = [0, 352], sizes = [32, 32], strides = [1, 1]} : vector<32x384xf32> to vector<32x32xf32>
    %89 = arith.truncf %88 : vector<32x32xf32> to vector<32x32xbf16>
    %90 = vector.shape_cast %89 : vector<32x32xbf16> to vector<4x8x32xbf16>
    "tpu.trace_start"() <{level = 10 : i32, message = "bqd,bkd->bqk"}> : () -> ()
    %cst_23 = arith.constant dense<0.000000e+00> : vector<4x8x8xf32>
    %91 = tpu.matmul %84, %87, %cst_23 {dimension_numbers = #tpu.dot_dimension_numbers<[2], [2], [1], [1], [0, 0, 0, 1, 1, 1], [0], [0]>} : vector<4x8x32xbf16>, vector<4x8x32xbf16>, vector<4x8x8xf32> -> vector<4x8x8xf32>
    "tpu.trace_stop"() : () -> ()
    %92 = arith.addf %91, %4 : vector<4x8x8xf32>
    %cst_24 = arith.constant dense<0xFF800000> : vector<4x8xf32>
    %93 = vector.multi_reduction <maximumf>, %92, %cst_24 [2] : vector<4x8x8xf32> to vector<4x8xf32>
    %94 = vector.shape_cast %93 : vector<4x8xf32> to vector<4x8x1xf32>
    %95 = vector.broadcast %94 : vector<4x8x1xf32> to vector<4x8x8xf32>
    %96 = arith.subf %92, %95 : vector<4x8x8xf32>
    %97 = math.exp %96 : vector<4x8x8xf32>
    %cst_25 = arith.constant dense<0.000000e+00> : vector<4x8xf32>
    %98 = vector.multi_reduction <add>, %97, %cst_25 [2] : vector<4x8x8xf32> to vector<4x8xf32>
    %99 = vector.shape_cast %98 : vector<4x8xf32> to vector<4x8x1xf32>
    %100 = tpu.reciprocal %99 {approx = true} : vector<4x8x1xf32> -> vector<4x8x1xf32>
    %101 = vector.broadcast %100 : vector<4x8x1xf32> to vector<4x8x8xf32>
    %102 = arith.mulf %97, %101 : vector<4x8x8xf32>
    %103 = arith.truncf %102 : vector<4x8x8xf32> to vector<4x8x8xbf16>
    "tpu.trace_start"() <{level = 10 : i32, message = "bqk,bkd->bqd"}> : () -> ()
    %cst_26 = arith.constant dense<0.000000e+00> : vector<4x8x32xf32>
    %104 = tpu.matmul %103, %90, %cst_26 {dimension_numbers = #tpu.dot_dimension_numbers<[2], [1], [1], [2], [0, 0, 0, 1, 1, 2], [0], [0]>} : vector<4x8x8xbf16>, vector<4x8x32xbf16>, vector<4x8x32xf32> -> vector<4x8x32xf32>
    "tpu.trace_stop"() : () -> ()
    %105 = tpu.concatenate %35, %58, %81, %104 in 2 : vector<4x8x32xf32>, vector<4x8x32xf32>, vector<4x8x32xf32>, vector<4x8x32xf32> -> vector<4x8x128xf32>
    %106 = vector.shape_cast %105 : vector<4x8x128xf32> to vector<32x128xf32>
    %107 = arith.truncf %106 : vector<32x128xf32> to vector<32x128xbf16>
    %c0_27 = arith.constant 0 : index
    %c0_28 = arith.constant 0 : index
    %c0_29 = arith.constant 0 : index
    %108 = vector.load %arg7[%c0_27, %c0_28, %c0_29] : memref<1x128x128xbf16, #tpu.memory_space<vmem>>, vector<1x128x128xbf16>
    %109 = vector.shape_cast %108 : vector<1x128x128xbf16> to vector<128x128xbf16>
    %cst_30 = arith.constant dense<0.000000e+00> : vector<32x128xf32>
    %110 = tpu.matmul %107, %109, %cst_30 {dimension_numbers = #tpu.dot_dimension_numbers<[1], [0], [0], [1], [0, 0, 1, 1], [], []>} : vector<32x128xbf16>, vector<128x128xbf16>, vector<32x128xf32> -> vector<32x128xf32>
    %c0_31 = arith.constant 0 : index
    %c0_32 = arith.constant 0 : index
    %c0_33 = arith.constant 0 : index
    %111 = vector.load %arg8[%c0_31, %c0_32, %c0_33] : memref<1x1x128xf32, #tpu.memory_space<vmem>>, vector<1x1x128xf32>
    %112 = vector.shape_cast %111 : vector<1x1x128xf32> to vector<1x128xf32>
    %113 = vector.broadcast %112 : vector<1x128xf32> to vector<32x128xf32>
    %114 = arith.addf %110, %113 : vector<32x128xf32>
    %115 = arith.addf %3, %114 : vector<32x128xf32>
    %c0_34 = arith.constant 0 : index
    %c0_35 = arith.constant 0 : index
    %c0_36 = arith.constant 0 : index
    %116 = vector.load %arg9[%c0_34, %c0_35, %c0_36] : memref<1x1x128xf32, #tpu.memory_space<vmem>>, vector<1x1x128xf32>
    %117 = vector.shape_cast %116 : vector<1x1x128xf32> to vector<1x128xf32>
    %c0_37 = arith.constant 0 : index
    %c0_38 = arith.constant 0 : index
    %c0_39 = arith.constant 0 : index
    %118 = vector.load %arg10[%c0_37, %c0_38, %c0_39] : memref<1x1x128xf32, #tpu.memory_space<vmem>>, vector<1x1x128xf32>
    %119 = vector.shape_cast %118 : vector<1x1x128xf32> to vector<1x128xf32>
    %cst_40 = arith.constant dense<0.000000e+00> : vector<32xf32>
    %120 = vector.multi_reduction <add>, %115, %cst_40 [1] : vector<32x128xf32> to vector<32xf32>
    %121 = vector.shape_cast %120 : vector<32xf32> to vector<32x1xf32>
    %cst_41 = arith.constant 1.280000e+02 : f32
    %122 = vector.broadcast %cst_41 : f32 to vector<32x1xf32>
    %123 = arith.divf %121, %122 : vector<32x1xf32>
    %124 = vector.broadcast %123 : vector<32x1xf32> to vector<32x128xf32>
    %125 = arith.subf %115, %124 : vector<32x128xf32>
    %126 = arith.mulf %125, %125 : vector<32x128xf32>
    %cst_42 = arith.constant dense<0.000000e+00> : vector<32xf32>
    %127 = vector.multi_reduction <add>, %126, %cst_42 [1] : vector<32x128xf32> to vector<32xf32>
    %128 = vector.shape_cast %127 : vector<32xf32> to vector<32x1xf32>
    %cst_43 = arith.constant 1.280000e+02 : f32
    %129 = vector.broadcast %cst_43 : f32 to vector<32x1xf32>
    %130 = arith.divf %128, %129 : vector<32x1xf32>
    %131 = vector.broadcast %123 : vector<32x1xf32> to vector<32x128xf32>
    %132 = arith.subf %115, %131 : vector<32x128xf32>
    %cst_44 = arith.constant 9.99999996E-13 : f32
    %133 = vector.broadcast %cst_44 : f32 to vector<32x1xf32>
    %134 = arith.addf %130, %133 : vector<32x1xf32>
    %135 = math.rsqrt %134 : vector<32x1xf32>
    %136 = vector.broadcast %135 : vector<32x1xf32> to vector<32x128xf32>
    %137 = arith.mulf %132, %136 : vector<32x128xf32>
    %138 = vector.broadcast %117 : vector<1x128xf32> to vector<32x128xf32>
    %139 = arith.mulf %137, %138 : vector<32x128xf32>
    %140 = vector.broadcast %119 : vector<1x128xf32> to vector<32x128xf32>
    %141 = arith.addf %139, %140 : vector<32x128xf32>
    %142 = arith.truncf %141 : vector<32x128xf32> to vector<32x128xbf16>
    %c0_45 = arith.constant 0 : index
    %c0_46 = arith.constant 0 : index
    %c0_47 = arith.constant 0 : index
    %143 = vector.load %arg11[%c0_45, %c0_46, %c0_47] : memref<1x128x512xbf16, #tpu.memory_space<vmem>>, vector<1x128x512xbf16>
    %144 = vector.shape_cast %143 : vector<1x128x512xbf16> to vector<128x512xbf16>
    %cst_48 = arith.constant dense<0.000000e+00> : vector<32x512xf32>
    %145 = tpu.matmul %142, %144, %cst_48 {dimension_numbers = #tpu.dot_dimension_numbers<[1], [0], [0], [1], [0, 0, 1, 1], [], []>} : vector<32x128xbf16>, vector<128x512xbf16>, vector<32x512xf32> -> vector<32x512xf32>
    %c0_49 = arith.constant 0 : index
    %c0_50 = arith.constant 0 : index
    %c0_51 = arith.constant 0 : index
    %146 = vector.load %arg12[%c0_49, %c0_50, %c0_51] : memref<1x1x512xf32, #tpu.memory_space<vmem>>, vector<1x1x512xf32>
    %147 = vector.shape_cast %146 : vector<1x1x512xf32> to vector<1x512xf32>
    %148 = vector.broadcast %147 : vector<1x512xf32> to vector<32x512xf32>
    %149 = arith.addf %145, %148 : vector<32x512xf32>
    %150 = arith.mulf %149, %149 : vector<32x512xf32>
    %151 = arith.mulf %149, %150 : vector<32x512xf32>
    %cst_52 = arith.constant 4.471500e-02 : f32
    %152 = vector.broadcast %cst_52 : f32 to vector<32x512xf32>
    %153 = arith.mulf %152, %151 : vector<32x512xf32>
    %154 = arith.addf %149, %153 : vector<32x512xf32>
    %cst_53 = arith.constant 0.797884583 : f32
    %155 = vector.broadcast %cst_53 : f32 to vector<32x512xf32>
    %156 = arith.mulf %155, %154 : vector<32x512xf32>
    %157 = math.tanh %156 : vector<32x512xf32>
    %cst_54 = arith.constant 1.000000e+00 : f32
    %158 = vector.broadcast %cst_54 : f32 to vector<32x512xf32>
    %159 = arith.addf %158, %157 : vector<32x512xf32>
    %cst_55 = arith.constant 5.000000e-01 : f32
    %160 = vector.broadcast %cst_55 : f32 to vector<32x512xf32>
    %161 = arith.mulf %160, %159 : vector<32x512xf32>
    %162 = arith.mulf %149, %161 : vector<32x512xf32>
    %163 = arith.truncf %162 : vector<32x512xf32> to vector<32x512xbf16>
    %c0_56 = arith.constant 0 : index
    %c0_57 = arith.constant 0 : index
    %c0_58 = arith.constant 0 : index
    %164 = vector.load %arg13[%c0_56, %c0_57, %c0_58] : memref<1x512x128xbf16, #tpu.memory_space<vmem>>, vector<1x512x128xbf16>
    %165 = vector.shape_cast %164 : vector<1x512x128xbf16> to vector<512x128xbf16>
    %cst_59 = arith.constant dense<0.000000e+00> : vector<32x128xf32>
    %166 = tpu.matmul %163, %165, %cst_59 {dimension_numbers = #tpu.dot_dimension_numbers<[1], [0], [0], [1], [0, 0, 1, 1], [], []>} : vector<32x512xbf16>, vector<512x128xbf16>, vector<32x128xf32> -> vector<32x128xf32>
    %c0_60 = arith.constant 0 : index
    %c0_61 = arith.constant 0 : index
    %c0_62 = arith.constant 0 : index
    %167 = vector.load %arg14[%c0_60, %c0_61, %c0_62] : memref<1x1x128xf32, #tpu.memory_space<vmem>>, vector<1x1x128xf32>
    %168 = vector.shape_cast %167 : vector<1x1x128xf32> to vector<1x128xf32>
    %169 = vector.broadcast %168 : vector<1x128xf32> to vector<32x128xf32>
    %170 = arith.addf %166, %169 : vector<32x128xf32>
    %171 = arith.addf %141, %170 : vector<32x128xf32>
    %c0_63 = arith.constant 0 : index
    %c0_64 = arith.constant 0 : index
    %c0_65 = arith.constant 0 : index
    %172 = vector.load %arg15[%c0_63, %c0_64, %c0_65] : memref<1x1x128xf32, #tpu.memory_space<vmem>>, vector<1x1x128xf32>
    %173 = vector.shape_cast %172 : vector<1x1x128xf32> to vector<1x128xf32>
    %c0_66 = arith.constant 0 : index
    %c0_67 = arith.constant 0 : index
    %c0_68 = arith.constant 0 : index
    %174 = vector.load %arg16[%c0_66, %c0_67, %c0_68] : memref<1x1x128xf32, #tpu.memory_space<vmem>>, vector<1x1x128xf32>
    %175 = vector.shape_cast %174 : vector<1x1x128xf32> to vector<1x128xf32>
    %cst_69 = arith.constant dense<0.000000e+00> : vector<32xf32>
    %176 = vector.multi_reduction <add>, %171, %cst_69 [1] : vector<32x128xf32> to vector<32xf32>
    %177 = vector.shape_cast %176 : vector<32xf32> to vector<32x1xf32>
    %cst_70 = arith.constant 1.280000e+02 : f32
    %178 = vector.broadcast %cst_70 : f32 to vector<32x1xf32>
    %179 = arith.divf %177, %178 : vector<32x1xf32>
    %180 = vector.broadcast %179 : vector<32x1xf32> to vector<32x128xf32>
    %181 = arith.subf %171, %180 : vector<32x128xf32>
    %182 = arith.mulf %181, %181 : vector<32x128xf32>
    %cst_71 = arith.constant dense<0.000000e+00> : vector<32xf32>
    %183 = vector.multi_reduction <add>, %182, %cst_71 [1] : vector<32x128xf32> to vector<32xf32>
    %184 = vector.shape_cast %183 : vector<32xf32> to vector<32x1xf32>
    %cst_72 = arith.constant 1.280000e+02 : f32
    %185 = vector.broadcast %cst_72 : f32 to vector<32x1xf32>
    %186 = arith.divf %184, %185 : vector<32x1xf32>
    %187 = vector.broadcast %179 : vector<32x1xf32> to vector<32x128xf32>
    %188 = arith.subf %171, %187 : vector<32x128xf32>
    %cst_73 = arith.constant 9.99999996E-13 : f32
    %189 = vector.broadcast %cst_73 : f32 to vector<32x1xf32>
    %190 = arith.addf %186, %189 : vector<32x1xf32>
    %191 = math.rsqrt %190 : vector<32x1xf32>
    %192 = vector.broadcast %191 : vector<32x1xf32> to vector<32x128xf32>
    %193 = arith.mulf %188, %192 : vector<32x128xf32>
    %194 = vector.broadcast %173 : vector<1x128xf32> to vector<32x128xf32>
    %195 = arith.mulf %193, %194 : vector<32x128xf32>
    %196 = vector.broadcast %175 : vector<1x128xf32> to vector<32x128xf32>
    %197 = arith.addf %195, %196 : vector<32x128xf32>
    %c0_74 = arith.constant 0 : index
    %c0_75 = arith.constant 0 : index
    %198 = vector.load %arg23[%c0_74, %c0_75] : memref<32x128xf32, #tpu.memory_space<vmem>>, vector<32x128xf32>
    tpu.vector_store %arg23[%c0_74, %c0_75], %197 {strides = array<i32>} : memref<32x128xf32, #tpu.memory_space<vmem>>, vector<32x128xf32>,
    %c2_i32 = arith.constant 2 : i32
    %199 = arith.cmpi eq, %arg1, %c2_i32 : i32
    %200 = arith.extui %199 : i1 to i32
    %c0_i32_76 = arith.constant 0 : i32
    %201 = arith.cmpi ne, %200, %c0_i32_76 : i32
    scf.if %201 {
      %202 = vector.shape_cast %197 : vector<32x128xf32> to vector<4x8x128xf32>
      %203 = vector.extract_strided_slice %202 {offsets = [0, 0, 0], sizes = [4, 1, 128], strides = [1, 1, 1]} : vector<4x8x128xf32> to vector<4x1x128xf32>
      %204 = vector.shape_cast %203 : vector<4x1x128xf32> to vector<4x128xf32>
      %205 = arith.truncf %204 : vector<4x128xf32> to vector<4x128xbf16>
      %c0_77 = arith.constant 0 : index
      %c0_78 = arith.constant 0 : index
      %206 = vector.load %arg17[%c0_77, %c0_78] : memref<128x128xbf16, #tpu.memory_space<vmem>>, vector<128x128xbf16>
      %cst_79 = arith.constant dense<0.000000e+00> : vector<4x128xf32>
      %207 = tpu.matmul %205, %206, %cst_79 {dimension_numbers = #tpu.dot_dimension_numbers<[1], [0], [0], [1], [0, 0, 1, 1], [], []>} : vector<4x128xbf16>, vector<128x128xbf16>, vector<4x128xf32> -> vector<4x128xf32>
      %c0_80 = arith.constant 0 : index
      %c0_81 = arith.constant 0 : index
      %208 = vector.load %arg18[%c0_80, %c0_81] : memref<1x128xf32, #tpu.memory_space<vmem>>, vector<1x128xf32>
      %209 = vector.broadcast %208 : vector<1x128xf32> to vector<4x128xf32>
      %210 = arith.addf %207, %209 : vector<4x128xf32>
      %211 = math.tanh %210 : vector<4x128xf32>
      %c0_82 = arith.constant 0 : index
      %c0_83 = arith.constant 0 : index
      %c0_84 = arith.constant 0 : index
      %212 = vector.load %arg4[%c0_82, %c0_83, %c0_84] : memref<4x1x32xf32, #tpu.memory_space<vmem>>, vector<4x1x32xf32>
      %213 = vector.shape_cast %212 : vector<4x1x32xf32> to vector<4x32xf32>
      %214 = vector.extract_strided_slice %211 {offsets = [0, 0], sizes = [2, 128], strides = [1, 1]} : vector<4x128xf32> to vector<2x128xf32>
      %215 = vector.extract_strided_slice %211 {offsets = [2, 0], sizes = [2, 128], strides = [1, 1]} : vector<4x128xf32> to vector<2x128xf32>
      %216 = vector.extract_strided_slice %213 {offsets = [0, 0], sizes = [2, 32], strides = [1, 1]} : vector<4x32xf32> to vector<2x32xf32>
      %217 = vector.extract_strided_slice %213 {offsets = [2, 0], sizes = [2, 32], strides = [1, 1]} : vector<4x32xf32> to vector<2x32xf32>
      %218 = arith.mulf %214, %215 : vector<2x128xf32>
      %cst_85 = arith.constant 0.000000e+00 : f32
      %219 = vector.broadcast %cst_85 : f32 to vector<2x128xf32>
      %220 = arith.maximumf %218, %219 : vector<2x128xf32>
      %221 = arith.mulf %216, %217 : vector<2x32xf32>
      %cst_86 = arith.constant 0.000000e+00 : f32
      %222 = vector.broadcast %cst_86 : f32 to vector<2x32xf32>
      %223 = arith.maximumf %221, %222 : vector<2x32xf32>
      %c0_87 = arith.constant 0 : index
      %c0_88 = arith.constant 0 : index
      %224 = vector.load %arg19[%c0_87, %c0_88] : memref<1x128xf32, #tpu.memory_space<vmem>>, vector<1x128xf32>
      %225 = vector.broadcast %224 : vector<1x128xf32> to vector<2x128xf32>
      %226 = arith.mulf %220, %225 : vector<2x128xf32>
      %cst_89 = arith.constant dense<0.000000e+00> : vector<2xf32>
      %227 = vector.multi_reduction <add>, %226, %cst_89 [1] : vector<2x128xf32> to vector<2xf32>
      %228 = vector.shape_cast %227 : vector<2xf32> to vector<2x1xf32>
      %c0_90 = arith.constant 0 : index
      %c0_91 = arith.constant 0 : index
      %229 = vector.load %arg20[%c0_90, %c0_91] : memref<1x32xf32, #tpu.memory_space<vmem>>, vector<1x32xf32>
      %230 = vector.broadcast %229 : vector<1x32xf32> to vector<2x32xf32>
      %231 = arith.mulf %223, %230 : vector<2x32xf32>
      %cst_92 = arith.constant dense<0.000000e+00> : vector<2xf32>
      %232 = vector.multi_reduction <add>, %231, %cst_92 [1] : vector<2x32xf32> to vector<2xf32>
      %233 = vector.shape_cast %232 : vector<2xf32> to vector<2x1xf32>
      %234 = arith.addf %228, %233 : vector<2x1xf32>
      %c0_93 = arith.constant 0 : index
      %c0_94 = arith.constant 0 : index
      %235 = vector.load %arg21[%c0_93, %c0_94] : memref<1x1xf32, #tpu.memory_space<vmem>>, vector<1x1xf32>
      %236 = vector.broadcast %235 : vector<1x1xf32> to vector<2x1xf32>
      %237 = arith.addf %234, %236 : vector<2x1xf32>
      %238 = vector.shape_cast %237 : vector<2x1xf32> to vector<1x2x1xf32>
      %239 = vector.shape_cast %238 : vector<1x2x1xf32> to vector<1x2x1xf32>
      %240 = vector.broadcast %239 : vector<1x2x1xf32> to vector<1x2x128xf32>
      %c0_95 = arith.constant 0 : index
      %c0_96 = arith.constant 0 : index
      %c0_97 = arith.constant 0 : index
      %241 = vector.load %arg22[%c0_95, %c0_96, %c0_97] : memref<1x2x128xf32, #tpu.memory_space<vmem>>, vector<1x2x128xf32>
      tpu.vector_store %arg22[%c0_95, %c0_96, %c0_97], %240 {strides = array<i32>} : memref<1x2x128xf32, #tpu.memory_space<vmem>>, vector<1x2x128xf32>,
    } else {
    }
    return
  }
  func.func @transform_0(%arg0: i32, %arg1: i32) -> (i32, i32, i32) {
    %c0_i32 = arith.constant 0 : i32
    %c0_i32_0 = arith.constant 0 : i32
    %c0_i32_1 = arith.constant 0 : i32
    return %arg0, %c0_i32, %c0_i32_0 : i32, i32, i32
  }
  func.func @transform_1(%arg0: i32, %arg1: i32) -> (i32, i32, i32) {
    %c0_i32 = arith.constant 0 : i32
    %c0_i32_0 = arith.constant 0 : i32
    %c0_i32_1 = arith.constant 0 : i32
    return %arg0, %c0_i32, %c0_i32_0 : i32, i32, i32
  }
  func.func @transform_2(%arg0: i32, %arg1: i32) -> (i32, i32, i32) {
    %c0_i32 = arith.constant 0 : i32
    %c0_i32_0 = arith.constant 0 : i32
    %c0_i32_1 = arith.constant 0 : i32
    return %arg0, %c0_i32, %c0_i32_0 : i32, i32, i32
  }
  func.func @transform_3(%arg0: i32, %arg1: i32) -> (i32, i32, i32) {
    %c0_i32 = arith.constant 0 : i32
    %c0_i32_0 = arith.constant 0 : i32
    %c0_i32_1 = arith.constant 0 : i32
    return %arg1, %c0_i32, %c0_i32_0 : i32, i32, i32
  }
  func.func @transform_4(%arg0: i32, %arg1: i32) -> (i32, i32, i32) {
    %c0_i32 = arith.constant 0 : i32
    %c0_i32_0 = arith.constant 0 : i32
    %c0_i32_1 = arith.constant 0 : i32
    return %arg1, %c0_i32, %c0_i32_0 : i32, i32, i32
  }
  func.func @transform_5(%arg0: i32, %arg1: i32) -> (i32, i32, i32) {
    %c0_i32 = arith.constant 0 : i32
    %c0_i32_0 = arith.constant 0 : i32
    %c0_i32_1 = arith.constant 0 : i32
    return %arg1, %c0_i32, %c0_i32_0 : i32, i32, i32
  }
  func.func @transform_6(%arg0: i32, %arg1: i32) -> (i32, i32, i32) {
    %c0_i32 = arith.constant 0 : i32
    %c0_i32_0 = arith.constant 0 : i32
    %c0_i32_1 = arith.constant 0 : i32
    return %arg1, %c0_i32, %c0_i32_0 : i32, i32, i32
  }
  func.func @transform_7(%arg0: i32, %arg1: i32) -> (i32, i32, i32) {
    %c0_i32 = arith.constant 0 : i32
    %c0_i32_0 = arith.constant 0 : i32
    %c0_i32_1 = arith.constant 0 : i32
    return %arg1, %c0_i32, %c0_i32_0 : i32, i32, i32
  }
  func.func @transform_8(%arg0: i32, %arg1: i32) -> (i32, i32, i32) {
    %c0_i32 = arith.constant 0 : i32
    %c0_i32_0 = arith.constant 0 : i32
    %c0_i32_1 = arith.constant 0 : i32
    return %arg1, %c0_i32, %c0_i32_0 : i32, i32, i32
  }
  func.func @transform_9(%arg0: i32, %arg1: i32) -> (i32, i32, i32) {
    %c0_i32 = arith.constant 0 : i32
    %c0_i32_0 = arith.constant 0 : i32
    %c0_i32_1 = arith.constant 0 : i32
    return %arg1, %c0_i32, %c0_i32_0 : i32, i32, i32
  }
  func.func @transform_10(%arg0: i32, %arg1: i32) -> (i32, i32, i32) {
    %c0_i32 = arith.constant 0 : i32
    %c0_i32_0 = arith.constant 0 : i32
    %c0_i32_1 = arith.constant 0 : i32
    return %arg1, %c0_i32, %c0_i32_0 : i32, i32, i32
  }
  func.func @transform_11(%arg0: i32, %arg1: i32) -> (i32, i32, i32) {
    %c0_i32 = arith.constant 0 : i32
    %c0_i32_0 = arith.constant 0 : i32
    %c0_i32_1 = arith.constant 0 : i32
    return %arg1, %c0_i32, %c0_i32_0 : i32, i32, i32
  }
  func.func @transform_12(%arg0: i32, %arg1: i32) -> (i32, i32, i32) {
    %c0_i32 = arith.constant 0 : i32
    %c0_i32_0 = arith.constant 0 : i32
    %c0_i32_1 = arith.constant 0 : i32
    return %arg1, %c0_i32, %c0_i32_0 : i32, i32, i32
  }
  func.func @transform_13(%arg0: i32, %arg1: i32) -> (i32, i32, i32) {
    %c0_i32 = arith.constant 0 : i32
    %c0_i32_0 = arith.constant 0 : i32
    %c0_i32_1 = arith.constant 0 : i32
    return %arg1, %c0_i32, %c0_i32_0 : i32, i32, i32
  }
  func.func @transform_14(%arg0: i32, %arg1: i32) -> (i32, i32, i32) {
    %c0_i32 = arith.constant 0 : i32
    %c0_i32_0 = arith.constant 0 : i32
    %c0_i32_1 = arith.constant 0 : i32
    return %arg1, %c0_i32, %c0_i32_0 : i32, i32, i32
  }
  func.func @transform_15(%arg0: i32, %arg1: i32) -> (i32, i32) {
    %c0_i32 = arith.constant 0 : i32
    %c0_i32_0 = arith.constant 0 : i32
    %c0_i32_1 = arith.constant 0 : i32
    return %c0_i32, %c0_i32_0 : i32, i32
  }
  func.func @transform_16(%arg0: i32, %arg1: i32) -> (i32, i32) {
    %c0_i32 = arith.constant 0 : i32
    %c0_i32_0 = arith.constant 0 : i32
    %c0_i32_1 = arith.constant 0 : i32
    return %c0_i32, %c0_i32_0 : i32, i32
  }
  func.func @transform_17(%arg0: i32, %arg1: i32) -> (i32, i32) {
    %c0_i32 = arith.constant 0 : i32
    %c0_i32_0 = arith.constant 0 : i32
    %c0_i32_1 = arith.constant 0 : i32
    return %c0_i32, %c0_i32_0 : i32, i32
  }
  func.func @transform_18(%arg0: i32, %arg1: i32) -> (i32, i32) {
    %c0_i32 = arith.constant 0 : i32
    %c0_i32_0 = arith.constant 0 : i32
    %c0_i32_1 = arith.constant 0 : i32
    return %c0_i32, %c0_i32_0 : i32, i32
  }
  func.func @transform_19(%arg0: i32, %arg1: i32) -> (i32, i32) {
    %c0_i32 = arith.constant 0 : i32
    %c0_i32_0 = arith.constant 0 : i32
    %c0_i32_1 = arith.constant 0 : i32
    return %c0_i32, %c0_i32_0 : i32, i32
  }
  func.func @transform_20(%arg0: i32, %arg1: i32) -> (i32, i32, i32) {
    %c0_i32 = arith.constant 0 : i32
    %c0_i32_0 = arith.constant 0 : i32
    %c0_i32_1 = arith.constant 0 : i32
    return %arg0, %c0_i32, %c0_i32_0 : i32, i32, i32
  }
}

</mosaic_0001>

<bundles_post_ra>
// kernel: tpu_custom_call.1
= control target key start
LH: loop header
LB: loop body
LE: loop exit
PB: predicated region body
PF: predicated region fallthrough
CT: control target
= control target key end

     0   :  { %s6582_s0 = inlined_call_operand.hbm [shape: f32[8,8,128], index: 0, kind: input, shape index: {}]   ;;  %s6583_s1 = inlined_call_operand.hbm [shape: f32[8,8,8], index: 1, kind: input, shape index: {}]   ;;  %s6584_s2 = inlined_call_operand.hbm [shape: f32[8,1,32], index: 2, kind: input, shape index: {}]   ;;  %s6585_s3 = inlined_call_operand.hbm [shape: bf16[3,128,384], index: 3, kind: input, shape index: {}]   ;;  %s6586_s4 = inlined_call_operand.hbm [shape: f32[3,1,384], index: 4, kind: input, shape index: {}]   ;;  %s6587_s5 = inlined_call_operand.hbm [shape: bf16[3,128,128], index: 5, kind: input, shape index: {}]   ;;  %s6588_s6 = inlined_call_operand.vmem [shape: f32[3,1,128], index: 6, kind: input, shape index: {}]   ;;  %s6589_s7 = inlined_call_operand.vmem [shape: f32[3,1,128], index: 7, kind: input, shape index: {}]   ;;  %s6590_s8 = inlined_call_operand.vmem [shape: f32[3,1,128], index: 8, kind: input, shape index: {}]   ;;  %s6591_s9 = inlined_call_operand.hbm [shape: bf16[3,128,512], index: 9, kind: input, shape index: {}]   ;;  %s6592_s10 = inlined_call_operand.hbm [shape: f32[3,1,512], index: 10, kind: input, shape index: {}]   ;;  %s6593_s11 = inlined_call_operand.hbm [shape: bf16[3,512,128], index: 11, kind: input, shape index: {}]   ;;  %s6594_s12 = inlined_call_operand.vmem [shape: f32[3,1,128], index: 12, kind: input, shape index: {}]   ;;  %s6595_s13 = inlined_call_operand.hbm [shape: f32[3,1,128], index: 13, kind: input, shape index: {}]   ;;  %s6596_s14 = inlined_call_operand.vmem [shape: f32[3,1,128], index: 14, kind: input, shape index: {}]   ;;  %s6597_s15 = inlined_call_operand.hbm [shape: bf16[128,128], index: 15, kind: input, shape index: {}]   ;;  %s6598_s16 = inlined_call_operand.vmem [shape: f32[1,128], index: 16, kind: input, shape index: {}]   ;;  %s6599_s17 = inlined_call_operand.vmem [shape: f32[1,128], index: 17, kind: input, shape index: {}]   ;;  %s6600_s18 = inlined_call_operand.vmem [shape: f32[1,32], index: 18, kind: input, shape index: {}]   ;;  %s6601_s19 = inlined_call_operand.<no memory space> [shape: f32[1,1], index: 19, kind: input, shape index: {}]   ;;  %s6602_s20 = inlined_call_operand.hbm [shape: f32[2,2,128], index: 20, kind: output, shape index: {}]  }
   0x1   :  { %6640 = sst [smem:[#allocation52_spill]] %s6582_s0  ;;  %v25_v0 = vstv %s6601_s19 }
   0x2   :  { %6641 = sst [smem:[#allocation53_spill]] %s6583_s1  ;;  %26 = vst [vmem:[#allocation3] sm:$0x1] %v25_v0 }
   0x3   :  { %6642 = sst [smem:[#allocation54_spill]] %s6584_s2 }
   0x4   :  { %6643 = sst [smem:[#allocation55_spill]] %s6585_s3 }
   0x5   :  { %6644 = sst [smem:[#allocation56_spill]] %s6586_s4 }
   0x6   :  { %6645 = sst [smem:[#allocation57_spill]] %s6587_s5 }
   0x7   :  { %6646 = sst [smem:[#allocation58_spill]] %s6588_s6 }
   0x8   :  { %6647 = sst [smem:[#allocation59_spill]] %s6589_s7 }
   0x9   :  { %6648 = sst [smem:[#allocation60_spill]] %s6590_s8 }
   0xa   :  { %6649 = sst [smem:[#allocation61_spill]] %s6591_s9 }
   0xb   :  { %6650 = sst [smem:[#allocation62_spill]] %s6592_s10 }
   0xc   :  { %6651 = sst [smem:[#allocation63_spill]] %s6593_s11 }
   0xd   :  { %6652 = sst [smem:[#allocation64_spill]] %s6594_s12 }
   0xe   :  { %6653 = sst [smem:[#allocation65_spill]] %s6595_s13 }
   0xf   :  { %6654 = sst [smem:[#allocation66_spill]] %s6596_s14 }
  0x10   :  { %6655 = sst [smem:[#allocation67_spill]] %s6597_s15 }
  0x11   :  { %6656 = sst [smem:[#allocation68_spill]] %s6598_s16 }
  0x12   :  { %6657 = sst [smem:[#allocation69_spill]] %s6599_s17 }
  0x13   :  { %6658 = sst [smem:[#allocation70_spill]] %s6600_s18 }
  0x14   :  { %6659 = sst [smem:[#allocation71_spill]] %s6602_s20 }
  0x15   :  { %27 = vsyncpa [#allocation5], 0 }
  0x16   :  { %29 = vsyncpa [#allocation5 + $0x1], 0 }
  0x17   :  { %30 = vsyncpa [#allocation8], 0 }
  0x18   :  { %32 = vsyncpa [#allocation8 + $0x1], 0 }
  0x19   :  { %33 = vsyncpa [#allocation11], 0 }
  0x1a   :  { %35 = vsyncpa [#allocation11 + $0x1], 0 }
  0x1b   :  { %36 = vsyncpa [#allocation14], 0 }
  0x1c   :  { %38 = vsyncpa [#allocation14 + $0x1], 0 }
  0x1d   :  { %39 = vsyncpa [#allocation17], 0 }
  0x1e   :  { %41 = vsyncpa [#allocation17 + $0x1], 0 }
  0x1f   :  { %42 = vsyncpa [#allocation20], 0 }
  0x20   :  { %44 = vsyncpa [#allocation20 + $0x1], 0 }
  0x21   :  { %45 = vsyncpa [#allocation6], 0 }
  0x22   :  { %47 = vsyncpa [#allocation6 + $0x1], 0  ;;  %s5449_s23 = smov 0   ;;  %s5451_s24 = smov 0  }
  0x23   :  { %s5453_s19 = smov 0   ;;  %s5455_s2 = smov 0  }
  0x24   :  { %s5457_s25 = smov 0   ;;  %s5459_s3 = smov 0  }
  0x25   :  { %s5461_s26 = smov 0   ;;  %s5463_s27 = smov 0  }
  0x26   :  { %s5465_s28 = smov 0   ;;  %s5467_s4 = smov 0  }
  0x27   :  { %s5469_s29 = smov 0  }
  0x28 LB: > { %6660 = sst [smem:[#allocation31_spill]] %s5288_s24  ;;  %s5503_s30 = sadd.s32 4294967295, %s5324_s29   ;;  %s5324_s29 = sphi %s5469_s29, %s53_s29   ;;  %s5320_s4 = sphi %s5467_s4, %s6751_s4   ;;  %s5316_s28 = sphi %s5465_s28, %s6750_s28   ;;  %s5312_s27 = sphi %s5463_s27, %s6749_s27   ;;  %s5308_s26 = sphi %s5461_s26, %s6748_s26   ;;  %s5304_s3 = sphi %s5459_s3, %s6747_s3   ;;  %s5300_s25 = sphi %s5457_s25, %s6746_s25   ;;  %s5296_s2 = sphi %s5455_s2, %s6745_s2   ;;  %s5292_s19 = sphi %s5453_s19, %s6744_s19   ;;  %s5288_s24 = sphi %s5451_s24, %s6743_s24   ;;  %s5284_s23 = sphi %s5449_s23, %s6742_s23  }
  0x29   : > { %6661 = sst [smem:[#allocation32_spill]] %s5292_s19  ;;  %s3911_s0 = sadd.s32 4294967294, %s5324_s29  }
  0x2a   : > { %6662 = sst [smem:[#allocation33_spill]] %s5296_s2  ;;  %p85_p0 = scmp.ne.s32.totalorder %s5300_s25, %s5296_s2 }
  0x2b   : > { %6663 = sst [smem:[#allocation34_spill]] %s5300_s25  ;;  %p6610_p1 = scmp.eq.s32.totalorder %s5503_s30, 0 }
  0x2c   : > { %6664 = sst [smem:[#allocation35_spill]] %s5304_s3  ;;  %p163_p2 = scmp.ne.s32.totalorder %s5288_s24, %s5284_s23 }
  0x2d   : > { %6665 = sst [smem:[#allocation36_spill]] %s5308_s26  ;;  %p578_p3 = scmp.eq.s32.totalorder %s5503_s30, 5 }
  0x2e   : > { %6666 = sst [smem:[#allocation37_spill]] %s5312_s27  ;;  %p5513_p4 = por %p6610_p1, %p85_p0 }
  0x2f   : > { %6667 = sst [smem:[#allocation38_spill]] %s5316_s28  ;;  %p584_p5 = scmp.eq.s32.totalorder %s3911_s0, 5 }
  0x30   : > { %6668 = sst [smem:[#allocation39_spill]] %s5320_s4  ;;  %p5519_p6 = por %p163_p2, %p6610_p1 }
  0x31   : > { %6669 = sst [smem:[#allocation40_spill]] %s5324_s29  ;;  %p3912_p7 = scmp.ge.s32.totalorder %s5324_s29, 1 }
  0x32   : > { %6670 = sst [smem:[#allocation41_spill]] %s5503_s30  ;;  %p5524_p8 = por %p584_p5, %p85_p0 }
  0x33   : > { %s6671_s21 = scalar_select %p5513_p4, 1, 0 }
  0x34   : > { %s6673_s1 = scalar_select %p5519_p6, 1, 0 }
  0x35   : > { %6672 = sst [smem:[#allocation42_spill]] %s6671_s21  ;;  %p591_p9 = scmp.lt.s32.totalorder %s5324_s29, 7 }
  0x36   : > { %6674 = sst [smem:[#allocation43_spill]] %s6673_s1  ;;  %s6606_s2 = smov 64  }
  0x37   : > { %s6675_s22 = scalar_select %p5524_p8, 1, 0 }
  0x38   : > { %s6677_s15 = sld [smem:[#allocation67_spill]]  ;;  %p5532_p10 = pnand %p3912_p7, %p591_p9 }
  0x39   : > { %6676 = sst [smem:[#allocation44_spill]] %s6675_s22  ;;  %s5326_s22 = smov [#allocation21]  }
  0x3a   : > { %p4540_p11 = pneg %p5532_p10  ;;  %s604_s27 = sshll.u32 %s5326_s22, 4  ;;  %s605_s27 = int_to_ptr.vmem [resolvable:$true] %s604_s27 }
  0x3b   : > { %s6608_s23 = smov 4   ;;  %s65_s17 = sadd.s32 1, %s5320_s4 }
  0x3c   : > { %p4541_p12 = pnand %p4540_p11, %p6610_p1  ;;  %s72_s22 = sadd.s32 1, %s5304_s3 }
  0x3d   : > { %p79_p0 = scmp.ne.s32.totalorder %s5304_s3, %s5300_s25  ;;  %p80_p2 = scmp.eq.s32.totalorder %s5324_s29, 0 }
  0x3e   : > { %s602_s0 = sshll.u32 %s6677_s15, 4  ;;  %s62_s15 = sadd.s32 1, %s5316_s28  ;;  %s603_s0 = int_to_ptr.hbm [resolvable:$true] %s602_s0 }
  0x3f   : > { %4543 = dma.hbm_to_vmem [thread:$0]  (!%p4541_p12), %s603_s0, 1024, %s605_s27, [#allocation20], %s6606_s2, %s6606_s2, %s6608_s23  }
  0x40   : > { %p63_p13 = scmp.ge.s32.totalorder %s62_s15, 3  ;;  %p5557_p9 = por %p80_p2, %p79_p0 }
  0x41   : > { %s150_s2 = sadd.s32 1, %s5292_s19  ;;  %p157_p11 = scmp.ne.s32.totalorder %s5292_s19, %s5288_s24 }
  0x42   : > { %s6753_s15 = smov (%p63_p13, %s62_s15), 0  ;;  %s6755_s17 = smov (!%p63_p13, %s65_s17), %s5320_s4 }
  0x43   : > { %6679 = sst [smem:[#allocation45_spill]] %s6753_s15  ;;  %s147_s27 = ssub.s32 %s5316_s28, %s6753_s15 }
  0x44   : > { %p67_p5 = scmp.ge.s32.totalorder %s6755_s17, 2  ;;  %p148_p7 = scmp.eq.s32.totalorder %s147_s27, 0 }
  0x45   : > { %p5576_p13 = por %p578_p3, %p79_p0  ;;  %p5580_p1 = por %p157_p11, %p80_p2 }
  0x46   : > { %s6757_s17 = smov (%p67_p5, %s6755_s17), 0  ;;  %p4580_p5 = scmp.lt.s32.totalorder %s5324_s29, 6 }
  0x47   : > { %6681 = sst [smem:[#allocation46_spill]] %s6757_s17  ;;  %s69_s16 = ssub.s32 %s5320_s4, %s6757_s17 }
  0x48   : > { %s5565_s23 = scalar_select %p148_p7, %s5292_s19, %s150_s2  }
  0x49   : > { %p70_p12 = scmp.eq.s32.totalorder %s69_s16, 0  ;;  %s5589_s2 = sand.u32 1, %s5304_s3  }
  0x4a   : > { %6682 = sst [smem:[#allocation47_spill]] %s5565_s23  ;;  %s6617_s16 = sshll.u32 %s5320_s4, 5 }
  0x4b   : > { %s6683_s27 = scalar_select %p5576_p13, 1, 0 }
  0x4c   : > { %s5586_s18 = scalar_select %p70_p12, %s5304_s3, %s72_s22  }
  0x4d   : > { %6684 = sst [smem:[#allocation48_spill]] %s6683_s27  ;;  %s6616_s17 = sshll.u32 %s5589_s2, 5 }
  0x4e   : > { %6686 = sst [smem:[#allocation49_spill]] %s5586_s18  ;;  %p5597_p3 = pnand %p4580_p5, %p5557_p9 }
  0x4f   : > { %s5602_s27 = sand.u32 1, %s5324_s29   ;;  %s6688_s3 = sld [smem:[#allocation53_spill]] }
  0x50   : > { %s656_s12 = scalar_lea.vmem [#allocation7], %s6616_s17  ;;  %p5615_p0 = pnand %p4580_p5, %p5580_p1 }
  0x51   : > { %s664_s8 = sshll.u32 %s656_s12, 4  ;;  %s6624_s6 = scalar_lea.sflag [#allocation8], %s5602_s27  ;;  %s665_s8 = int_to_ptr.vmem [resolvable:$true] %s664_s8 }
  0x52   : > { %s6625_s18 = smov 128   ;;  %s6626_s22 = smov 8  }
  0x53   : > { %s5628_s12 = sand.u32 1, %s5292_s19   ;;  %s6691_s5 = sld [smem:[#allocation57_spill]] }
  0x54   : > { %s4508_s15 = smul.u32 192, %s5628_s12  ;;  %s6692_s19 = smov 4  }
  0x55   : > { %s661_s14 = scalar_lea.hbm %s6688_s3, %s6617_s16  ;;  %s6690_s16 = sld [smem:[#allocation55_spill]] }
  0x56   : > { %s662_s7 = sshll.u32 %s661_s14, 4  ;;  %s4509_s14 = smul.u32 192, %s5316_s28  ;;  %s663_s7 = int_to_ptr.hbm [resolvable:$true] %s662_s7 }
  0x57   : > { %4550 = dma.hbm_to_vmem [thread:$0]  (!%p5597_p3), %s663_s7, 512, %s665_s8, %s6624_s6, %s6625_s18, %s6625_s18, %s6626_s22  }
  0x58   : > { %s699_s1 = scalar_lea.vmem [#allocation10], %s4508_s15  ;;  %s6629_s7 = scalar_lea.sflag [#allocation11], %s5602_s27 }
  0x59   : > { %s707_s24 = sshll.u32 %s699_s1, 4  ;;  %s5331_s8 = smov 192   ;;  %s708_s24 = int_to_ptr.vmem [resolvable:$true] %s707_s24 }
  0x5a   : > { %s5332_s6 = smov 12   ;;  %s3924_s18 = sshll.u32 %s5628_s12, 6 }
  0x5b   : > { %s704_s29 = scalar_lea.hbm %s6690_s16, %s4509_s14  ;;  %s4401_s22 = sshll.u32 %s5316_s28, 6 }
  0x5c   : > { %s705_s26 = sshll.u32 %s704_s29, 4  ;;  %s745_s29 = scalar_lea.hbm %s6691_s5, %s4401_s22  ;;  %s706_s26 = int_to_ptr.hbm [resolvable:$true] %s705_s26 }
  0x5d   : > { %4556 = dma.hbm_to_vmem [thread:$0]  (!%p5615_p0), %s706_s26, 3072, %s708_s24, %s6629_s7, %s5331_s8, %s5331_s8, %s5332_s6  }
  0x5e   : > { %s746_s14 = sshll.u32 %s745_s29, 4  ;;  %s740_s1 = scalar_lea.vmem [#allocation13], %s3924_s18  ;;  %s747_s14 = int_to_ptr.hbm [resolvable:$true] %s746_s14 }
  0x5f   : > { %s748_s15 = sshll.u32 %s740_s1, 4  ;;  %s6628_s3 = scalar_lea.sflag [#allocation14], %s5602_s27  ;;  %s749_s15 = int_to_ptr.vmem [resolvable:$true] %s748_s15 }
  0x60   : > { %s6693_s6 = smov 64   ;;  %s3930_s24 = sshll.u32 %s5628_s12, 2 }
  0x61   : > { %4562 = dma.hbm_to_vmem [thread:$0]  (!%p5615_p0), %s747_s14, 1024, %s749_s15, %s6628_s3, %s6693_s6, %s6693_s6, %s6692_s19  }
  0x62   : > { %s3931_s26 = sshll.u32 %s5316_s28, 2  ;;  %s6694_s10 = sld [smem:[#allocation62_spill]] }
  0x63   : > { %s802_s17 = scalar_lea.vmem [#allocation16], %s3930_s24  ;;  %s6632_s1 = scalar_lea.sflag [#allocation17], %s5602_s27 }
  0x64   : > { %s810_s16 = sshll.u32 %s802_s17, 4  ;;  %s6695_s14 = sshll.u32 %s5320_s4, 5  ;;  %s811_s16 = int_to_ptr.vmem [resolvable:$true] %s810_s16 }
  0x65   : > { %s6696_s7 = sld [smem:[#allocation52_spill]]  ;;  %s6697_s22 = sshll.u32 %s5589_s2, 5 }
  0x66   : > { %s634_s8 = scalar_lea.vmem [#allocation4], %s6697_s22  ;;  %s6699_s17 = smov 128  }
  0x67   : > { %s642_s24 = sshll.u32 %s634_s8, 4  ;;  %s3921_s3 = sshll.u32 %s5589_s2, 2  ;;  %s643_s24 = int_to_ptr.vmem [resolvable:$true] %s642_s24 }
  0x68   : > { %s806_s18 = scalar_lea.hbm %s6694_s10, %s3931_s26  ;;  %s631_s26 = scalar_lea.sflag [#allocation5], %s5589_s2 }
  0x69   : > { %s808_s29 = sshll.u32 %s806_s18, 4  ;;  %s6698_s18 = smov 8   ;;  %s809_s29 = int_to_ptr.hbm [resolvable:$true] %s808_s29 }
  0x6a   : > { %4568 = dma.hbm_to_vmem [thread:$0]  (!%p5615_p0), %s809_s29, 64, %s811_s16, %s6632_s1  }
  0x6b   : > { %s639_s5 = scalar_lea.hbm %s6696_s7, %s6695_s14  ;;  %s3922_s7 = sshll.u32 %s5320_s4, 2 }
  0x6c   : > { %s640_s30 = sshll.u32 %s639_s5, 4  ;;  %s6700_s29 = sld [smem:[#allocation54_spill]]  ;;  %s641_s30 = int_to_ptr.hbm [resolvable:$true] %s640_s30 }
  0x6d   : > { %4547 = dma.hbm_to_vmem [thread:$0]  (!%p5597_p3), %s641_s30, 512, %s643_s24, %s631_s26, %s6699_s17, %s6699_s17, %s6698_s18  }
  0x6e   : > { %s678_s22 = scalar_lea.vmem [#allocation9], %s3921_s3  ;;  %s5333_s1 = smov 16  }
  0x6f   : > { %s685_s8 = sshll.u32 %s678_s22, 4  ;;  %s5334_s10 = smov 1   ;;  %s686_s8 = int_to_ptr.vmem [resolvable:$true] %s685_s8 }
  0x70   : > { %s6701_s21 = scalar_lea.sflag [#allocation8], %s5602_s27  ;;  %s4510_s25 = smul.u32 3, %s5628_s12 }
  0x71   : > { %s3927_s30 = sshll.u32 %s5628_s12, 8  ;;  %s4511_s2 = smul.u32 3, %s5316_s28 }
  0x72   : > { %s682_s14 = scalar_lea.hbm %s6700_s29, %s3922_s7  ;;  %s4402_s24 = sshll.u32 %s5316_s28, 8 }
  0x73   : > { %s683_s15 = sshll.u32 %s682_s14, 4  ;;  %s6702_s17 = sld [smem:[#allocation56_spill]]  ;;  %s684_s15 = int_to_ptr.hbm [resolvable:$true] %s683_s15 }
  0x74   : > { %4553 = dma.hbm_to_vmem [thread:$0]  (!%p5597_p3), %s684_s15, 64, %s686_s8, %s6701_s21, %s5333_s1, %s5333_s1, %s5334_s10  }
  0x75   : > { %s721_s7 = scalar_lea.vmem [#allocation12], %s4510_s25  ;;  %s6703_s9 = sld [smem:[#allocation61_spill]] }
  0x76   : > { %s729_s5 = sshll.u32 %s721_s7, 4  ;;  %s6704_s21 = scalar_lea.sflag [#allocation11], %s5602_s27  ;;  %s730_s5 = int_to_ptr.vmem [resolvable:$true] %s729_s5 }
  0x77   : > { %s780_s15 = scalar_lea.vmem [#allocation15], %s3927_s30  ;;  %s5335_s25 = smov 256  }
  0x78   : > { %s788_s22 = sshll.u32 %s780_s15, 4  ;;  %s6705_s8 = scalar_lea.sflag [#allocation14], %s5602_s27  ;;  %s789_s22 = int_to_ptr.vmem [resolvable:$true] %s788_s22 }
  0x79   : > { %s725_s3 = scalar_lea.hbm %s6702_s17, %s4511_s2  ;;  %s6706_s11 = sld [smem:[#allocation63_spill]] }
  0x7a   : > { %s727_s16 = sshll.u32 %s725_s3, 4  ;;  %s821_s17 = scalar_lea.vmem [#allocation18], %s3927_s30  ;;  %s728_s16 = int_to_ptr.hbm [resolvable:$true] %s727_s16 }
  0x7b   : > { %s785_s10 = scalar_lea.hbm %s6703_s9, %s4402_s24  ;;  %s829_s3 = sshll.u32 %s821_s17, 4  ;;  %s830_s3 = int_to_ptr.vmem [resolvable:$true] %s829_s3 }
  0x7c   : > { %4559 = dma.hbm_to_vmem [thread:$0]  (!%p5615_p0), %s728_s16, 48, %s730_s5, %s6704_s21  }
  0x7d   : > { %s786_s23 = sshll.u32 %s785_s10, 4  ;;  %s6707_s5 = scalar_lea.sflag [#allocation17], %s5602_s27  ;;  %s787_s23 = int_to_ptr.hbm [resolvable:$true] %s786_s23 }
  0x7e   : > { %4565 = dma.hbm_to_vmem [thread:$0]  (!%p5615_p0), %s787_s23, 4096, %s789_s22, %s6705_s8, %s5335_s25, %s5335_s25, %s5333_s1  }
  0x7f   : > { %s826_s18 = scalar_lea.hbm %s6706_s11, %s4402_s24  ;;  %s6708_s13 = sld [smem:[#allocation65_spill]] }
  0x80   : > { %s827_s7 = sshll.u32 %s826_s18, 4  ;;  %s848_s10 = scalar_lea.vmem [#allocation19], %s5628_s12  ;;  %s828_s7 = int_to_ptr.hbm [resolvable:$true] %s827_s7 }
  0x81   : > { %4571 = dma.hbm_to_vmem [thread:$0]  (!%p5615_p0), %s828_s7, 4096, %s830_s3, %s6707_s5, %s6693_s6, %s6693_s6, %s6692_s19  }
  0x82   : > { %s855_s21 = sshll.u32 %s848_s10, 4  ;;  %s846_s30 = scalar_lea.sflag [#allocation20], %s5602_s27  ;;  %s856_s21 = int_to_ptr.vmem [resolvable:$true] %s855_s21 }
  0x83   : > { %870 = sbr.rel (%p5532_p10) target bundleno = 3827 (0xef3), region = 100 }
  0x85   : > { %s851_s14 = scalar_lea.hbm %s6708_s13, %s5316_s28 }
  0x86   : > { %s853_s1 = sshll.u32 %s851_s14, 4  ;;  %s854_s1 = int_to_ptr.hbm [resolvable:$true] %s853_s1 }
  0x87   : > { %4574 = dma.hbm_to_vmem [thread:$0]  (!%p5615_p0), %s854_s1, 16, %s856_s21, %s846_s30  }
  0x88   : > { %s6709_s24 = sld [smem:[#allocation34_spill]] }
  0x8e   : > { %s5724_s15 = sand.u32 1, %s6709_s24  }
  0x8f   : > { %6711 = sst [smem:[#allocation50_spill]] %s5724_s15  ;;  %s3936_s19 = sshll.u32 %s5724_s15, 5 }
  0x90   : > { %s873_s6 = scalar_lea.sflag [#allocation5], %s5724_s15  ;;  %s5728_s22 = scalar_lea.vmem [#allocation4], %s3936_s19 }
  0x91   : > { %5251 = dma.done.wait (%p5513_p4), %s873_s6, 512  }
  0x92   : > { %5253 = vsyncadd (%p5513_p4), %s873_s6, 4294966784  ;;  %s6712_s27 = sld [smem:[#allocation41_spill]]  ;;  %s5738_s12 = scalar_lea.vmem [#allocation7], %s3936_s19 }
  0x98   : > { %s5735_s0 = sand.u32 1, %s6712_s27  }
  0x99   : > { %s883_s20 = scalar_lea.sflag [#allocation8], %s5735_s0 }
  0x9a   : > { %5255 = dma.done.wait (%p5513_p4), %s883_s20, 576  }
  0x9b   : > { %5257 = vsyncadd (%p5513_p4), %s883_s20, 4294966720  ;;  %s6713_s25 = sld [smem:[#allocation31_spill]]  ;;  %s3938_s2 = sshll.u32 %s5724_s15, 2 }
  0x9c   : > { %s5749_s17 = scalar_lea.vmem [#allocation9], %s3938_s2  ;;  %s903_s3 = scalar_lea.sflag [#allocation11], %s5735_s0 }
  0x9d   : > { %6715 = sst [smem:[#allocation51_spill]] %s5749_s17 }
  0xa1   : > { %s5746_s26 = sand.u32 1, %s6713_s25  }
  0xa2   : > { %s4512_s18 = smul.u32 192, %s5746_s26 }
  0xa4   : > { %s5752_s7 = scalar_lea.vmem [#allocation10], %s4512_s18 }
  0xa5   : > { %5259 = dma.done.wait (%p5519_p6), %s903_s3, 3120  }
  0xa6   : > { %5261 = vsyncadd (%p5519_p6), %s903_s3, 4294964176  ;;  %s4513_s5 = smul.u32 3, %s5746_s26  ;;  %s3939_s16 = sshll.u32 %s5746_s26, 6 }
  0xa7   : > { %s923_s14 = scalar_lea.sflag [#allocation14], %s5735_s0  ;;  %s5763_s1 = scalar_lea.vmem [#allocation13], %s3939_s16 }
  0xa8   : > { %s5760_s29 = scalar_lea.vmem [#allocation12], %s4513_s5 }
  0xa9   : > { %5263 = dma.done.wait (%p5519_p6), %s923_s14, 5120  }
  0xaa   : > { %5265 = vsyncadd (%p5519_p6), %s923_s14, 4294962176  ;;  %s3940_s10 = sshll.u32 %s5746_s26, 8  ;;  %s3941_s21 = sshll.u32 %s5746_s26, 2 }
  0xab   : > { %s5771_s30 = scalar_lea.vmem [#allocation15], %s3940_s10  ;;  %s943_s24 = scalar_lea.sflag [#allocation17], %s5735_s0 }
  0xac   : > { %s5774_s23 = scalar_lea.vmem [#allocation16], %s3941_s21 }
  0xad   : > { %5267 = dma.done.wait (%p5519_p6), %s943_s24, 4160  }
  0xae   : > { %5269 = vsyncadd (%p5519_p6), %s943_s24, 4294963136  ;;  %s5780_s19 = scalar_lea.vmem [#allocation18], %s3940_s10  ;;  %s963_s6 = scalar_lea.sflag [#allocation20], %s5735_s0 }
  0xaf   : > { %5271 = dma.done.wait (%p5519_p6), %s963_s6, 16  }
  0xb0   : > { %5273 = vsyncadd (%p5519_p6), %s963_s6, 4294967280  ;;  %p6716_p1 = scmp.eq.s32.totalorder %s6712_s27, 0 }
  0xb2   : > { %5275 = dma.done.wait (%p6716_p1), [#allocation20], 1024   ;;  %p6717_p4 = pmov %p6716_p1 }
  0xb3   : > { %s6718_s25 = sld [smem:[#allocation36_spill]]  ;;  %s3944_s2 = sshll.u32 %s5724_s15, 1 }
  0xb4   : > { %5277 = vsyncadd (%p6717_p4), [#allocation20], 4294966272  ;;  %s6719_s5 = sld [smem:[#allocation58_spill]]  ;;  %s5817_s17 = scalar_lea.vmem [#allocation22], %s3944_s2 }
  0xb5   : > { %s6720_s27 = sld [smem:[#allocation59_spill]] }
  0xb6   : > { %s6721_s6 = sld [smem:[#allocation60_spill]] }
  0xb7   : > { %s6722_s13 = sld [smem:[#allocation64_spill]] }
  0xb8   : > { %s6723_s0 = sld [smem:[#allocation66_spill]] }
  0xb9   : > { %p1090_p10 = scmp.lt.s32.totalorder %s6718_s25, 2  ;;  %p3945_p6 = scmp.ne.s32.totalorder %s6718_s25, 0 }
  0xbb   : > { %s5795_s18 = scalar_select %p1090_p10, %s6718_s25, 2 }
  0xbc   : > { %1109 = sbr.rel (%p3945_p6) target bundleno = 198 (0xc6), region = 148 }
  0xbd   : > { %s1092_s8 = scalar_lea.vmem %s6719_s5, %s5795_s18  ;;  %s1095_s10 = scalar_lea.vmem %s6720_s27, %s5795_s18 }
  0xbe   : > { %s1098_s20 = scalar_lea.vmem %s6721_s6, %s5795_s18  ;;  %s1101_s4 = scalar_lea.vmem %s6722_s13, %s5795_s18 }
  0xbf   : > { %s1104_s3 = scalar_lea.vmem %s6723_s0, %s5795_s18 }
  0xc1   : > { %v1110_v1 = vld [vmem:[%s5728_s22] sm:$0xff]  ;;  %v1111_v2 = vld [vmem:[%s5728_s22 + $0x8] sm:$0xff]  ;;  %v1112_v3 = vld [vmem:[%s5728_s22 + $0x10] sm:$0xff] }
  0xc2   : > { %1114 = vst [vmem:[#allocation2 + $0x10] sm:$0xff] %v1110_v1  ;;  %v1113_v4 = vld [vmem:[%s5728_s22 + $0x18] sm:$0xff] }
  0xc3   : > { %1115 = vst [vmem:[#allocation2] sm:$0xff] %v1111_v2 }
  0xc4   : > { %1116 = vst [vmem:[#allocation2 + $0x18] sm:$0xff] %v1112_v3 }
  0xc5   : > { %1117 = vst [vmem:[#allocation2 + $0x8] sm:$0xff] %v1113_v4 }
  0xc6 PF: > { %v4032_v5 = vld [vmem:[%s5752_s7 + $0xa8] sm:$0xf]  ;;  %v4426_v6 = vld [vmem:[%s5752_s7 + $0xb0] sm:$0xf0]  ;;  %v4425_v7 = vld [vmem:[%s5752_s7 + $0xac] sm:$0xf] }
  0xc7   : > { %v4033_v8 = vor.u32 %v4426_v6, %v4032_v5  ;;  %v4034_v9 = vld [vmem:[%s5752_s7 + $0xb4] sm:$0xf0]  ;;  %v4020_v10 = vld [vmem:[%s5752_s7 + $0x90] sm:$0xf]  ;;  %v4423_v11 = vld [vmem:[%s5752_s7 + $0x98] sm:$0xf0] }
  0xc8   : > { %v4037_v12 = vor.u32 %v4425_v7, %v4034_v9  ;;  %v4422_v13 = vld [vmem:[%s5752_s7 + $0x94] sm:$0xf]  ;;  %v4022_v14 = vld [vmem:[%s5752_s7 + $0x9c] sm:$0xf0]  ;;  %v4021_v15 = vor.u32 %v4423_v11, %v4020_v10  ;;  %v4008_v17 = vld [vmem:[%s5752_s7 + $0x78] sm:$0xf] }
  0xc9   : > { %1296 = vmatpush.bf16.msra.mxu0 %v4033_v8  ;;  %v4025_v16 = vor.u32 %v4422_v13, %v4022_v14  ;;  %v4420_v18 = vld [vmem:[%s5752_s7 + $0x80] sm:$0xf0]  ;;  %v4419_v19 = vld [vmem:[%s5752_s7 + $0x7c] sm:$0xf]  ;;  %v4010_v20 = vld [vmem:[%s5752_s7 + $0x84] sm:$0xf0] }
  0xca   : > { %1315 = vmatpush.bf16.msra.mxu1 %v4037_v12  ;;  %v4009_v21 = vor.u32 %v4420_v18, %v4008_v17  ;;  %v4013_v22 = vor.u32 %v4419_v19, %v4010_v20  ;;  %v3996_v23 = vld [vmem:[%s5752_s7 + $0x60] sm:$0xf]  ;;  %v4417_v24 = vld [vmem:[%s5752_s7 + $0x68] sm:$0xf0]  ;;  %v4416_v25 = vld [vmem:[%s5752_s7 + $0x64] sm:$0xf] }
  0xcb   : > { %v3998_v26 = vld [vmem:[%s5752_s7 + $0x6c] sm:$0xf0]  ;;  %v3984_v27 = vld [vmem:[%s5752_s7 + $0x48] sm:$0xf]  ;;  %v3997_v28 = vor.u32 %v4417_v24, %v3996_v23  ;;  %v4414_v29 = vld [vmem:[%s5752_s7 + $0x50] sm:$0xf0] }
  0xcc   : > { %v4413_v30 = vld [vmem:[%s5752_s7 + $0x4c] sm:$0xf]  ;;  %v3986_v31 = vld [vmem:[%s5752_s7 + $0x54] sm:$0xf0]  ;;  %v4001_v32 = vor.u32 %v4416_v25, %v3998_v26  ;;  %v3985_v33 = vor.u32 %v4414_v29, %v3984_v27  ;;  %v3972_v35 = vld [vmem:[%s5752_s7 + $0x30] sm:$0xf] }
  0xcd   : > { %1297 = vmatpush.bf16.msra.mxu0 %v4021_v15  ;;  %v3989_v34 = vor.u32 %v4413_v30, %v3986_v31  ;;  %v4411_v36 = vld [vmem:[%s5752_s7 + $0x38] sm:$0xf0]  ;;  %v4410_v37 = vld [vmem:[%s5752_s7 + $0x34] sm:$0xf]  ;;  %v3974_v38 = vld [vmem:[%s5752_s7 + $0x3c] sm:$0xf0] }
  0xce   : > { %1316 = vmatpush.bf16.msra.mxu1 %v4025_v16  ;;  %v3973_v39 = vor.u32 %v4411_v36, %v3972_v35  ;;  %v4040_v40 = vld [vmem:[%s5752_s7 + $0xb0] sm:$0xf]  ;;  %v4427_v41 = vld [vmem:[%s5752_s7 + $0xb8] sm:$0xf0]  ;;  %v4028_v42 = vld [vmem:[%s5752_s7 + $0x98] sm:$0xf]  ;;  %v3977_v43 = vor.u32 %v4410_v37, %v3974_v38 }
  0xcf   : > { %v3960_v44 = vld [vmem:[%s5752_s7 + $0x18] sm:$0xf]  ;;  %v4408_v45 = vld [vmem:[%s5752_s7 + $0x20] sm:$0xf0]  ;;  %v4041_v46 = vor.u32 %v4427_v41, %v4040_v40  ;;  %v4407_v48 = vld [vmem:[%s5752_s7 + $0x1c] sm:$0xf] }
  0xd0   : > { %v4424_v47 = vld [vmem:[%s5752_s7 + $0xa0] sm:$0xf0]  ;;  %v3962_v49 = vld [vmem:[%s5752_s7 + $0x24] sm:$0xf0]  ;;  %v3961_v51 = vor.u32 %v4408_v45, %v3960_v44  ;;  %v4016_v52 = vld [vmem:[%s5752_s7 + $0x80] sm:$0xf] }
  0xd1   : > { %1298 = vmatpush.bf16.msra.mxu0 %v4009_v21  ;;  %1334 = vmatpush.bf16.msra.mxu2 %v4041_v46  ;;  %v4029_v50 = vor.u32 %v4424_v47, %v4028_v42  ;;  %v4421_v53 = vld [vmem:[%s5752_s7 + $0x88] sm:$0xf0]  ;;  %v3965_v54 = vor.u32 %v4407_v48, %v3962_v49  ;;  %v3948_v55 = vld [vmem:[%s5752_s7] sm:$0xf]  ;;  %v4404_v57 = vld [vmem:[%s5752_s7 + $0x4] sm:$0xf] }
  0xd2   : > { %1317 = vmatpush.bf16.msra.mxu1 %v4013_v22  ;;  %v4405_v56 = vld [vmem:[%s5752_s7 + $0x8] sm:$0xf0]  ;;  %v3950_v58 = vld [vmem:[%s5752_s7 + $0xc] sm:$0xf0]  ;;  %v4017_v60 = vor.u32 %v4421_v53, %v4016_v52  ;;  %v1119_v62 = vld [vmem:[#allocation2] sm:$0xff]  ;;  %vm1365_vm0 = vcmask 261120  }
  0xd3   : > { %v1118_v59 = vld [vmem:[#allocation2 + $0x10] sm:$0xff]  ;;  %v3949_v61 = vor.u32 %v4405_v56, %v3948_v55  ;;  %v4418_v0 = vld [vmem:[%s5752_s7 + $0x70] sm:$0xf0]  ;;  %v3953_v1 = vor.u32 %v4404_v57, %v3950_v58  ;;  %v3992_v4 = vld [vmem:[%s5752_s7 + $0x50] sm:$0xf]  ;;  %s5336_s9 = smov 96  }
  0xd4   : > { %v4004_v63 = vld [vmem:[%s5752_s7 + $0x68] sm:$0xf]  ;;  %v1126_v2 = vpack.c.bf16 %v1119_v62, %v1118_v59  ;;  %v4415_v5 = vld [vmem:[%s5752_s7 + $0x58] sm:$0xf0]  ;;  %v3980_v7 = vld [vmem:[%s5752_s7 + $0x38] sm:$0xf] }
  0xd5   : > { %1299 = vmatpush.bf16.msra.mxu0 %v3997_v28  ;;  %1335 = vmatpush.bf16.msra.mxu2 %v4029_v50  ;;  %v4005_v3 = vor.u32 %v4418_v0, %v4004_v63  ;;  %v3993_v6 = vor.u32 %v4415_v5, %v3992_v4  ;;  %v4412_v8 = vld [vmem:[%s5752_s7 + $0x40] sm:$0xf0]  ;;  %v1120_v10 = vld [vmem:[#allocation2 + $0x18] sm:$0xff]  ;;  %v3968_v13 = vld [vmem:[%s5752_s7 + $0x20] sm:$0xf]  ;;  %vm1494_vm1 = vcmask 1043456  }
  0xd6   : > { %1318 = vmatpush.bf16.msra.mxu1 %v4001_v32  ;;  %v3981_v9 = vor.u32 %v4412_v8, %v3980_v7  ;;  %v1121_v11 = vld [vmem:[#allocation2 + $0x8] sm:$0xff]  ;;  %v4409_v14 = vld [vmem:[%s5752_s7 + $0x28] sm:$0xf0]  ;;  %v3956_v16 = vld [vmem:[%s5752_s7 + $0x8] sm:$0xf]  ;;  %vm1442_vm2 = vcmask 64512  }
  0xd7   : > { %v1127_v12 = vpack.c.bf16 %v1121_v11, %v1120_v10  ;;  %v3969_v15 = vor.u32 %v4409_v14, %v3968_v13  ;;  %v4406_v17 = vld [vmem:[%s5752_s7 + $0x10] sm:$0xf0]  ;;  %v1160_v19 = vld [vmem:[%s5760_s29] sm:$0x7]  ;;  %s5337_s11 = smov 64   ;;  %s5338_s13 = smov 32  }
  0xd8   : > { %v3957_v18 = vor.u32 %v4406_v17, %v3956_v16  ;;  %v1163_v20 = vperm.slane %v1160_v19, 1  ;;  %v1162_v22 = vperm.slane %v1160_v19, 0  ;;  %v5905_v56 = vperm.slane %v1160_v19, 2  ;;  %v5930_v13 = vld [vmem:[%s5738_s12 + $0x8] sm:$0xff] }
  0xd9   : > { %1300 = vmatpush.bf16.msra.mxu0 %v3985_v33  ;;  %1336 = vmatpush.bf16.msra.mxu2 %v4017_v60  ;;  %vm2328_vm3 = vcmask 523264   ;;  %vm2333_vm4 = vcmask 785408  }
  0xda   : > { %1319 = vmatpush.bf16.msra.mxu1 %v3989_v34 }
  0xdd   : > { %1301 = vmatpush.bf16.msra.mxu0 %v3973_v39  ;;  %1337 = vmatpush.bf16.msra.mxu2 %v4005_v3 }
  0xde   : > { %1320 = vmatpush.bf16.msra.mxu1 %v3977_v43 }
  0xe1   : > { %1302 = vmatpush.bf16.msra.mxu0 %v3961_v51  ;;  %1338 = vmatpush.bf16.msra.mxu2 %v3993_v6 }
  0xe2   : > { %1321 = vmatpush.bf16.msra.mxu1 %v3965_v54 }
  0xe5   : > { %1303 = vmatpush.bf16.msra.mxu0 %v3949_v61  ;;  %1339 = vmatpush.bf16.msra.mxu2 %v3981_v9 }
  0xe6   : > { %1322 = vmatpush.bf16.msra.mxu1 %v3953_v1 }
  0xe8   : > { %1304 = vmatmul.bf16.vlgmr.msra.gmra.mxu0 %v1126_v2 }
  0xe9   : > { %1323 = vmatmul.bf16.vlgmr.msra.gmra.mxu1 %v1126_v2  ;;  %1340 = vmatpush.bf16.msra.mxu2 %v3969_v15 }
  0xed   : > { %1341 = vmatpush.bf16.msra.mxu2 %v3957_v18  ;;  %v5935_v18 = vld [vmem:[%s5738_s12 + $0x10] sm:$0xff] }
  0xf0   : > { %1342 = vmatmul.bf16.vlgmr.msra.gmra.mxu2 %v1126_v2  ;;  %v5919_v2 = vld [vmem:[%s5738_s12] sm:$0xff] }
  0xf8   : > { %1309 = vmatmul.bf16.gmra.mxu0 %v1127_v12 }
  0xf9   : > { %1328 = vmatmul.bf16.gmra.mxu1 %v1127_v12 }
 0x100   : > { %1347 = vmatmul.bf16.gmra.mxu2 %v1127_v12 }
 0x165   : > { %v1305_v25 = vpop.f32.mrf.mxu0 }
 0x166   : > { %v1324_v21 = vpop.f32.mrf.mxu1  ;;  %v1306_v26 = vadd.f32 %v1305_v25, %v1162_v22 }
 0x167   : > { %v1325_v23 = vadd.f32 %v1324_v21, %v1163_v20 }
 0x168   : > { %v5877_v29 = vpack.c.bf16 %v1306_v26, %v1306_v26 }
 0x169   : > { %v5873_v24 = vpack.c.bf16 %v1325_v23, %v1325_v23  ;;  %v5940_v23 = vld [vmem:[%s5738_s12 + $0x18] sm:$0xff] }
 0x16b   : > { %v1370_v27 = vsel %vm1365_vm0, %v5873_v24, 0 }
 0x16c   : > { %1379 = vmatpush.bf16.xpose.msra.mxu3 %v1370_v27 }
 0x16d   : > { %v1307_v36 = vpop.f32.mrf.mxu0 }
 0x16e   : > { %v1326_v28 = vpop.f32.mrf.mxu1  ;;  %v1308_v39 = vadd.f32 %v1307_v36, %v1162_v22 }
 0x16f   : > { %v1327_v30 = vadd.f32 %v1326_v28, %v1163_v20 }
 0x170   : > { %v5887_v43 = vpack.c.bf16 %v1308_v39, %v1308_v39 }
 0x171   : > { %v1358_v31 = vpack.c.bf16 %v1327_v30, %v1327_v30 }
 0x173   : > { %4042 = vmatmul.msk.bf16.vlgmr.msra.gmra.mxu3 %vm1365_vm0, %v5877_v29  ;;  %v1389_v32 = vsel %vm1365_vm0, %v1358_v31, 0  ;;  %v1603_v44 = vunpack.c.l.b16 %v1358_v31  ;;  %v1343_v57 = vpop.f32.mrf.mxu2 }
 0x174   : > { %1398 = vmatpush.bf16.xpose.msrb.mxu3 %v1389_v32  ;;  %v5908_v58 = vadd.f32 %v1343_v57, %v5905_v56  ;;  %v1574_v32 = vunpack.c.l.b16 %v5873_v24 }
 0x175   : > { %v5892_v48 = vpack.c.b16 %v1603_v44, %v1603_v44  ;;  %v1310_v50 = vpop.f32.mrf.mxu0 }
 0x176   : > { %v1329_v33 = vpop.f32.mrf.mxu1  ;;  %v1311_v51 = vadd.f32 %v1310_v50, %v1162_v22 }
 0x177   : > { %v1330_v34 = vadd.f32 %v1329_v33, %v1163_v20  ;;  %v5949_v33 = vpack.c.b16 %v1574_v32, %v1574_v32 }
 0x178   : > { %v1355_v52 = vpack.c.bf16 %v1311_v51, %v1311_v51 }
 0x179   : > { %v1359_v35 = vpack.c.bf16 %v1330_v34, %v1330_v34 }
 0x17a   : > { %v1627_v27 = vunpack.c.l.b16 %v1355_v52 }
 0x17b   : > { %v1408_v37 = vsel %vm1365_vm0, %v1359_v35, 0  ;;  %v1632_v38 = vunpack.c.l.b16 %v1359_v35  ;;  %v5910_v59 = vpop.f32.mrf.mxu2 }
 0x17c   : > { %1417 = vmatpush.bf16.xpose.msra.mxu3 %v1408_v37  ;;  %v5944_v30 = vpack.c.b16 %v1627_v27, %v1627_v27 }
 0x17d   : > { %v5883_v40 = vpack.c.b16 %v1632_v38, %v1632_v38  ;;  %v1312_v53 = vpop.f32.mrf.mxu0 }
 0x17e   : > { %v1331_v41 = vpop.f32.mrf.mxu1  ;;  %v1313_v54 = vadd.f32 %v1312_v53, %v1162_v22 }
 0x17f   : > { %1634 = vrot.lane.b32.xlu2 %v5883_v40, %s5336_s9  ;;  %v1332_v42 = vadd.f32 %v1331_v41, %v1163_v20 }
 0x180   : > { %v5901_v55 = vpack.c.bf16 %v1313_v54, %v1313_v54 }
 0x181   : > { %v1360_v45 = vpack.c.bf16 %v1332_v42, %v1332_v42 }
 0x183   : > { %4043 = vmatmul.msk.bf16.vlgmr.msrb.gmra.mxu3 %vm1365_vm0, %v5887_v43  ;;  %v1661_v46 = vunpack.c.l.b16 %v1360_v45  ;;  %v1427_v47 = vsel %vm1365_vm0, %v1360_v45, 0  ;;  %v1348_v60 = vpop.f32.mrf.mxu2 }
 0x184   : > { %1436 = vmatpush.bf16.xpose.msrb.mxu3 %v1427_v47  ;;  %v1349_v61 = vadd.f32 %v1348_v60, %v5905_v56 }
 0x185   : > { %v5894_v49 = vpack.c.b16 %v1661_v46, %v1661_v46 }
 0x186   : > { %v5913_v63 = vpack.c.bf16 %v1349_v61, %v1349_v61  ;;  %v1361_v61 = vpack.c.bf16 %v5908_v58, %v5908_v58 }
 0x187   : > { %1605 = vrot.lane.b32.xlu2 %v5892_v48, %s5336_s9  ;;  %1663 = vrot.lane.b32.xlu0 %v5894_v49, %s5336_s9 }
 0x188   : > { %v1534_v1 = vsel %vm1494_vm1, %v5913_v63, 0 }
 0x189   : > { %1543 = vmatpush.bf16.msrb.mxu2 %v1534_v1 }
 0x18b   : > { %v1350_v5 = vpop.f32.mrf.mxu2 }
 0x18c   : > { %v1351_v6 = vadd.f32 %v1350_v5, %v5905_v56 }
 0x18e   : > { %v5924_v8 = vpack.c.bf16 %v1351_v6, %v1351_v6  ;;  %v1598_v6 = vunpack.c.l.b16 %v5887_v43 }
 0x190   : > { %v1553_v11 = vsel %vm1494_vm1, %v5924_v8, 0 }
 0x193   : > { %4044 = vmatmul.msk.bf16.vlgmr.msra.gmra.mxu3 %vm1365_vm0, %v1355_v52  ;;  %v1569_v52 = vunpack.c.l.b16 %v5877_v29  ;;  %v1656_v29 = vunpack.c.l.b16 %v5901_v55 }
 0x194   : > { %1562 = vmatpush.bf16.msra.mxu3 %v1553_v11 }
 0x195   : > { %v5957_v60 = vpack.c.b16 %v1569_v52, %v1569_v52 }
 0x1a3   : > { %4045 = vmatmul.msk.bf16.vlgmr.msrb.gmra.mxu3 %vm1365_vm0, %v5901_v55 }
 0x1d9   : > { %v1635_v62 = vpop.permute.xlu2 %1634 }
 0x1da   : > { %v1640_v0 = vsel %vm1365_vm0, %v1635_v62, 0  ;;  %v1733_v62 = vunpack.c.l.b16 %v1361_v61 }
 0x1db   : > { %1649 = vmatpush.bf16.xpose.msra.mxu2 %v1640_v0 }
 0x1dc   : > { %v5963_v0 = vpack.c.b16 %v1733_v62, %v1733_v62 }
 0x1f6   : > { %v1381_v3 = vpop.f32.mrf.mxu3 }
 0x1f7   : > { %v1382_v4 = vadd.f32 %v1381_v3, %v5919_v2 }
 0x1f9   : > { %v1443_v7 = vsel %vm1442_vm2, %v1382_v4, -inf  ;;  %v1664_v9 = vpop.permute.xlu0 %1663 }
 0x1fa   : > { %1444 = vmax.xlane.f32.xlu0 %v1443_v7  ;;  %v1669_v10 = vsel %vm1365_vm0, %v1664_v9, 0  ;;  %v5975_v7 = vpack.c.b16 %v1598_v6, %v1598_v6  ;;  %v1346_v9 = vadd.f32 %v5910_v59, %v5905_v56 }
 0x1fb   : > { %1678 = vmatpush.bf16.xpose.msrb.mxu3 %v1669_v10  ;;  %v1496_v10 = vsel %vm1494_vm1, %v1361_v61, 0 }
 0x1fc   : > { %v5981_v55 = vpack.c.bf16 %v1346_v9, %v1346_v9  ;;  %1505 = vmatpush.bf16.msrb.mxu1 %v1496_v10 }
 0x1fe   : > { %v1383_v12 = vpop.f32.mrf.mxu3  ;;  %v1515_v11 = vsel %vm1494_vm1, %v5981_v55, 0  ;;  %v1757_v62 = vunpack.c.l.b16 %v5981_v55 }
 0x1ff   : > { %v1606_v12 = vpop.permute.xlu2 %1605 }
 0x200   : > { %1524 = vmatpush.bf16.msra.mxu1 %v1515_v11 }
 0x206   : > { %v1400_v14 = vpop.f32.mrf.mxu3 }
 0x207   : > { %v1401_v15 = vadd.f32 %v1400_v14, %v5930_v13 }
 0x209   : > { %v1446_v16 = vsel %vm1442_vm2, %v1401_v15, -inf }
 0x20a   : > { %1447 = vmax.xlane.f32.xlu1 %v1446_v16 }
 0x20e   : > { %v1402_v17 = vpop.f32.mrf.mxu3 }
 0x20f   : > { %v1611_v17 = vsel %vm1365_vm0, %v1606_v12, 0 }
 0x216   : > { %v1419_v19 = vpop.f32.mrf.mxu3 }
 0x217   : > { %v1420_v20 = vadd.f32 %v1419_v19, %v5935_v18 }
 0x219   : > { %v1449_v21 = vsel %vm1442_vm2, %v1420_v20, -inf }
 0x21a   : > { %1450 = vmax.xlane.f32.xlu0 %v1449_v21 }
 0x21e   : > { %v1421_v22 = vpop.f32.mrf.mxu3 }
 0x226   : > { %v1438_v25 = vpop.f32.mrf.mxu3 }
 0x227   : > { %v1439_v26 = vadd.f32 %v1438_v25, %v5940_v23 }
 0x229   : > { %v1452_v28 = vsel %vm1442_vm2, %v1439_v26, -inf }
 0x22a   : > { %1453 = vmax.xlane.f32.xlu1 %v1452_v28 }
 0x22e   : > { %1629 = vrot.lane.b32.xlu0 %v5944_v30, %s5336_s9  ;;  %v1440_v31 = vpop.f32.mrf.mxu3 }
 0x243   : > { %1576 = vrot.lane.b32.xlu1 %v5949_v33, %s5336_s9 }
 0x26d   : > { %v1445_v34 = vpop.xlane.xlu0 %1444 }
 0x26e   : > { %v1455_v35 = vsub.f32 %v1382_v4, %v1445_v34  ;;  %v5969_v4 = vpack.c.b16 %v1656_v29, %v1656_v29 }
 0x270   : > { %v1459_v36 = vmul.f32 1.442695, %v1455_v35 }
 0x272   : > { %4722 = vpow2.f32 %v1459_v36 }
 0x278   : > { %v4723_v37 = vpop.eup %4722 }
 0x279   : > { %v1467_v38 = vsel %vm1442_vm2, %v4723_v37, 0.0 }
 0x27a   : > { %1468 = vadd.xlane.f32.xlu2 %v1467_v38 }
 0x27d   : > { %v1448_v39 = vpop.xlane.xlu1 %1447 }
 0x27e   : > { %v1456_v41 = vsub.f32 %v1401_v15, %v1448_v39 }
 0x280   : > { %v1461_v42 = vmul.f32 1.442695, %v1456_v41 }
 0x282   : > { %4724 = vpow2.f32 %v1461_v42 }
 0x288   : > { %v4725_v44 = vpop.eup %4724 }
 0x289   : > { %v1470_v24 = vsel %vm1442_vm2, %v4725_v44, 0.0 }
 0x28a   : > { %1471 = vadd.xlane.f32.xlu1 %v1470_v24 }
 0x28d   : > { %v1451_v45 = vpop.xlane.xlu0 %1450 }
 0x28e   : > { %v1457_v46 = vsub.f32 %v1420_v20, %v1451_v45 }
 0x290   : > { %v1463_v47 = vmul.f32 1.442695, %v1457_v46 }
 0x292   : > { %4726 = vpow2.f32 %v1463_v47 }
 0x298   : > { %v4727_v50 = vpop.eup %4726 }
 0x299   : > { %v1473_v51 = vsel %vm1442_vm2, %v4727_v50, 0.0 }
 0x29a   : > { %1474 = vadd.xlane.f32.xlu2 %v1473_v51 }
 0x29d   : > { %v1454_v53 = vpop.xlane.xlu1 %1453 }
 0x29e   : > { %v1458_v54 = vsub.f32 %v1439_v26, %v1454_v53  ;;  %v1781_v53 = vunpack.c.l.b16 %v5913_v63 }
 0x2a0   : > { %v1465_v57 = vmul.f32 1.442695, %v1458_v54  ;;  %v1630_v25 = vpop.permute.xlu0 %1629  ;;  %v6005_v54 = vpack.c.b16 %v1781_v53, %v1781_v53 }
 0x2a2   : > { %4728 = vpow2.f32 %v1465_v57 }
 0x2a3   : > { %1571 = vrot.lane.b32.xlu1 %v5957_v60, %s5336_s9 }
 0x2a8   : > { %v4729_v1 = vpop.eup %4728 }
 0x2a9   : > { %v1476_v3 = vsel %vm1442_vm2, %v4729_v1, 0.0 }
 0x2aa   : > { %1477 = vadd.xlane.f32.xlu0 %v1476_v3 }
 0x2ab   : > { %1735 = vrot.lane.b32.xlu1 %v5963_v0, %s5336_s9 }
 0x2b2   : > { %1658 = vrot.lane.b32.xlu2 %v5969_v4, %s5336_s9 }
 0x2b5   : > { %v1577_v58 = vpop.permute.xlu1 %1576 }
 0x2b6   : > { %v1582_v5 = vsel %vm1365_vm0, %v1577_v58, 0  ;;  %v6014_v58 = vpack.c.b16 %v1757_v62, %v1757_v62 }
 0x2b7   : > { %1591 = vmatpush.bf16.xpose.msrb.mxu0 %v1582_v5 }
 0x2be   : > { %1600 = vrot.lane.b32.xlu0 %v5975_v7, %s5336_s9 }
 0x2ed   : > { %v1469_v14 = vpop.xlane.xlu2 %1468 }
 0x2ee   : > { %4730 = vrcp.f32 %v1469_v14 }
 0x2f4   : > { %v4731_v43 = vpop.eup %4730 }
 0x2f5   : > { %v1483_v15 = vmul.f32 %v4731_v43, %v4723_v37 }
 0x2f7   : > { %v1487_v16 = vpack.c.bf16 %v1483_v15, %v1483_v15 }
 0x2f9   : > { %4046 = vmatmul.msk.bf16.vlgmr.msrb.gmra.mxu1 %vm1442_vm2, %v1487_v16 }
 0x2fa   : > { %1620 = vmatpush.bf16.xpose.msrb.mxu1 %v1611_v17 }
 0x2fd   : > { %v1472_v56 = vpop.xlane.xlu1 %1471 }
 0x2fe   : > { %4732 = vrcp.f32 %v1472_v56 }
 0x304   : > { %v4733_v59 = vpop.eup %4732 }
 0x305   : > { %v1484_v19 = vmul.f32 %v4733_v59, %v4725_v44 }
 0x307   : > { %v1488_v20 = vpack.c.bf16 %v1484_v19, %v1484_v19 }
 0x309   : > { %4047 = vmatmul.msk.bf16.vlgmr.msra.gmra.mxu1 %vm1442_vm2, %v1488_v20 }
 0x30d   : > { %v1475_v21 = vpop.xlane.xlu2 %1474 }
 0x30e   : > { %4734 = vrcp.f32 %v1475_v21 }
 0x314   : > { %v4735_v22 = vpop.eup %4734 }
 0x315   : > { %v1485_v26 = vmul.f32 %v4735_v22, %v4727_v50  ;;  %v1572_v27 = vpop.permute.xlu1 %1571  ;;  %v1659_v37 = vpop.permute.xlu2 %1658 }
 0x316   : > { %4050 = vmatmul.msk.bf16.vlgmr.msrb.gmra.mxu0 %vm1365_vm0, %v1572_v27 }
 0x317   : > { %v1489_v28 = vpack.c.bf16 %v1485_v26, %v1485_v26 }
 0x319   : > { %4048 = vmatmul.msk.bf16.vlgmr.msrb.gmra.mxu2 %vm1442_vm2, %v1489_v28 }
 0x31d   : > { %v1478_v31 = vpop.xlane.xlu0 %1477  ;;  %v1736_v50 = vpop.permute.xlu1 %1735 }
 0x31e   : > { %4736 = vrcp.f32 %v1478_v31  ;;  %v1741_v51 = vsel %vm1494_vm1, %v1736_v50, 0 }
 0x31f   : > { %1750 = vmatpush.bf16.msra.mxu0 %v1741_v51 }
 0x324   : > { %v4737_v32 = vpop.eup %4736 }
 0x325   : > { %v1486_v34 = vmul.f32 %v4737_v32, %v4729_v1 }
 0x327   : > { %v1490_v35 = vpack.c.bf16 %v1486_v34, %v1486_v34 }
 0x329   : > { %4049 = vmatmul.msk.bf16.vlgmr.msra.gmra.mxu3 %vm1442_vm2, %v1490_v35  ;;  %4052 = vmatmul.msk.bf16.vlgmr.msra.gmra.mxu2 %vm1365_vm0, %v1630_v25  ;;  %v1805_v25 = vunpack.c.l.b16 %v5924_v8 }
 0x32b   : > { %v6032_v28 = vpack.c.b16 %v1805_v25, %v1805_v25 }
 0x330   : > { %v1601_v36 = vpop.permute.xlu0 %1600 }
 0x331   : > { %4051 = vmatmul.msk.bf16.vlgmr.msrb.gmra.mxu1 %vm1365_vm0, %v1601_v36 }
 0x339   : > { %4053 = vmatmul.msk.bf16.vlgmr.msrb.gmra.mxu3 %vm1365_vm0, %v1659_v37 }
 0x376   : > { %v5995_v38 = vpop.f32.mrf.mxu1 }
 0x37e   : > { %v1509_v39 = vpop.f32.mrf.mxu1 }
 0x386   : > { %v5997_v41 = vpop.f32.mrf.mxu1 }
 0x38e   : > { %v1528_v42 = vpop.f32.mrf.mxu1 }
 0x393   : > { %v1593_v44 = vpop.f32.mrf.mxu0 }
 0x394   : > { %v1594_v24 = vadd.f32 %v1593_v44, %v5919_v2 }
 0x396   : > { %v1684_v45 = vsel %vm1442_vm2, %v1594_v24, -inf }
 0x397   : > { %1685 = vmax.xlane.f32.xlu0 %v1684_v45 }
 0x39b   : > { %v1595_v46 = vpop.f32.mrf.mxu0 }
 0x39c   : > { %v6001_v47 = vpop.f32.mrf.mxu2 }
 0x3a4   : > { %v1547_v52 = vpop.f32.mrf.mxu2 }
 0x3ab   : > { %1783 = vrot.lane.b32.xlu0 %v6005_v54, %s5336_s9 }
 0x3ac   : > { %v6009_v57 = vpop.f32.mrf.mxu3  ;;  %v1651_v61 = vpop.f32.mrf.mxu2 }
 0x3ad   : > { %v1652_v1 = vadd.f32 %v1651_v61, %v5935_v18 }
 0x3ae   : > { %v1622_v3 = vpop.f32.mrf.mxu1 }
 0x3af   : > { %v1690_v29 = vsel %vm1442_vm2, %v1652_v1, -inf  ;;  %v1623_v63 = vadd.f32 %v1622_v3, %v5930_v13 }
 0x3b0   : > { %1691 = vmax.xlane.f32.xlu2 %v1690_v29 }
 0x3b1   : > { %v1687_v10 = vsel %vm1442_vm2, %v1623_v63, -inf }
 0x3b3   : > { %1759 = vrot.lane.b32.xlu0 %v6014_v58, %s5336_s9 }
 0x3b4   : > { %v1566_v5 = vpop.f32.mrf.mxu3  ;;  %v1653_v6 = vpop.f32.mrf.mxu2 }
 0x3b6   : > { %v1624_v9 = vpop.f32.mrf.mxu1 }
 0x3b8   : > { %1688 = vmax.xlane.f32.xlu2 %v1687_v10 }
 0x3bb   : > { %1899 = vrot.lane.b32.xlu0 %v5894_v49, %s5337_s11 }
 0x3bc   : > { %v1680_v55 = vpop.f32.mrf.mxu3 }
 0x3bd   : > { %v1681_v11 = vadd.f32 %v1680_v55, %v5940_v23 }
 0x3bf   : > { %v1693_v12 = vsel %vm1442_vm2, %v1681_v11, -inf }
 0x3c0   : > { %1694 = vmax.xlane.f32.xlu1 %v1693_v12 }
 0x3c3   : > { %1874 = vrot.lane.b32.xlu0 %v5944_v30, %s5337_s11 }
 0x3c4   : > { %v1682_v14 = vpop.f32.mrf.mxu3 }
 0x3d9   : > { %1830 = vrot.lane.b32.xlu1 %v5949_v33, %s5337_s11 }
 0x40a   : > { %v1686_v43 = vpop.xlane.xlu0 %1685 }
 0x40b   : > { %v1696_v15 = vsub.f32 %v1594_v24, %v1686_v43 }
 0x40d   : > { %v1700_v16 = vmul.f32 1.442695, %v1696_v15 }
 0x40f   : > { %4738 = vpow2.f32 %v1700_v16 }
 0x415   : > { %v4739_v17 = vpop.eup %4738 }
 0x416   : > { %v1708_v56 = vsel %vm1442_vm2, %v4739_v17, 0.0 }
 0x417   : > { %1709 = vadd.xlane.f32.xlu2 %v1708_v56 }
 0x41d   : > { %v1784_v59 = vpop.permute.xlu0 %1783 }
 0x41e   : > { %v1789_v19 = vsel %vm1494_vm1, %v1784_v59, 0 }
 0x41f   : > { %1798 = vmatpush.bf16.msrb.mxu2 %v1789_v19 }
 0x423   : > { %v1692_v20 = vpop.xlane.xlu2 %1691 }
 0x424   : > { %v1698_v31 = vsub.f32 %v1652_v1, %v1692_v20 }
 0x425   : > { %v1760_v21 = vpop.permute.xlu0 %1759 }
 0x426   : > { %v1765_v22 = vsel %vm1494_vm1, %v1760_v21, 0  ;;  %v1704_v34 = vmul.f32 1.442695, %v1698_v31 }
 0x427   : > { %1774 = vmatpush.bf16.msra.mxu1 %v1765_v22 }
 0x42b   : > { %v1689_v26 = vpop.xlane.xlu2 %1688 }
 0x42c   : > { %v1697_v27 = vsub.f32 %v1623_v63, %v1689_v26 }
 0x42d   : > { %v1900_v53 = vpop.permute.xlu0 %1899 }
 0x42e   : > { %v1702_v32 = vmul.f32 1.442695, %v1697_v27  ;;  %v1905_v3 = vsel %vm1365_vm0, %v1900_v53, 0 }
 0x42f   : > { %1807 = vrot.lane.b32.xlu2 %v6032_v28, %s5336_s9 }
 0x430   : > { %4740 = vpow2.f32 %v1702_v32 }
 0x431   : > { %4742 = vpow2.f32 %v1704_v34 }
 0x433   : > { %v1695_v35 = vpop.xlane.xlu1 %1694 }
 0x434   : > { %v1699_v36 = vsub.f32 %v1681_v11, %v1695_v35 }
 0x435   : > { %v1875_v10 = vpop.permute.xlu0 %1874 }
 0x436   : > { %v4741_v37 = vpop.eup %4740  ;;  %v1706_v39 = vmul.f32 1.442695, %v1699_v36 }
 0x437   : > { %1876 = vrot.lane.b32.xlu2 %v5883_v40, %s5337_s11  ;;  %v1711_v8 = vsel %vm1442_vm2, %v4741_v37, 0.0  ;;  %v4743_v42 = vpop.eup %4742 }
 0x438   : > { %4744 = vpow2.f32 %v1706_v39  ;;  %1712 = vadd.xlane.f32.xlu1 %v1711_v8  ;;  %v1714_v45 = vsel %vm1442_vm2, %v4743_v42, 0.0 }
 0x43e   : > { %v4745_v44 = vpop.eup %4744 }
 0x43f   : > { %1853 = vrot.lane.b32.xlu2 %v5892_v48, %s5337_s11  ;;  %v1717_v24 = vsel %vm1442_vm2, %v4745_v44, 0.0 }
 0x440   : > { %1718 = vadd.xlane.f32.xlu0 %v1717_v24  ;;  %1715 = vadd.xlane.f32.xlu1 %v1714_v45 }
 0x447   : > { %1828 = vrot.lane.b32.xlu2 %v5957_v60, %s5337_s11 }
 0x44b   : > { %v1831_v46 = vpop.permute.xlu1 %1830 }
 0x44c   : > { %v1836_v50 = vsel %vm1365_vm0, %v1831_v46, 0 }
 0x44d   : > { %1845 = vmatpush.bf16.xpose.msrb.mxu0 %v1836_v50 }
 0x44f   : > { %2010 = vrot.lane.b32.xlu2 %v6005_v54, %s5337_s11 }
 0x454   : > { %1851 = vrot.lane.b32.xlu0 %v5975_v7, %s5337_s11 }
 0x459   : > { %1897 = vrot.lane.b32.xlu1 %v5969_v4, %s5337_s11 }
 0x45c   : > { %1968 = vrot.lane.b32.xlu0 %v5963_v0, %s5337_s11 }
 0x464   : > { %2031 = vrot.lane.b32.xlu0 %v6032_v28, %s5337_s11 }
 0x46c   : > { %2077 = vrot.lane.b32.xlu0 %v5892_v48, %s5338_s13 }
 0x48a   : > { %v1710_v51 = vpop.xlane.xlu2 %1709 }
 0x48b   : > { %4746 = vrcp.f32 %v1710_v51 }
 0x491   : > { %v4747_v52 = vpop.eup %4746 }
 0x492   : > { %v1724_v61 = vmul.f32 %v4747_v52, %v4739_v17  ;;  %v1808_v62 = vpop.permute.xlu2 %1807 }
 0x493   : > { %v1813_v1 = vsel %vm1494_vm1, %v1808_v62, 0 }
 0x494   : > { %v1728_v29 = vpack.c.bf16 %v1724_v61, %v1724_v61  ;;  %1822 = vmatpush.bf16.msra.mxu3 %v1813_v1 }
 0x496   : > { %4054 = vmatmul.msk.bf16.vlgmr.msra.gmra.mxu0 %vm1442_vm2, %v1728_v29 }
 0x498   : > { %1914 = vmatpush.bf16.xpose.msrb.mxu3 %v1905_v3 }
 0x49a   : > { %v1877_v63 = vpop.permute.xlu2 %1876 }
 0x49b   : > { %v1882_v5 = vsel %vm1365_vm0, %v1877_v63, 0 }
 0x49c   : > { %1891 = vmatpush.bf16.xpose.msra.mxu2 %v1882_v5 }
 0x4a2   : > { %v1854_v48 = vpop.permute.xlu2 %1853 }
 0x4a3   : > { %v1859_v6 = vsel %vm1365_vm0, %v1854_v48, 0 }
 0x4a4   : > { %1868 = vmatpush.bf16.xpose.msrb.mxu1 %v1859_v6 }
 0x4aa   : > { %v1829_v9 = vpop.permute.xlu2 %1828 }
 0x4ab   : > { %v1713_v55 = vpop.xlane.xlu1 %1712  ;;  %4058 = vmatmul.msk.bf16.vlgmr.msrb.gmra.mxu0 %vm1365_vm0, %v1829_v9 }
 0x4ac   : > { %4748 = vrcp.f32 %v1713_v55 }
 0x4b2   : > { %v4749_v11 = vpop.eup %4748  ;;  %v2011_v59 = vpop.permute.xlu2 %2010 }
 0x4b3   : > { %v1725_v12 = vmul.f32 %v4749_v11, %v4741_v37  ;;  %v1716_v14 = vpop.xlane.xlu1 %1715  ;;  %v1719_v43 = vpop.xlane.xlu0 %1718  ;;  %v2016_v22 = vsel %vm1494_vm1, %v2011_v59, 0 }
 0x4b4   : > { %4750 = vrcp.f32 %v1716_v14 }
 0x4b5   : > { %v1729_v15 = vpack.c.bf16 %v1725_v12, %v1725_v12  ;;  %4752 = vrcp.f32 %v1719_v43 }
 0x4b7   : > { %4055 = vmatmul.msk.bf16.vlgmr.msra.gmra.mxu1 %vm1442_vm2, %v1729_v15 }
 0x4ba   : > { %v4751_v16 = vpop.eup %4750 }
 0x4bb   : > { %v4753_v17 = vpop.eup %4752  ;;  %v1726_v56 = vmul.f32 %v4751_v16, %v4743_v42 }
 0x4bc   : > { %v1727_v19 = vmul.f32 %v4753_v17, %v4745_v44 }
 0x4bd   : > { %v1730_v20 = vpack.c.bf16 %v1726_v56, %v1726_v56 }
 0x4be   : > { %v1731_v21 = vpack.c.bf16 %v1727_v19, %v1727_v19 }
 0x4bf   : > { %4056 = vmatmul.msk.bf16.vlgmr.msrb.gmra.mxu2 %vm1442_vm2, %v1730_v20 }
 0x4c0   : > { %4057 = vmatmul.msk.bf16.vlgmr.msra.gmra.mxu3 %vm1442_vm2, %v1731_v21  ;;  %2025 = vmatpush.bf16.msrb.mxu2 %v2016_v22 }
 0x4c6   : > { %v1852_v25 = vpop.permute.xlu0 %1851 }
 0x4c7   : > { %4059 = vmatmul.msk.bf16.vlgmr.msrb.gmra.mxu1 %vm1365_vm0, %v1852_v25 }
 0x4cb   : > { %v1898_v27 = vpop.permute.xlu1 %1897 }
 0x4ce   : > { %v1969_v26 = vpop.permute.xlu0 %1968 }
 0x4cf   : > { %v1974_v31 = vsel %vm1494_vm1, %v1969_v26, 0  ;;  %4060 = vmatmul.msk.bf16.vlgmr.msra.gmra.mxu2 %vm1365_vm0, %v1875_v10 }
 0x4d0   : > { %4061 = vmatmul.msk.bf16.vlgmr.msrb.gmra.mxu3 %vm1365_vm0, %v1898_v27  ;;  %1983 = vmatpush.bf16.msra.mxu0 %v1974_v31 }
 0x4d6   : > { %v2032_v32 = vpop.permute.xlu0 %2031 }
 0x4d7   : > { %v2037_v34 = vsel %vm1494_vm1, %v2032_v32, 0 }
 0x4d8   : > { %2046 = vmatpush.bf16.msra.mxu3 %v2037_v34 }
 0x4de   : > { %v2078_v43 = vpop.permute.xlu0 %2077 }
 0x4df   : > { %v2083_v17 = vsel %vm1365_vm0, %v2078_v43, 0 }
 0x513   : > { %v6073_v35 = vpop.f32.mrf.mxu0 }
 0x51b   : > { %v1754_v36 = vpop.f32.mrf.mxu0 }
 0x528   : > { %v1847_v37 = vpop.f32.mrf.mxu0 }
 0x529   : > { %v1848_v39 = vadd.f32 %v1847_v37, %v5919_v2 }
 0x52b   : > { %v1920_v8 = vsel %vm1442_vm2, %v1848_v39, -inf }
 0x52c   : > { %1921 = vmax.xlane.f32.xlu1 %v1920_v8 }
 0x530   : > { %v1849_v42 = vpop.f32.mrf.mxu0 }
 0x534   : > { %v6077_v44 = vpop.f32.mrf.mxu1 }
 0x535   : > { %v4686_v24 = vpack.i.bf16 %v6077_v44, %v6073_v35 }
 0x53c   : > { %v1778_v45 = vpop.f32.mrf.mxu1 }
 0x542   : > { %v6081_v46 = vpop.f32.mrf.mxu2 }
 0x543   : > { %v6083_v50 = vpop.f32.mrf.mxu3 }
 0x544   : > { %v4701_v51 = vpack.i.bf16 %v6083_v50, %v6081_v46  ;;  %v1870_v52 = vpop.f32.mrf.mxu1 }
 0x545   : > { %1989 = vrot.lane.b32.xlu1 %v6014_v58, %s5337_s11  ;;  %v1871_v14 = vadd.f32 %v1870_v52, %v5930_v13 }
 0x54a   : > { %v1802_v53 = vpop.f32.mrf.mxu2 }
 0x54b   : > { %v1826_v61 = vpop.f32.mrf.mxu3 }
 0x54c   : > { %v1872_v62 = vpop.f32.mrf.mxu1 }
 0x54d   : > { %2054 = vrot.lane.b32.xlu1 %v5949_v33, %s5338_s13 }
 0x552   : > { %v1893_v1 = vpop.f32.mrf.mxu2 }
 0x553   : > { %v1894_v3 = vadd.f32 %v1893_v1, %v5935_v18  ;;  %v1916_v29 = vpop.f32.mrf.mxu3 }
 0x554   : > { %v1917_v6 = vadd.f32 %v1916_v29, %v5940_v23 }
 0x555   : > { %v1926_v63 = vsel %vm1442_vm2, %v1894_v3, -inf }
 0x556   : > { %1927 = vmax.xlane.f32.xlu0 %v1926_v63  ;;  %v1929_v9 = vsel %vm1442_vm2, %v1917_v6, -inf }
 0x55a   : > { %v1895_v5 = vpop.f32.mrf.mxu2 }
 0x55b   : > { %v1918_v48 = vpop.f32.mrf.mxu3 }
 0x56a   : > { %2052 = vrot.lane.b32.xlu0 %v5957_v60, %s5338_s13  ;;  %v1923_v60 = vsel %vm1442_vm2, %v1871_v14, -inf }
 0x577   : > { %1930 = vmax.xlane.f32.xlu1 %v1929_v9 }
 0x590   : > { %2123 = vrot.lane.b32.xlu1 %v5894_v49, %s5338_s13 }
 0x59f   : > { %v1922_v33 = vpop.xlane.xlu1 %1921 }
 0x5a0   : > { %v1932_v10 = vsub.f32 %v1848_v39, %v1922_v33 }
 0x5a2   : > { %v1936_v55 = vmul.f32 1.442695, %v1932_v10 }
 0x5a4   : > { %4754 = vpow2.f32 %v1936_v55 }
 0x5aa   : > { %v4755_v11 = vpop.eup %4754 }
 0x5ab   : > { %v1944_v12 = vsel %vm1442_vm2, %v4755_v11, 0.0 }
 0x5ac   : > { %1945 = vadd.xlane.f32.xlu2 %v1944_v12 }
 0x5b4   : > { %1924 = vmax.xlane.f32.xlu2 %v1923_v60 }
 0x5b7   : > { %v1990_v15 = vpop.permute.xlu1 %1989 }
 0x5b8   : > { %v1995_v16 = vsel %vm1494_vm1, %v1990_v15, 0 }
 0x5b9   : > { %2004 = vmatpush.bf16.msra.mxu1 %v1995_v16 }
 0x5bd   : > { %2092 = vmatpush.bf16.xpose.msrb.mxu1 %v2083_v17 }
 0x5bf   : > { %v2055_v49 = vpop.permute.xlu1 %2054 }
 0x5c0   : > { %v2060_v56 = vsel %vm1365_vm0, %v2055_v49, 0 }
 0x5c1   : > { %2069 = vmatpush.bf16.xpose.msrb.mxu0 %v2060_v56 }
 0x5c9   : > { %v1928_v59 = vpop.xlane.xlu0 %1927 }
 0x5ca   : > { %v1934_v19 = vsub.f32 %v1894_v3, %v1928_v59 }
 0x5cc   : > { %v1940_v20 = vmul.f32 1.442695, %v1934_v19  ;;  %2100 = vrot.lane.b32.xlu2 %v5883_v40, %s5338_s13 }
 0x5ce   : > { %4756 = vpow2.f32 %v1940_v20 }
 0x5d4   : > { %v4757_v21 = vpop.eup %4756 }
 0x5d5   : > { %v1950_v22 = vsel %vm1442_vm2, %v4757_v21, 0.0 }
 0x5d6   : > { %1951 = vadd.xlane.f32.xlu1 %v1950_v22 }
 0x5ea   : > { %v1931_v25 = vpop.xlane.xlu1 %1930 }
 0x5eb   : > { %v1935_v26 = vsub.f32 %v1917_v6, %v1931_v25 }
 0x5ed   : > { %v1942_v27 = vmul.f32 1.442695, %v1935_v26 }
 0x5ef   : > { %4758 = vpow2.f32 %v1942_v27  ;;  %2098 = vrot.lane.b32.xlu1 %v5944_v30, %s5338_s13 }
 0x5f5   : > { %v4759_v31 = vpop.eup %4758 }
 0x5f6   : > { %v1953_v32 = vsel %vm1442_vm2, %v4759_v31, 0.0 }
 0x5f7   : > { %1954 = vadd.xlane.f32.xlu2 %v1953_v32 }
 0x602   : > { %v2124_v34 = vpop.permute.xlu1 %2123 }
 0x603   : > { %v2129_v36 = vsel %vm1365_vm0, %v2124_v34, 0 }
 0x604   : > { %2138 = vmatpush.bf16.xpose.msrb.mxu3 %v2129_v36 }
 0x60f   : > { %2075 = vrot.lane.b32.xlu2 %v5975_v7, %s5338_s13  ;;  %v2053_v7 = vpop.permute.xlu0 %2052 }
 0x61f   : > { %v1946_v40 = vpop.xlane.xlu2 %1945 }
 0x620   : > { %4760 = vrcp.f32 %v1946_v40 }
 0x626   : > { %v4761_v37 = vpop.eup %4760 }
 0x627   : > { %v1960_v39 = vmul.f32 %v4761_v37, %v4755_v11  ;;  %v1925_v8 = vpop.xlane.xlu2 %1924 }
 0x628   : > { %v1933_v42 = vsub.f32 %v1871_v14, %v1925_v8 }
 0x629   : > { %v1964_v45 = vpack.c.bf16 %v1960_v39, %v1960_v39 }
 0x62a   : > { %v1938_v52 = vmul.f32 1.442695, %v1933_v42 }
 0x62b   : > { %4062 = vmatmul.msk.bf16.vlgmr.msra.gmra.mxu0 %vm1442_vm2, %v1964_v45 }
 0x62c   : > { %4762 = vpow2.f32 %v1938_v52 }
 0x62f   : > { %v2101_v30 = vpop.permute.xlu2 %2100 }
 0x630   : > { %v2106_v53 = vsel %vm1365_vm0, %v2101_v30, 0 }
 0x631   : > { %2115 = vmatpush.bf16.xpose.msra.mxu2 %v2106_v53 }
 0x632   : > { %v4763_v61 = vpop.eup %4762 }
 0x633   : > { %v1947_v62 = vsel %vm1442_vm2, %v4763_v61, 0.0 }
 0x634   : > { %1948 = vadd.xlane.f32.xlu0 %v1947_v62 }
 0x63b   : > { %4066 = vmatmul.msk.bf16.vlgmr.msrb.gmra.mxu0 %vm1365_vm0, %v2053_v7 }
 0x648   : > { %2121 = vrot.lane.b32.xlu0 %v5969_v4, %s5338_s13 }
 0x649   : > { %v1952_v1 = vpop.xlane.xlu1 %1951 }
 0x64a   : > { %4764 = vrcp.f32 %v1952_v1 }
 0x650   : > { %v4765_v3 = vpop.eup %4764 }
 0x651   : > { %v1962_v29 = vmul.f32 %v4765_v3, %v4757_v21 }
 0x653   : > { %v1966_v63 = vpack.c.bf16 %v1962_v29, %v1962_v29 }
 0x655   : > { %4064 = vmatmul.msk.bf16.vlgmr.msrb.gmra.mxu2 %vm1442_vm2, %v1966_v63 }
 0x661   : > { %v2099_v5 = vpop.permute.xlu1 %2098 }
 0x665   : > { %4068 = vmatmul.msk.bf16.vlgmr.msra.gmra.mxu2 %vm1365_vm0, %v2099_v5 }
 0x66a   : > { %v1955_v48 = vpop.xlane.xlu2 %1954 }
 0x66b   : > { %4766 = vrcp.f32 %v1955_v48 }
 0x671   : > { %v4767_v6 = vpop.eup %4766 }
 0x672   : > { %v1963_v9 = vmul.f32 %v4767_v6, %v4759_v31  ;;  %v2076_v49 = vpop.permute.xlu2 %2075 }
 0x674   : > { %v1967_v33 = vpack.c.bf16 %v1963_v9, %v1963_v9 }
 0x676   : > { %4065 = vmatmul.msk.bf16.vlgmr.msra.gmra.mxu3 %vm1442_vm2, %v1967_v33 }
 0x6a7   : > { %v1949_v10 = vpop.xlane.xlu0 %1948 }
 0x6a8   : > { %4768 = vrcp.f32 %v1949_v10  ;;  %v1985_v4 = vpop.f32.mrf.mxu0 }
 0x6ae   : > { %v4769_v55 = vpop.eup %4768 }
 0x6af   : > { %v1961_v11 = vmul.f32 %v4769_v55, %v4763_v61 }
 0x6b0   : > { %v1987_v12 = vpop.f32.mrf.mxu0 }
 0x6b1   : > { %v1965_v14 = vpack.c.bf16 %v1961_v11, %v1961_v11 }
 0x6b3   : > { %4063 = vmatmul.msk.bf16.vlgmr.msra.gmra.mxu1 %vm1442_vm2, %v1965_v14 }
 0x6b8   : > { %v2071_v60 = vpop.f32.mrf.mxu0 }
 0x6b9   : > { %v2072_v43 = vadd.f32 %v2071_v60, %v5919_v2 }
 0x6ba   : > { %v2122_v15 = vpop.permute.xlu0 %2121 }
 0x6bb   : > { %4069 = vmatmul.msk.bf16.vlgmr.msrb.gmra.mxu3 %vm1365_vm0, %v2122_v15  ;;  %v2144_v16 = vsel %vm1442_vm2, %v2072_v43, -inf }
 0x6bc   : > { %2145 = vmax.xlane.f32.xlu2 %v2144_v16 }
 0x6c0   : > { %v2073_v17 = vpop.f32.mrf.mxu0 }
 0x6c3   : > { %4067 = vmatmul.msk.bf16.vlgmr.msrb.gmra.mxu1 %vm1365_vm0, %v2076_v49 }
 0x6d8   : > { %v6128_v56 = vpop.f32.mrf.mxu2 }
 0x6e0   : > { %v2029_v59 = vpop.f32.mrf.mxu2 }
 0x6e8   : > { %v2117_v19 = vpop.f32.mrf.mxu2 }
 0x6e9   : > { %v2118_v20 = vadd.f32 %v2117_v19, %v5935_v18 }
 0x6eb   : > { %v2150_v21 = vsel %vm1442_vm2, %v2118_v20, -inf }
 0x6ec   : > { %2151 = vmax.xlane.f32.xlu0 %v2150_v21 }
 0x6f0   : > { %v2119_v2 = vpop.f32.mrf.mxu2 }
 0x6f9   : > { %v6132_v22 = vpop.f32.mrf.mxu3 }
 0x6fa   : > { %v4706_v25 = vpack.i.bf16 %v6132_v22, %v6128_v56 }
 0x701   : > { %v2050_v26 = vpop.f32.mrf.mxu3 }
 0x72f   : > { %v2146_v31 = vpop.xlane.xlu2 %2145 }
 0x730   : > { %v2006_v27 = vpop.f32.mrf.mxu1  ;;  %v2156_v34 = vsub.f32 %v2072_v43, %v2146_v31  ;;  %v4434_v31 = vld [vmem:[%s5763_s1 + $0x30] sm:$0xff] }
 0x732   : > { %v2160_v36 = vmul.f32 1.442695, %v2156_v34  ;;  %v4432_v34 = vld [vmem:[%s5763_s1 + $0x20] sm:$0xff] }
 0x734   : > { %4770 = vpow2.f32 %v2160_v36 }
 0x738   : > { %v2008_v32 = vpop.f32.mrf.mxu1 }
 0x739   : > { %v4433_v32 = vld [vmem:[%s5763_s1 + $0x28] sm:$0xff] }
 0x73a   : > { %v4771_v52 = vpop.eup %4770 }
 0x73b   : > { %v2168_v53 = vsel %vm1442_vm2, %v4771_v52, 0.0 }
 0x73e   : > { %v2140_v40 = vpop.f32.mrf.mxu3 }
 0x73f   : > { %v2141_v37 = vadd.f32 %v2140_v40, %v5940_v23  ;;  %v4431_v40 = vld [vmem:[%s5763_s1 + $0x18] sm:$0xff] }
 0x740   : > { %v2094_v39 = vpop.f32.mrf.mxu1 }
 0x741   : > { %v2095_v18 = vadd.f32 %v2094_v39, %v5930_v13  ;;  %v2153_v8 = vsel %vm1442_vm2, %v2141_v37, -inf  ;;  %v4691_v13 = vpack.i.bf16 %v2006_v27, %v1985_v4  ;;  %v4435_v27 = vld [vmem:[%s5763_s1 + $0x38] sm:$0xff] }
 0x742   : > { %2154 = vmax.xlane.f32.xlu2 %v2153_v8 }
 0x743   : > { %v2147_v42 = vsel %vm1442_vm2, %v2095_v18, -inf }
 0x744   : > { %2148 = vmax.xlane.f32.xlu1 %v2147_v42 }
 0x746   : > { %v2142_v45 = vpop.f32.mrf.mxu3 }
 0x748   : > { %v2096_v30 = vpop.f32.mrf.mxu1 }
 0x74c   : > { %2169 = vadd.xlane.f32.xlu1 %v2168_v53 }
 0x75a   : > { %2192 = vrot.lane.b32.xlu2 %v5963_v0, %s5338_s13 }
 0x75f   : > { %v2152_v0 = vpop.xlane.xlu0 %2151 }
 0x760   : > { %v2158_v62 = vsub.f32 %v2118_v20, %v2152_v0 }
 0x762   : > { %2255 = vrot.lane.b32.xlu2 %v6032_v28, %s5338_s13  ;;  %v2164_v1 = vmul.f32 1.442695, %v2158_v62 }
 0x765   : > { %2213 = vrot.lane.b32.xlu1 %v6014_v58, %s5338_s13 }
 0x76a   : > { %4692 = vrot.lane.b32.xlu2 %v4691_v13, %s5337_s11 }
 0x76d   : > { %4687 = vrot.lane.b32.xlu1 %v4686_v24, %s5338_s13 }
 0x772   : > { %4702 = vrot.lane.b32.xlu2 %v4701_v51, %s5338_s13 }
 0x7b5   : > { %v2155_v23 = vpop.xlane.xlu2 %2154 }
 0x7b6   : > { %v2159_v44 = vsub.f32 %v2141_v37, %v2155_v23  ;;  %v4430_v37 = vld [vmem:[%s5763_s1 + $0x10] sm:$0xff] }
 0x7b7   : > { %v2149_v61 = vpop.xlane.xlu1 %2148 }
 0x7b8   : > { %v2157_v28 = vsub.f32 %v2095_v18, %v2149_v61  ;;  %v2166_v51 = vmul.f32 1.442695, %v2159_v44  ;;  %v4429_v18 = vld [vmem:[%s5763_s1 + $0x8] sm:$0xff] }
 0x7ba   : > { %v2162_v7 = vmul.f32 1.442695, %v2157_v28 }
 0x7bc   : > { %4772 = vpow2.f32 %v2162_v7 }
 0x7bd   : > { %v2193_v58 = vpop.permute.xlu2 %2192 }
 0x7be   : > { %v2198_v3 = vsel %vm1494_vm1, %v2193_v58, 0 }
 0x7bf   : > { %v2170_v29 = vpop.xlane.xlu1 %2169  ;;  %2207 = vmatpush.bf16.msra.mxu0 %v2198_v3 }
 0x7c0   : > { %4774 = vrcp.f32 %v2170_v29 }
 0x7c1   : > { %4776 = vpow2.f32 %v2164_v1 }
 0x7c2   : > { %v4773_v35 = vpop.eup %4772  ;;  %4778 = vpow2.f32 %v2166_v51 }
 0x7c3   : > { %v2171_v24 = vsel %vm1442_vm2, %v4773_v35, 0.0  ;;  %2408 = vmatpush.bf16.msrb.mxu0 %v4435_v27 }
 0x7c4   : > { %2172 = vadd.xlane.f32.xlu0 %v2171_v24 }
 0x7c5   : > { %v2256_v46 = vpop.permute.xlu2 %2255 }
 0x7c6   : > { %v4775_v50 = vpop.eup %4774  ;;  %v2261_v63 = vsel %vm1494_vm1, %v2256_v46, 0 }
 0x7c7   : > { %v2184_v5 = vmul.f32 %v4775_v50, %v4771_v52  ;;  %2270 = vmatpush.bf16.msra.mxu3 %v2261_v63  ;;  %v4777_v48 = vpop.eup %4776  ;;  %2409 = vmatpush.bf16.msrb.mxu0 %v4434_v31  ;;  %v4428_v52 = vld [vmem:[%s5763_s1] sm:$0xff] }
 0x7c8   : > { %v2174_v9 = vsel %vm1442_vm2, %v4777_v48, 0.0  ;;  %v4779_v33 = vpop.eup %4778 }
 0x7c9   : > { %v2188_v6 = vpack.c.bf16 %v2184_v5, %v2184_v5  ;;  %v2177_v10 = vsel %vm1442_vm2, %v4779_v33, 0.0 }
 0x7cb   : > { %4070 = vmatmul.msk.bf16.vlgmr.msra.gmra.mxu0 %vm1442_vm2, %v2188_v6 }
 0x7cc   : > { %2175 = vadd.xlane.f32.xlu0 %v2174_v9  ;;  %2410 = vmatpush.bf16.msrb.mxu0 %v4433_v32 }
 0x7cd   : > { %v4693_v23 = vpop.permute.xlu2 %4692 }
 0x7ce   : > { %v4695_v28 = vunpack.i.h.bf16 %v4693_v23  ;;  %v4694_v62 = vunpack.i.l.bf16 %v4693_v23 }
 0x7d0   : > { %2411 = vmatpush.bf16.msrb.mxu0 %v4432_v34 }
 0x7d4   : > { %2178 = vadd.xlane.f32.xlu0 %v2177_v10  ;;  %2412 = vmatpush.bf16.msrb.mxu0 %v4431_v40 }
 0x7d7   : > { %v2214_v4 = vpop.permute.xlu1 %2213 }
 0x7d8   : > { %v2219_v55 = vsel %vm1494_vm1, %v2214_v4, 0  ;;  %2413 = vmatpush.bf16.msrb.mxu0 %v4430_v37 }
 0x7d9   : > { %2228 = vmatpush.bf16.msra.mxu1 %v2219_v55 }
 0x7dc   : > { %2414 = vmatpush.bf16.msrb.mxu0 %v4429_v18 }
 0x7df   : > { %v4688_v30 = vpop.permute.xlu1 %4687 }
 0x7e0   : > { %2415 = vmatpush.bf16.msrb.mxu0 %v4428_v52  ;;  %v4690_v53 = vunpack.i.h.bf16 %v4688_v30  ;;  %v4689_v13 = vunpack.i.l.bf16 %v4688_v30 }
 0x7e2   : > { %v2325_v0 = vsel %vm1365_vm0, %v5997_v41, %v4690_v53  ;;  %v2324_v61 = vsel %vm1365_vm0, %v5995_v38, %v4689_v13  ;;  %v4703_v41 = vpop.permute.xlu2 %4702 }
 0x7e3   : > { %v2329_v3 = vsel %vm2328_vm3, %v2324_v61, %v4694_v62  ;;  %v2330_v29 = vsel %vm2328_vm3, %v2325_v0, %v4695_v28  ;;  %v4705_v38 = vunpack.i.h.bf16 %v4703_v41  ;;  %v4704_v50 = vunpack.i.l.bf16 %v4703_v41 }
 0x7e5   : > { %v2326_v6 = vsel %vm1365_vm0, %v6001_v47, %v4704_v50  ;;  %v4836_v47 = vld [vmem:[#allocation2 + $0x10] sm:$0xff] }
 0x7e8   : > { %2234 = vrot.lane.b32.xlu0 %v6005_v54, %s5338_s13 }
 0x7f0   : > { %4707 = vrot.lane.b32.xlu0 %v4706_v25, %s5337_s11 }
 0x837   : > { %v2173_v11 = vpop.xlane.xlu0 %2172 }
 0x838   : > { %4780 = vrcp.f32 %v2173_v11 }
 0x83e   : > { %v4781_v12 = vpop.eup %4780 }
 0x83f   : > { %v2185_v14 = vmul.f32 %v4781_v12, %v4773_v35  ;;  %v2176_v60 = vpop.xlane.xlu0 %2175 }
 0x841   : > { %v2189_v43 = vpack.c.bf16 %v2185_v14, %v2185_v14 }
 0x843   : > { %4071 = vmatmul.msk.bf16.vlgmr.msra.gmra.mxu1 %vm1442_vm2, %v2189_v43 }
 0x847   : > { %v2179_v15 = vpop.xlane.xlu0 %2178 }
 0x848   : > { %4782 = vrcp.f32 %v2179_v15  ;;  %v2209_v16 = vpop.f32.mrf.mxu0 }
 0x849   : > { %4784 = vrcp.f32 %v2176_v60 }
 0x84e   : > { %v4783_v17 = vpop.eup %4782 }
 0x84f   : > { %v2187_v49 = vmul.f32 %v4783_v17, %v4779_v33  ;;  %v4785_v56 = vpop.eup %4784  ;;  %v4837_v17 = vld [vmem:[#allocation2] sm:$0xff] }
 0x850   : > { %v2211_v54 = vpop.f32.mrf.mxu0  ;;  %v2186_v19 = vmul.f32 %v4785_v56, %v4777_v48  ;;  %v2327_v48 = vsel %vm1365_vm0, %v6009_v57, %v4705_v38  ;;  %v4716_v57 = vld [vmem:[%s1092_s8] ss:$0 sm:$0xff]  ;;  %v4230_v38 = vld [vmem:[%s5771_s30 + $0xf8] sm:$0xf0] }
 0x851   : > { %v2191_v59 = vpack.c.bf16 %v2187_v49, %v2187_v49  ;;  %v4838_v56 = vld [vmem:[#allocation2 + $0x18] sm:$0xff] }
 0x852   : > { %v2190_v2 = vpack.c.bf16 %v2186_v19, %v2186_v19 }
 0x853   : > { %4073 = vmatmul.msk.bf16.vlgmr.msra.gmra.mxu3 %vm1442_vm2, %v2191_v59 }
 0x85a   : > { %v2235_v20 = vpop.permute.xlu0 %2234 }
 0x85b   : > { %v2240_v21 = vsel %vm1494_vm1, %v2235_v20, 0 }
 0x85c   : > { %2249 = vmatpush.bf16.msrb.mxu2 %v2240_v21 }
 0x85f   : > { %4072 = vmatmul.msk.bf16.vlgmr.msrb.gmra.mxu2 %vm1442_vm2, %v2190_v2  ;;  %v4839_v2 = vld [vmem:[#allocation2 + $0x8] sm:$0xff] }
 0x862   : > { %v4708_v46 = vpop.permute.xlu0 %4707 }
 0x863   : > { %v4710_v51 = vunpack.i.h.bf16 %v4708_v46  ;;  %v4709_v63 = vunpack.i.l.bf16 %v4708_v46  ;;  %v4465_v46 = vld [vmem:[%s5771_s30 + $0xec] sm:$0xf] }
 0x864   : > { %v4233_v50 = vor.u32 %v4465_v46, %v4230_v38  ;;  %v4445_v38 = vld [vmem:[%s5771_s30 + $0x4c] sm:$0xf] }
 0x865   : > { %v2331_v10 = vsel %vm2328_vm3, %v2326_v6, %v4709_v63  ;;  %v2332_v4 = vsel %vm2328_vm3, %v2327_v48, %v4710_v51  ;;  %v4204_v51 = vld [vmem:[%s5771_s30 + $0xc0] sm:$0xf]  ;;  %v4462_v63 = vld [vmem:[%s5771_s30 + $0xcc] sm:$0xf0]  ;;  %v4206_v6 = vld [vmem:[%s5771_s30 + $0xd0] sm:$0xf0] }
 0x866   : > { %2795 = vmatpush.bf16.msra.mxu0 %v4233_v50  ;;  %v4205_v48 = vor.u32 %v4462_v63, %v4204_v51  ;;  %v4150_v50 = vld [vmem:[%s5771_s30 + $0x58] sm:$0xf0]  ;;  %v4124_v63 = vld [vmem:[%s5771_s30 + $0x20] sm:$0xf] }
 0x867   : > { %v4153_v51 = vor.u32 %v4445_v38, %v4150_v50 }
 0x8c0   : > { %v2230_v22 = vpop.f32.mrf.mxu1 }
 0x8c1   : > { %v4696_v25 = vpack.i.bf16 %v2230_v22, %v2209_v16 }
 0x8c3   : > { %4697 = vrot.lane.b32.xlu1 %v4696_v25, %s5336_s9  ;;  %v5339_v25 = vmov 128.0  }
 0x8c4   : > { %4786 = vrcp.f32 %v5339_v25  ;;  %v4180_v25 = vld [vmem:[%s5771_s30 + $0x88] sm:$0xf] }
 0x8c8   : > { %v2232_v26 = vpop.f32.mrf.mxu1 }
 0x8ca   : > { %v4787_v26 = vpop.eup %4786 }
 0x8cb   : > { %v2442_v27 = vmul.f32 128.0, %v4787_v26  ;;  %vm2446_vm5 = vweird.f32 %v4787_v26 }
 0x8cd   : > { %v2443_v31 = vsub.f32 1.0, %v2442_v27 }
 0x8cf   : > { %v2444_v32 = vmul.f32 %v4787_v26, %v2443_v31 }
 0x8d1   : > { %v2445_v34 = vadd.f32 %v4787_v26, %v2444_v32  ;;  %v4453_v32 = vld [vmem:[%s5771_s30 + $0x8c] sm:$0xf] }
 0x8d6   : > { %v2272_v36 = vpop.f32.mrf.mxu3 }
 0x8de   : > { %v2274_v39 = vpop.f32.mrf.mxu3 }
 0x8e2   : > { %v2251_v8 = vpop.f32.mrf.mxu2 }
 0x8e3   : > { %v4711_v42 = vpack.i.bf16 %v2272_v36, %v2251_v8  ;;  %v6204_v36 = vsel %vm2446_vm5, %v4787_v26, %v2445_v34  ;;  %v4455_v26 = vld [vmem:[%s5771_s30 + $0x94] sm:$0xf0]  ;;  %v4182_v34 = vld [vmem:[%s5771_s30 + $0x98] sm:$0xf0] }
 0x8e4   : > { %v4181_v31 = vor.u32 %v4455_v26, %v4180_v25 }
 0x8e5   : > { %4712 = vrot.lane.b32.xlu1 %v4711_v42, %s5336_s9 }
 0x8ea   : > { %v2253_v45 = vpop.f32.mrf.mxu2 }
 0x935   : > { %v4698_v7 = vpop.permute.xlu1 %4697 }
 0x936   : > { %v4700_v58 = vunpack.i.h.bf16 %v4698_v7  ;;  %v4699_v1 = vunpack.i.l.bf16 %v4698_v7  ;;  %v4220_v7 = vld [vmem:[%s5771_s30 + $0xe0] sm:$0xf] }
 0x938   : > { %v2335_v35 = vsel %vm2333_vm4, %v2330_v29, %v4700_v58  ;;  %v2334_v44 = vsel %vm2333_vm4, %v2329_v3, %v4699_v1  ;;  %v4466_v58 = vld [vmem:[%s5771_s30 + $0xec] sm:$0xf0]  ;;  %v4464_v1 = vld [vmem:[%s5771_s30 + $0xe4] sm:$0xf]  ;;  %v4222_v29 = vld [vmem:[%s5771_s30 + $0xf0] sm:$0xf0] }
 0x939   : > { %v2338_v24 = vpack.c.bf16 %v2335_v35, %v2334_v44  ;;  %v4221_v3 = vor.u32 %v4466_v58, %v4220_v7  ;;  %v4228_v35 = vld [vmem:[%s5771_s30 + $0xe8] sm:$0xf]  ;;  %v4467_v44 = vld [vmem:[%s5771_s30 + $0xf4] sm:$0xf0]  ;;  %v4140_v58 = vld [vmem:[%s5771_s30 + $0x40] sm:$0xf] }
 0x93a   : > { %v4229_v41 = vor.u32 %v4467_v44, %v4228_v35  ;;  %v4142_v35 = vld [vmem:[%s5771_s30 + $0x50] sm:$0xf0]  ;;  %v4148_v44 = vld [vmem:[%s5771_s30 + $0x48] sm:$0xf] }
 0x93b   : > { %2416 = vmatmul.bf16.vlgmr.msrb.gmra.mxu0 %v2338_v24  ;;  %v4225_v24 = vor.u32 %v4464_v1, %v4222_v29  ;;  %2738 = vmatpush.bf16.msrb.mxu1 %v4221_v3  ;;  %v4446_v1 = vld [vmem:[%s5771_s30 + $0x4c] sm:$0xf0]  ;;  %v4444_v3 = vld [vmem:[%s5771_s30 + $0x44] sm:$0xf] }
 0x93c   : > { %2776 = vmatpush.bf16.msrb.mxu3 %v4229_v41  ;;  %v4141_v29 = vor.u32 %v4446_v1, %v4140_v58  ;;  %v4145_v41 = vor.u32 %v4444_v3, %v4142_v35  ;;  %v4718_v1 = vld [vmem:[%s1098_s20] ss:$0 sm:$0xff] }
 0x93d   : > { %2757 = vmatpush.bf16.msra.mxu2 %v4225_v24  ;;  %v4447_v24 = vld [vmem:[%s5771_s30 + $0x54] sm:$0xf0] }
 0x93e   : > { %v4149_v46 = vor.u32 %v4447_v24, %v4148_v44 }
 0x93f   : > { %2739 = vmatpush.bf16.msrb.mxu1 %v4205_v48  ;;  %v4440_v48 = vld [vmem:[%s5771_s30 + $0x24] sm:$0xf] }
 0x957   : > { %v4713_v5 = vpop.permute.xlu1 %4712 }
 0x958   : > { %v4715_v9 = vunpack.i.h.bf16 %v4713_v5  ;;  %v4714_v33 = vunpack.i.l.bf16 %v4713_v5  ;;  %v4460_v5 = vld [vmem:[%s5771_s30 + $0xc4] sm:$0xf] }
 0x95a   : > { %v2336_v55 = vsel %vm2333_vm4, %v2331_v10, %v4714_v33  ;;  %v2337_v11 = vsel %vm2333_vm4, %v2332_v4, %v4715_v9  ;;  %v4212_v9 = vld [vmem:[%s5771_s30 + $0xc8] sm:$0xf]  ;;  %v4463_v33 = vld [vmem:[%s5771_s30 + $0xd4] sm:$0xf0]  ;;  %v4209_v10 = vor.u32 %v4460_v5, %v4206_v6  ;;  %v4442_v5 = vld [vmem:[%s5771_s30 + $0x2c] sm:$0xf0] }
 0x95b   : > { %v2339_v12 = vpack.c.bf16 %v2337_v11, %v2336_v55  ;;  %v4213_v4 = vor.u32 %v4463_v33, %v4212_v9  ;;  %v4461_v55 = vld [vmem:[%s5771_s30 + $0xcc] sm:$0xf]  ;;  %v4214_v11 = vld [vmem:[%s5771_s30 + $0xd8] sm:$0xf0]  ;;  %v4125_v6 = vor.u32 %v4442_v5, %v4124_v63  ;;  %v4126_v9 = vld [vmem:[%s5771_s30 + $0x30] sm:$0xf0] }
 0x95c   : > { %2758 = vmatpush.bf16.msra.mxu2 %v4209_v10  ;;  %v4132_v33 = vld [vmem:[%s5771_s30 + $0x28] sm:$0xf]  ;;  %v4443_v10 = vld [vmem:[%s5771_s30 + $0x34] sm:$0xf0] }
 0x95d   : > { %2421 = vmatmul.bf16.gmra.mxu0 %v2339_v12  ;;  %v4217_v12 = vor.u32 %v4461_v55, %v4214_v11  ;;  %2777 = vmatpush.bf16.msrb.mxu3 %v4213_v4  ;;  %v4129_v55 = vor.u32 %v4440_v48, %v4126_v9  ;;  %v4133_v11 = vor.u32 %v4443_v10, %v4132_v33 }
 0x95f   : > { %2796 = vmatpush.bf16.msra.mxu0 %v4217_v12  ;;  %v4441_v12 = vld [vmem:[%s5771_s30 + $0x2c] sm:$0xf] }
 0x9b8   : > { %v2417_v14 = vpop.f32.mrf.mxu0 }
 0x9b9   : > { %v2418_v60 = vadd.f32 %v4716_v57, %v2417_v14  ;;  %v4458_v14 = vld [vmem:[%s5771_s30 + $0xac] sm:$0xf0] }
 0x9bb   : > { %v2427_v43 = vadd.f32 %v4836_v47, %v2418_v60  ;;  %v4456_v60 = vld [vmem:[%s5771_s30 + $0xa4] sm:$0xf] }
 0x9bd   : > { %2433 = vadd.xlane.f32.xlu2 %v2427_v43 }
 0x9c0   : > { %v2419_v15 = vpop.f32.mrf.mxu0 }
 0x9c1   : > { %v2420_v16 = vadd.f32 %v4716_v57, %v2419_v15  ;;  %v4196_v15 = vld [vmem:[%s5771_s30 + $0xa8] sm:$0xf] }
 0x9c3   : > { %v2428_v49 = vadd.f32 %v4837_v17, %v2420_v16  ;;  %v4459_v16 = vld [vmem:[%s5771_s30 + $0xb4] sm:$0xf0] }
 0x9c5   : > { %2435 = vadd.xlane.f32.xlu0 %v2428_v49 }
 0x9da   : > { %v2422_v54 = vpop.f32.mrf.mxu0 }
 0x9db   : > { %v2423_v59 = vadd.f32 %v4716_v57, %v2422_v54  ;;  %v4457_v54 = vld [vmem:[%s5771_s30 + $0xac] sm:$0xf] }
 0x9dd   : > { %v2429_v19 = vadd.f32 %v4838_v56, %v2423_v59  ;;  %v4198_v59 = vld [vmem:[%s5771_s30 + $0xb8] sm:$0xf0] }
 0x9de   : > { %v4201_v56 = vor.u32 %v4457_v54, %v4198_v59  ;;  %v4116_v54 = vld [vmem:[%s5771_s30 + $0x8] sm:$0xf] }
 0x9df   : > { %2437 = vadd.xlane.f32.xlu1 %v2429_v19 }
 0x9e0   : > { %2797 = vmatpush.bf16.msra.mxu0 %v4201_v56  ;;  %v4439_v56 = vld [vmem:[%s5771_s30 + $0x14] sm:$0xf0] }
 0x9e2   : > { %v2424_v20 = vpop.f32.mrf.mxu0 }
 0x9e3   : > { %v2425_v21 = vadd.f32 %v4716_v57, %v2424_v20  ;;  %v4188_v57 = vld [vmem:[%s5771_s30 + $0xa0] sm:$0xf]  ;;  %v4454_v20 = vld [vmem:[%s5771_s30 + $0x8c] sm:$0xf0] }
 0x9e4   : > { %v4189_v47 = vor.u32 %v4458_v14, %v4188_v57  ;;  %v4134_v57 = vld [vmem:[%s5771_s30 + $0x38] sm:$0xf0] }
 0x9e5   : > { %v2430_v22 = vadd.f32 %v4839_v2, %v2425_v21  ;;  %v4452_v21 = vld [vmem:[%s5771_s30 + $0x84] sm:$0xf] }
 0x9e6   : > { %2740 = vmatpush.bf16.msrb.mxu1 %v4189_v47  ;;  %v4108_v47 = vld [vmem:[%s5771_s30] sm:$0xf] }
 0x9e7   : > { %2439 = vadd.xlane.f32.xlu2 %v2430_v22 }
 0xa30   : > { %v2434_v40 = vpop.xlane.xlu2 %2433 }
 0xa31   : > { %v2448_v37 = vmul.f32 %v6204_v36, %v2434_v40  ;;  %v4185_v40 = vor.u32 %v4453_v32, %v4182_v34 }
 0xa33   : > { %v6207_v39 = vsub.f32 %v2427_v43, %v2448_v37  ;;  %v4190_v43 = vld [vmem:[%s5771_s30 + $0xb0] sm:$0xf0]  ;;  %v4156_v37 = vld [vmem:[%s5771_s30 + $0x60] sm:$0xf]  ;;  %2798 = vmatpush.bf16.msra.mxu0 %v4185_v40 }
 0xa34   : > { %v4193_v17 = vor.u32 %v4456_v60, %v4190_v43  ;;  %v4137_v60 = vor.u32 %v4441_v12, %v4134_v57  ;;  %v4438_v43 = vld [vmem:[%s5771_s30 + $0xc] sm:$0xf0] }
 0xa35   : > { %v2456_v18 = vmul.f32 %v6207_v39, %v6207_v39 }
 0xa36   : > { %2759 = vmatpush.bf16.msra.mxu2 %v4193_v17  ;;  %v4109_v17 = vor.u32 %v4438_v43, %v4108_v47 }
 0xa37   : > { %2460 = vadd.xlane.f32.xlu0 %v2456_v18  ;;  %v4450_v18 = vld [vmem:[%s5771_s30 + $0x6c] sm:$0xf0] }
 0xa38   : > { %v2436_v8 = vpop.xlane.xlu0 %2435 }
 0xa39   : > { %v2449_v42 = vmul.f32 %v6204_v36, %v2436_v8  ;;  %v4448_v8 = vld [vmem:[%s5771_s30 + $0x64] sm:$0xf] }
 0xa3b   : > { %v6212_v45 = vsub.f32 %v2428_v49, %v2449_v42  ;;  %v4197_v49 = vor.u32 %v4459_v16, %v4196_v15  ;;  %v4157_v42 = vor.u32 %v4450_v18, %v4156_v37  ;;  %v4436_v15 = vld [vmem:[%s5771_s30 + $0x4] sm:$0xf] }
 0xa3d   : > { %v2457_v52 = vmul.f32 %v6212_v45, %v6212_v45  ;;  %2778 = vmatpush.bf16.msrb.mxu3 %v4197_v49  ;;  %v4110_v49 = vld [vmem:[%s5771_s30 + $0x10] sm:$0xf0] }
 0xa3e   : > { %v4113_v59 = vor.u32 %v4436_v15, %v4110_v49  ;;  %v4474_v49 = vld [vmem:[%s5780_s19 + $0x30] sm:$0xff] }
 0xa3f   : > { %2462 = vadd.xlane.f32.xlu1 %v2457_v52  ;;  %v4158_v52 = vld [vmem:[%s5771_s30 + $0x70] sm:$0xf0] }
 0xa41   : > { %2779 = vmatpush.bf16.msrb.mxu3 %v4181_v31 }
 0xa52   : > { %v2438_v30 = vpop.xlane.xlu1 %2437 }
 0xa53   : > { %v2450_v53 = vmul.f32 %v6204_v36, %v2438_v30  ;;  %v4164_v30 = vld [vmem:[%s5771_s30 + $0x68] sm:$0xf] }
 0xa55   : > { %v6217_v13 = vsub.f32 %v2429_v19, %v2450_v53  ;;  %v4172_v19 = vld [vmem:[%s5771_s30 + $0x80] sm:$0xf]  ;;  %v4451_v53 = vld [vmem:[%s5771_s30 + $0x74] sm:$0xf0] }
 0xa56   : > { %v4173_v2 = vor.u32 %v4454_v20, %v4172_v19  ;;  %v4437_v19 = vld [vmem:[%s5771_s30 + $0xc] sm:$0xf]  ;;  %v4118_v20 = vld [vmem:[%s5771_s30 + $0x18] sm:$0xf0] }
 0xa57   : > { %v2458_v23 = vmul.f32 %v6217_v13, %v6217_v13 }
 0xa58   : > { %2741 = vmatpush.bf16.msrb.mxu1 %v4173_v2  ;;  %v4121_v2 = vor.u32 %v4437_v19, %v4118_v20  ;;  %v4473_v19 = vld [vmem:[%s5780_s19 + $0x28] sm:$0xff] }
 0xa59   : > { %2464 = vadd.xlane.f32.xlu2 %v2458_v23  ;;  %v4161_v23 = vor.u32 %v4448_v8, %v4158_v52  ;;  %v4497_v20 = vld [vmem:[%s5780_s19 + $0xe8] sm:$0xff] }
 0xa5a   : > { %v2440_v0 = vpop.xlane.xlu2 %2439 }
 0xa5b   : > { %v2451_v61 = vmul.f32 %v6204_v36, %v2440_v0  ;;  %v4165_v0 = vor.u32 %v4451_v53, %v4164_v30 }
 0xa5c   : > { %2742 = vmatpush.bf16.msrb.mxu1 %v4157_v42 }
 0xa5d   : > { %v6222_v28 = vsub.f32 %v2430_v22, %v2451_v61  ;;  %v4174_v22 = vld [vmem:[%s5771_s30 + $0x90] sm:$0xf0]  ;;  %v4449_v61 = vld [vmem:[%s5771_s30 + $0x6c] sm:$0xf]  ;;  %2780 = vmatpush.bf16.msrb.mxu3 %v4165_v0  ;;  %v4717_v0 = vld [vmem:[%s1095_s10] ss:$0 sm:$0xff] }
 0xa5e   : > { %v4177_v27 = vor.u32 %v4452_v21, %v4174_v22  ;;  %v4117_v21 = vor.u32 %v4439_v56, %v4116_v54  ;;  %v4498_v54 = vld [vmem:[%s5780_s19 + $0xf0] sm:$0xff]  ;;  %v4491_v56 = vld [vmem:[%s5780_s19 + $0xb8] sm:$0xff] }
 0xa5f   : > { %v2459_v62 = vmul.f32 %v6222_v28, %v6222_v28 }
 0xa60   : > { %2760 = vmatpush.bf16.msra.mxu2 %v4177_v27  ;;  %2743 = vmatpush.bf16.msrb.mxu1 %v4141_v29 }
 0xa61   : > { %2466 = vadd.xlane.f32.xlu0 %v2459_v62  ;;  %v4166_v62 = vld [vmem:[%s5771_s30 + $0x78] sm:$0xf0]  ;;  %2781 = vmatpush.bf16.msrb.mxu3 %v4149_v46 }
 0xa62   : > { %v4169_v7 = vor.u32 %v4449_v61, %v4166_v62 }
 0xa64   : > { %2761 = vmatpush.bf16.msra.mxu2 %v4161_v23  ;;  %2799 = vmatpush.bf16.msra.mxu0 %v4169_v7 }
 0xa65   : > { %2744 = vmatpush.bf16.msrb.mxu1 %v4125_v6  ;;  %2782 = vmatpush.bf16.msrb.mxu3 %v4133_v11 }
 0xa68   : > { %2762 = vmatpush.bf16.msra.mxu2 %v4145_v41  ;;  %2800 = vmatpush.bf16.msra.mxu0 %v4153_v51 }
 0xa69   : > { %2745 = vmatpush.bf16.msrb.mxu1 %v4109_v17  ;;  %2783 = vmatpush.bf16.msrb.mxu3 %v4117_v21  ;;  %v4475_v17 = vld [vmem:[%s5780_s19 + $0x38] sm:$0xff]  ;;  %v4482_v21 = vld [vmem:[%s5780_s19 + $0x70] sm:$0xff] }
 0xa6c   : > { %2763 = vmatpush.bf16.msra.mxu2 %v4129_v55  ;;  %2801 = vmatpush.bf16.msra.mxu0 %v4137_v60 }
 0xa6d   : > { %3226 = vmatpush.bf16.msra.mxu1 %v4475_v17  ;;  %3264 = vmatpush.bf16.msra.mxu3 %v4491_v56 }
 0xa70   : > { %2764 = vmatpush.bf16.msra.mxu2 %v4113_v59  ;;  %2802 = vmatpush.bf16.msra.mxu0 %v4121_v2  ;;  %v4483_v59 = vld [vmem:[%s5780_s19 + $0x78] sm:$0xff]  ;;  %v4490_v2 = vld [vmem:[%s5780_s19 + $0xb0] sm:$0xff] }
 0xa71   : > { %3227 = vmatpush.bf16.msra.mxu1 %v4474_v49  ;;  %3265 = vmatpush.bf16.msra.mxu3 %v4490_v2 }
 0xa74   : > { %3245 = vmatpush.bf16.msrb.mxu2 %v4483_v59 }
 0xa75   : > { %3228 = vmatpush.bf16.msra.mxu1 %v4473_v19 }
 0xa78   : > { %3246 = vmatpush.bf16.msrb.mxu2 %v4482_v21 }
 0xaaa   : > { %v2461_v4 = vpop.xlane.xlu0 %2460 }
 0xaab   : > { %v2468_v14 = vmul.f32 %v2461_v4, %v6204_v36 }
 0xaad   : > { %v2472_v16 = vadd.f32 1e-12, %v2468_v14 }
 0xaaf   : > { %4788 = vrsqrt.f32 %v2472_v16  ;;  %vm2482_vm7 = vweird.f32 %v2472_v16 }
 0xab2   : > { %v2463_v22 = vpop.xlane.xlu1 %2462 }
 0xab3   : > { %v2469_v25 = vmul.f32 %v2463_v22, %v6204_v36  ;;  %v4472_v22 = vld [vmem:[%s5780_s19 + $0x20] sm:$0xff] }
 0xab4   : > { %3229 = vmatpush.bf16.msra.mxu1 %v4472_v22 }
 0xab5   : > { %v4789_v26 = vpop.eup %4788  ;;  %v2473_v27 = vadd.f32 1e-12, %v2469_v25  ;;  %v4496_v25 = vld [vmem:[%s5780_s19 + $0xe0] sm:$0xff] }
 0xab6   : > { %v2477_v31 = vmul.f32 %v4789_v26, %v2472_v16  ;;  %vm2483_vm6 = vweird.f32 %v4789_v26 }
 0xab7   : > { %4790 = vrsqrt.f32 %v2473_v27  ;;  %vm2484_vm8 = vmor %vm2482_vm7, %vm2483_vm6  ;;  %vm2492_vm10 = vweird.f32 %v2473_v27 }
 0xab8   : > { %v2478_v32 = vmul.f32 %v4789_v26, %v2477_v31  ;;  %v4471_v31 = vld [vmem:[%s5780_s19 + $0x18] sm:$0xff] }
 0xab9   : > { %3230 = vmatpush.bf16.msra.mxu1 %v4471_v31 }
 0xaba   : > { %v2479_v34 = vmul.f32 0.5, %v2478_v32  ;;  %v4495_v32 = vld [vmem:[%s5780_s19 + $0xd8] sm:$0xff] }
 0xabc   : > { %v2480_v40 = vsub.f32 1.5, %v2479_v34  ;;  %v4480_v34 = vld [vmem:[%s5780_s19 + $0x60] sm:$0xff] }
 0xabd   : > { %v4791_v37 = vpop.eup %4790 }
 0xabe   : > { %v2481_v18 = vmul.f32 %v4789_v26, %v2480_v40  ;;  %v2487_v8 = vmul.f32 %v4791_v37, %v2473_v27  ;;  %vm2493_vm9 = vweird.f32 %v4791_v37  ;;  %v4489_v27 = vld [vmem:[%s5780_s19 + $0xa8] sm:$0xff]  ;;  %v4488_v40 = vld [vmem:[%s5780_s19 + $0xa0] sm:$0xff] }
 0xabf   : > { %vm2494_vm11 = vmor %vm2492_vm10, %vm2493_vm9  ;;  %3266 = vmatpush.bf16.msra.mxu3 %v4489_v27 }
 0xac0   : > { %v2488_v42 = vmul.f32 %v4791_v37, %v2487_v8  ;;  %v2485_v52 = vsel %vm2484_vm8, %v4789_v26, %v2481_v18  ;;  %v4481_v26 = vld [vmem:[%s5780_s19 + $0x68] sm:$0xff]  ;;  %v4494_v18 = vld [vmem:[%s5780_s19 + $0xd0] sm:$0xff]  ;;  %v2568_v8 = vld [vmem:[%s5774_s23] sm:$0xf] }
 0xac1   : > { %v2516_v23 = vmul.f32 %v2485_v52, %v6207_v39  ;;  %3247 = vmatpush.bf16.msrb.mxu2 %v4481_v26  ;;  %v4487_v52 = vld [vmem:[%s5780_s19 + $0x98] sm:$0xff] }
 0xac2   : > { %v2489_v30 = vmul.f32 0.5, %v2488_v42  ;;  %v4479_v42 = vld [vmem:[%s5780_s19 + $0x58] sm:$0xff] }
 0xac3   : > { %v2523_v58 = vmul.f32 %v4717_v0, %v2516_v23  ;;  %3267 = vmatpush.bf16.msra.mxu3 %v4488_v40  ;;  %v6345_v23 = vperm.slane %v2568_v8, 0 }
 0xac4   : > { %v2490_v53 = vsub.f32 1.5, %v2489_v30  ;;  %v4469_v30 = vld [vmem:[%s5780_s19 + $0x8] sm:$0xff] }
 0xac5   : > { %v6305_v35 = vadd.f32 %v4718_v1, %v2523_v58  ;;  %3248 = vmatpush.bf16.msrb.mxu2 %v4480_v34  ;;  %v4468_v58 = vld [vmem:[%s5780_s19] sm:$0xff] }
 0xac6   : > { %v2491_v61 = vmul.f32 %v4791_v37, %v2490_v53  ;;  %v4493_v53 = vld [vmem:[%s5780_s19 + $0xc8] sm:$0xff] }
 0xac7   : > { %3268 = vmatpush.bf16.msra.mxu3 %v4487_v52 }
 0xac8   : > { %v2495_v62 = vsel %vm2494_vm11, %v4791_v37, %v2491_v61  ;;  %v4470_v37 = vld [vmem:[%s5780_s19 + $0x10] sm:$0xff] }
 0xac9   : > { %v2517_v7 = vmul.f32 %v2495_v62, %v6212_v45  ;;  %3231 = vmatpush.bf16.msra.mxu1 %v4470_v37  ;;  %3249 = vmatpush.bf16.msrb.mxu2 %v4479_v42  ;;  %v4478_v61 = vld [vmem:[%s5780_s19 + $0x50] sm:$0xff] }
 0xaca   : > { %v4486_v62 = vld [vmem:[%s5780_s19 + $0x90] sm:$0xff] }
 0xacb   : > { %v2524_v3 = vmul.f32 %v4717_v0, %v2517_v7  ;;  %3269 = vmatpush.bf16.msra.mxu3 %v4486_v62 }
 0xacc   : > { %v2465_v29 = vpop.xlane.xlu2 %2464 }
 0xacd   : > { %v2470_v39 = vmul.f32 %v2465_v29, %v6204_v36  ;;  %v6307_v44 = vadd.f32 %v4718_v1, %v2524_v3  ;;  %3232 = vmatpush.bf16.msra.mxu1 %v4469_v30  ;;  %3250 = vmatpush.bf16.msrb.mxu2 %v4478_v61 }
 0xacf   : > { %v2474_v24 = vadd.f32 1e-12, %v2470_v39  ;;  %v2534_v41 = vpack.c.bf16 %v6307_v44, %v6305_v35 }
 0xad1   : > { %4792 = vrsqrt.f32 %v2474_v24  ;;  %2746 = vmatmul.bf16.vlgmr.msrb.gmra.mxu1 %v2534_v41  ;;  %2765 = vmatmul.bf16.vlgmr.msra.gmra.mxu2 %v2534_v41  ;;  %vm2502_vm13 = vweird.f32 %v2474_v24 }
 0xad2   : > { %2784 = vmatmul.bf16.vlgmr.msrb.gmra.mxu3 %v2534_v41  ;;  %2803 = vmatmul.bf16.vlgmr.msra.gmra.mxu0 %v2534_v41  ;;  %v4485_v41 = vld [vmem:[%s5780_s19 + $0x88] sm:$0xff] }
 0xad3   : > { %3233 = vmatpush.bf16.msra.mxu1 %v4468_v58  ;;  %3270 = vmatpush.bf16.msra.mxu3 %v4485_v41 }
 0xad4   : > { %v2467_v45 = vpop.xlane.xlu0 %2466 }
 0xad5   : > { %v2471_v46 = vmul.f32 %v2467_v45, %v6204_v36 }
 0xad7   : > { %v4793_v38 = vpop.eup %4792  ;;  %v2475_v50 = vadd.f32 1e-12, %v2471_v46  ;;  %v6363_v46 = vperm.slane %v2568_v8, 1 }
 0xad8   : > { %v2497_v51 = vmul.f32 %v4793_v38, %v2474_v24  ;;  %vm2503_vm12 = vweird.f32 %v4793_v38  ;;  %v4477_v24 = vld [vmem:[%s5780_s19 + $0x48] sm:$0xff] }
 0xad9   : > { %4794 = vrsqrt.f32 %v2475_v50  ;;  %vm2504_vm14 = vmor %vm2502_vm13, %vm2503_vm12  ;;  %vm2512_vm0 = vweird.f32 %v2475_v50  ;;  %3251 = vmatpush.bf16.msrb.mxu2 %v4477_v24 }
 0xada   : > { %v2498_v63 = vmul.f32 %v4793_v38, %v2497_v51 }
 0xadc   : > { %v2499_v5 = vmul.f32 0.5, %v2498_v63 }
 0xade   : > { %v2500_v48 = vsub.f32 1.5, %v2499_v5 }
 0xadf   : > { %v4795_v6 = vpop.eup %4794 }
 0xae0   : > { %v2501_v9 = vmul.f32 %v4793_v38, %v2500_v48  ;;  %v2507_v33 = vmul.f32 %v4795_v6, %v2475_v50  ;;  %vm2513_vm15 = vweird.f32 %v4795_v6  ;;  %v6367_v50 = vperm.slane %v2568_v8, 2  ;;  %v4476_v48 = vld [vmem:[%s5780_s19 + $0x40] sm:$0xff] }
 0xae1   : > { %vm2514_vm1 = vmor %vm2512_vm0, %vm2513_vm15  ;;  %3252 = vmatpush.bf16.msrb.mxu2 %v4476_v48 }
 0xae2   : > { %v2508_v10 = vmul.f32 %v4795_v6, %v2507_v33  ;;  %v2505_v4 = vsel %vm2504_vm14, %v4793_v38, %v2501_v9 }
 0xae3   : > { %v2518_v12 = vmul.f32 %v2505_v4, %v6217_v13 }
 0xae4   : > { %v2509_v55 = vmul.f32 0.5, %v2508_v10 }
 0xae5   : > { %v2525_v47 = vmul.f32 %v4717_v0, %v2518_v12 }
 0xae6   : > { %v2510_v11 = vsub.f32 1.5, %v2509_v55 }
 0xae7   : > { %v6314_v15 = vadd.f32 %v4718_v1, %v2525_v47 }
 0xae8   : > { %v2511_v57 = vmul.f32 %v4795_v6, %v2510_v11 }
 0xaea   : > { %v2515_v14 = vsel %vm2514_vm1, %v4795_v6, %v2511_v57  ;;  %v4484_v6 = vld [vmem:[%s5780_s19 + $0x80] sm:$0xff] }
 0xaeb   : > { %v2519_v60 = vmul.f32 %v2515_v14, %v6222_v28  ;;  %v4499_v28 = vld [vmem:[%s5780_s19 + $0xf8] sm:$0xff]  ;;  %3271 = vmatpush.bf16.msra.mxu3 %v4484_v6 }
 0xaec   : > { %3283 = vmatpush.bf16.msrb.mxu0 %v4499_v28 }
 0xaed   : > { %v2526_v43 = vmul.f32 %v4717_v0, %v2519_v60  ;;  %v6347_v0 = vperm.slane %v2568_v8, 3 }
 0xaef   : > { %v6316_v16 = vadd.f32 %v4718_v1, %v2526_v43  ;;  %v4492_v1 = vld [vmem:[%s5780_s19 + $0xc0] sm:$0xff] }
 0xaf0   : > { %3284 = vmatpush.bf16.msrb.mxu0 %v4498_v54 }
 0xaf1   : > { %v2535_v13 = vpack.c.bf16 %v6316_v16, %v6314_v15 }
 0xaf3   : > { %2751 = vmatmul.bf16.gmra.mxu1 %v2535_v13  ;;  %2770 = vmatmul.bf16.gmra.mxu2 %v2535_v13 }
 0xaf4   : > { %2789 = vmatmul.bf16.gmra.mxu3 %v2535_v13  ;;  %2808 = vmatmul.bf16.gmra.mxu0 %v2535_v13 }
 0xaf5   : > { %3285 = vmatpush.bf16.msrb.mxu0 %v4497_v20 }
 0xaf9   : > { %3286 = vmatpush.bf16.msrb.mxu0 %v4496_v25 }
 0xafd   : > { %3287 = vmatpush.bf16.msrb.mxu0 %v4495_v32 }
 0xb01   : > { %3288 = vmatpush.bf16.msrb.mxu0 %v4494_v18 }
 0xb05   : > { %3289 = vmatpush.bf16.msrb.mxu0 %v4493_v53 }
 0xb09   : > { %3290 = vmatpush.bf16.msrb.mxu0 %v4492_v1 }
 0xb4e   : > { %v2747_v7 = vpop.f32.mrf.mxu1 }
 0xb4f   : > { %v6354_v3 = vadd.f32 %v2747_v7, %v6345_v23  ;;  %v2804_v29 = vpop.f32.mrf.mxu0 }
 0xb50   : > { %v6357_v39 = vadd.f32 %v2804_v29, %v6347_v0 }
 0xb51   : > { %v2814_v45 = vmul.f32 %v6354_v3, %v6354_v3 }
 0xb52   : > { %v2817_v38 = vmul.f32 %v6357_v39, %v6357_v39 }
 0xb53   : > { %v2830_v51 = vmul.f32 %v2814_v45, %v6354_v3 }
 0xb54   : > { %v2833_v63 = vmul.f32 %v2817_v38, %v6357_v39  ;;  %v2766_v5 = vpop.f32.mrf.mxu2 }
 0xb55   : > { %v2846_v9 = vmul.f32 0.044715, %v2830_v51  ;;  %v6374_v33 = vadd.f32 %v2766_v5, %v6363_v46  ;;  %v2785_v10 = vpop.f32.mrf.mxu3 }
 0xb56   : > { %v2849_v4 = vmul.f32 0.044715, %v2833_v63  ;;  %v6377_v55 = vadd.f32 %v2785_v10, %v6367_v50  ;;  %v2749_v11 = vpop.f32.mrf.mxu1 }
 0xb57   : > { %v2862_v12 = vadd.f32 %v2846_v9, %v6354_v3  ;;  %v2815_v57 = vmul.f32 %v6374_v33, %v6374_v33  ;;  %v6383_v14 = vadd.f32 %v2749_v11, %v6345_v23  ;;  %v2806_v60 = vpop.f32.mrf.mxu0 }
 0xb58   : > { %v2865_v47 = vadd.f32 %v2849_v4, %v6357_v39  ;;  %v2816_v43 = vmul.f32 %v6377_v55, %v6377_v55  ;;  %v6389_v13 = vadd.f32 %v2806_v60, %v6347_v0 }
 0xb59   : > { %v2878_v17 = vmul.f32 0.7978846, %v2862_v12  ;;  %v2831_v28 = vmul.f32 %v2815_v57, %v6374_v33  ;;  %v2818_v49 = vmul.f32 %v6383_v14, %v6383_v14 }
 0xb5a   : > { %v2881_v54 = vmul.f32 0.7978846, %v2865_v47  ;;  %v2832_v59 = vmul.f32 %v2816_v43, %v6377_v55  ;;  %v2821_v56 = vmul.f32 %v6389_v13, %v6389_v13 }
 0xb5b   : > { %v2847_v19 = vmul.f32 0.044715, %v2831_v28  ;;  %v2834_v20 = vmul.f32 %v2818_v49, %v6383_v14  ;;  %4796 = vtanh.f32 %v2878_v17 }
 0xb5c   : > { %v2848_v21 = vmul.f32 0.044715, %v2832_v59  ;;  %v2837_v2 = vmul.f32 %v2821_v56, %v6389_v13  ;;  %v2768_v22 = vpop.f32.mrf.mxu2  ;;  %4798 = vtanh.f32 %v2881_v54 }
 0xb5d   : > { %v2863_v25 = vadd.f32 %v2847_v19, %v6374_v33  ;;  %v2850_v26 = vmul.f32 0.044715, %v2834_v20  ;;  %v6401_v27 = vadd.f32 %v2768_v22, %v6363_v46  ;;  %v2787_v31 = vpop.f32.mrf.mxu3 }
 0xb5e   : > { %v2864_v32 = vadd.f32 %v2848_v21, %v6377_v55  ;;  %v2853_v34 = vmul.f32 0.044715, %v2837_v2  ;;  %v6405_v40 = vadd.f32 %v2787_v31, %v6367_v50 }
 0xb5f   : > { %v2879_v37 = vmul.f32 0.7978846, %v2863_v25  ;;  %v2866_v18 = vadd.f32 %v2850_v26, %v6383_v14  ;;  %v2819_v8 = vmul.f32 %v6401_v27, %v6401_v27 }
 0xb60   : > { %v2880_v42 = vmul.f32 0.7978846, %v2864_v32  ;;  %v2869_v52 = vadd.f32 %v2853_v34, %v6389_v13  ;;  %v2820_v30 = vmul.f32 %v6405_v40, %v6405_v40 }
 0xb61   : > { %4800 = vtanh.f32 %v2879_v37  ;;  %v2882_v53 = vmul.f32 0.7978846, %v2866_v18  ;;  %v2835_v61 = vmul.f32 %v2819_v8, %v6401_v27  ;;  %v4797_v58 = vpop.eup %4796 }
 0xb62   : > { %4802 = vtanh.f32 %v2880_v42  ;;  %v2885_v62 = vmul.f32 0.7978846, %v2869_v52  ;;  %v2836_v7 = vmul.f32 %v2820_v30, %v6405_v40  ;;  %v4799_v29 = vpop.eup %4798  ;;  %v2910_v45 = vadd.f32 1.0, %v4797_v58 }
 0xb63   : > { %4804 = vtanh.f32 %v2882_v53  ;;  %v2851_v1 = vmul.f32 0.044715, %v2835_v61  ;;  %v2913_v63 = vadd.f32 1.0, %v4799_v29 }
 0xb64   : > { %4806 = vtanh.f32 %v2885_v62  ;;  %v2852_v24 = vmul.f32 0.044715, %v2836_v7  ;;  %v2926_v4 = vmul.f32 0.5, %v2910_v45 }
 0xb65   : > { %v2867_v41 = vadd.f32 %v2851_v1, %v6401_v27  ;;  %v2929_v12 = vmul.f32 0.5, %v2913_v63 }
 0xb66   : > { %v2868_v38 = vadd.f32 %v2852_v24, %v6405_v40  ;;  %v2942_v28 = vmul.f32 %v2926_v4, %v6354_v3 }
 0xb67   : > { %v4801_v51 = vpop.eup %4800  ;;  %v2883_v5 = vmul.f32 0.7978846, %v2867_v41  ;;  %v2945_v59 = vmul.f32 %v2929_v12, %v6357_v39 }
 0xb68   : > { %v4803_v48 = vpop.eup %4802  ;;  %v2884_v6 = vmul.f32 0.7978846, %v2868_v38  ;;  %v2911_v60 = vadd.f32 1.0, %v4801_v51 }
 0xb69   : > { %v4805_v9 = vpop.eup %4804  ;;  %4808 = vtanh.f32 %v2883_v5  ;;  %v2912_v43 = vadd.f32 1.0, %v4803_v48 }
 0xb6a   : > { %v4807_v10 = vpop.eup %4806  ;;  %v2914_v11 = vadd.f32 1.0, %v4805_v9  ;;  %4810 = vtanh.f32 %v2884_v6  ;;  %v2927_v20 = vmul.f32 0.5, %v2911_v60 }
 0xb6b   : > { %v2917_v57 = vadd.f32 1.0, %v4807_v10  ;;  %v2928_v25 = vmul.f32 0.5, %v2912_v43 }
 0xb6c   : > { %v2930_v47 = vmul.f32 0.5, %v2914_v11  ;;  %v2943_v37 = vmul.f32 %v2927_v20, %v6374_v33 }
 0xb6d   : > { %v2933_v17 = vmul.f32 0.5, %v2917_v57  ;;  %v2944_v42 = vmul.f32 %v2928_v25, %v6377_v55 }
 0xb6e   : > { %v2946_v49 = vmul.f32 %v2930_v47, %v6383_v14 }
 0xb6f   : > { %v4809_v54 = vpop.eup %4808  ;;  %v2949_v56 = vmul.f32 %v2933_v17, %v6389_v13 }
 0xb70   : > { %v4811_v19 = vpop.eup %4810  ;;  %v2958_v21 = vpack.c.bf16 %v2946_v49, %v2942_v28  ;;  %v2915_v2 = vadd.f32 1.0, %v4809_v54  ;;  %v2752_v22 = vpop.f32.mrf.mxu1 }
 0xb71   : > { %v2961_v26 = vpack.c.bf16 %v2949_v56, %v2945_v59  ;;  %v2916_v31 = vadd.f32 1.0, %v4811_v19  ;;  %v6422_v32 = vadd.f32 %v2752_v22, %v6345_v23  ;;  %v2809_v34 = vpop.f32.mrf.mxu0 }
 0xb72   : > { %v2931_v3 = vmul.f32 0.5, %v2915_v2  ;;  %v6425_v14 = vadd.f32 %v2809_v34, %v6347_v0  ;;  %3234 = vmatmul.bf16.vlgmr.msra.gmra.mxu1 %v2958_v21 }
 0xb73   : > { %v2932_v39 = vmul.f32 0.5, %v2916_v31  ;;  %v2822_v13 = vmul.f32 %v6422_v32, %v6422_v32  ;;  %3291 = vmatmul.bf16.vlgmr.msrb.gmra.mxu0 %v2961_v26 }
 0xb74   : > { %v2947_v18 = vmul.f32 %v2931_v3, %v6401_v27  ;;  %v2825_v8 = vmul.f32 %v6425_v14, %v6425_v14 }
 0xb75   : > { %v2948_v52 = vmul.f32 %v2932_v39, %v6405_v40  ;;  %v2838_v30 = vmul.f32 %v2822_v13, %v6422_v32 }
 0xb76   : > { %v2841_v53 = vmul.f32 %v2825_v8, %v6425_v14  ;;  %v2771_v61 = vpop.f32.mrf.mxu2  ;;  %v2959_v62 = vpack.c.bf16 %v2947_v18, %v2943_v37 }
 0xb77   : > { %v2960_v7 = vpack.c.bf16 %v2948_v52, %v2944_v42  ;;  %v2854_v58 = vmul.f32 0.044715, %v2838_v30  ;;  %v6438_v1 = vadd.f32 %v2771_v61, %v6363_v46  ;;  %v2790_v33 = vpop.f32.mrf.mxu3 }
 0xb78   : > { %v2857_v27 = vmul.f32 0.044715, %v2841_v53  ;;  %v6441_v29 = vadd.f32 %v2790_v33, %v6367_v50  ;;  %v2754_v24 = vpop.f32.mrf.mxu1  ;;  %3253 = vmatmul.bf16.vlgmr.msrb.gmra.mxu2 %v2959_v62 }
 0xb79   : > { %v2870_v55 = vadd.f32 %v2854_v58, %v6422_v32  ;;  %v2823_v40 = vmul.f32 %v6438_v1, %v6438_v1  ;;  %v6447_v41 = vadd.f32 %v2754_v24, %v6345_v23  ;;  %v2811_v45 = vpop.f32.mrf.mxu0  ;;  %3272 = vmatmul.bf16.vlgmr.msra.gmra.mxu3 %v2960_v7 }
 0xb7a   : > { %v2873_v38 = vadd.f32 %v2857_v27, %v6425_v14  ;;  %v2824_v51 = vmul.f32 %v6441_v29, %v6441_v29  ;;  %v6453_v63 = vadd.f32 %v2811_v45, %v6347_v0 }
 0xb7b   : > { %v2886_v5 = vmul.f32 0.7978846, %v2870_v55  ;;  %v2839_v48 = vmul.f32 %v2823_v40, %v6438_v1  ;;  %v2826_v6 = vmul.f32 %v6447_v41, %v6447_v41 }
 0xb7c   : > { %v2889_v9 = vmul.f32 0.7978846, %v2873_v38  ;;  %v2840_v23 = vmul.f32 %v2824_v51, %v6441_v29  ;;  %v2829_v10 = vmul.f32 %v6453_v63, %v6453_v63 }
 0xb7d   : > { %v2855_v4 = vmul.f32 0.044715, %v2839_v48  ;;  %v2842_v11 = vmul.f32 %v2826_v6, %v6447_v41  ;;  %4812 = vtanh.f32 %v2886_v5 }
 0xb7e   : > { %v2856_v12 = vmul.f32 0.044715, %v2840_v23  ;;  %v2845_v57 = vmul.f32 %v2829_v10, %v6453_v63  ;;  %v2773_v0 = vpop.f32.mrf.mxu2  ;;  %4814 = vtanh.f32 %v2889_v9 }
 0xb7f   : > { %v2871_v60 = vadd.f32 %v2855_v4, %v6438_v1  ;;  %v2858_v47 = vmul.f32 0.044715, %v2842_v11  ;;  %v2774_v43 = vadd.f32 %v2773_v0, %v6363_v46  ;;  %v2792_v17 = vpop.f32.mrf.mxu3 }
 0xb80   : > { %v2872_v28 = vadd.f32 %v2856_v12, %v6441_v29  ;;  %v2861_v49 = vmul.f32 0.044715, %v2845_v57  ;;  %v2793_v54 = vadd.f32 %v2792_v17, %v6367_v50 }
 0xb81   : > { %v2887_v59 = vmul.f32 0.7978846, %v2871_v60  ;;  %v2874_v56 = vadd.f32 %v2858_v47, %v6447_v41  ;;  %v2827_v19 = vmul.f32 %v2774_v43, %v2774_v43 }
 0xb82   : > { %v2888_v20 = vmul.f32 0.7978846, %v2872_v28  ;;  %v2877_v21 = vadd.f32 %v2861_v49, %v6453_v63  ;;  %v2828_v2 = vmul.f32 %v2793_v54, %v2793_v54  ;;  %v4719_v28 = vld [vmem:[%s1101_s4] ss:$0 sm:$0xff]  ;;  %s6728_s4 = scalar_lea.vmem [#allocation19], %s5746_s26  ;;  %s6730_s26 = sld [smem:[#allocation36_spill]] }
 0xb83   : > { %4816 = vtanh.f32 %v2887_v59  ;;  %v2890_v22 = vmul.f32 0.7978846, %v2874_v56  ;;  %v2843_v25 = vmul.f32 %v2827_v19, %v2774_v43  ;;  %v4813_v31 = vpop.eup %4812 }
 0xb84   : > { %4818 = vtanh.f32 %v2888_v20  ;;  %v2893_v46 = vmul.f32 0.7978846, %v2877_v21  ;;  %v2844_v26 = vmul.f32 %v2828_v2, %v2793_v54  ;;  %v4815_v3 = vpop.eup %4814  ;;  %v2918_v37 = vadd.f32 1.0, %v4813_v31 }
 0xb85   : > { %4820 = vtanh.f32 %v2890_v22  ;;  %v2859_v34 = vmul.f32 0.044715, %v2843_v25  ;;  %v2921_v42 = vadd.f32 1.0, %v4815_v3 }
 0xb86   : > { %4822 = vtanh.f32 %v2893_v46  ;;  %v2860_v50 = vmul.f32 0.044715, %v2844_v26  ;;  %v2934_v7 = vmul.f32 0.5, %v2918_v37 }
 0xb87   : > { %v2875_v39 = vadd.f32 %v2859_v34, %v2774_v43  ;;  %v2937_v33 = vmul.f32 0.5, %v2921_v42 }
 0xb88   : > { %v2876_v13 = vadd.f32 %v2860_v50, %v2793_v54  ;;  %v2950_v45 = vmul.f32 %v2934_v7, %v6422_v32  ;;  %p4362_p2 = scmp.ne.s32.totalorder %s6730_s26, 2 }
 0xb89   : > { %v4817_v18 = vpop.eup %4816  ;;  %v2891_v8 = vmul.f32 0.7978846, %v2875_v39  ;;  %v2953_v5 = vmul.f32 %v2937_v33, %v6425_v14  ;;  %s6731_s18 = sld [smem:[#allocation51_spill]] (!%p4362_p2) }
 0xb8a   : > { %v4819_v52 = vpop.eup %4818  ;;  %v2892_v30 = vmul.f32 0.7978846, %v2876_v13  ;;  %v2919_v24 = vadd.f32 1.0, %v4817_v18  ;;  %s6732_s27 = sld [smem:[#allocation70_spill]] (!%p4362_p2) }
 0xb8b   : > { %v4821_v53 = vpop.eup %4820  ;;  %4824 = vtanh.f32 %v2891_v8  ;;  %v2920_v40 = vadd.f32 1.0, %v4819_v52  ;;  %s6733_s24 = sld [smem:[#allocation68_spill]] (!%p4362_p2) }
 0xb8c   : > { %v4823_v61 = vpop.eup %4822  ;;  %4826 = vtanh.f32 %v2892_v30  ;;  %v2922_v62 = vadd.f32 1.0, %v4821_v53  ;;  %v2935_v10 = vmul.f32 0.5, %v2919_v24 }
 0xb8d   : > { %v2925_v58 = vadd.f32 1.0, %v4823_v61  ;;  %v2936_v12 = vmul.f32 0.5, %v2920_v40 }
 0xb8e   : > { %v2938_v27 = vmul.f32 0.5, %v2922_v62  ;;  %v2951_v32 = vmul.f32 %v2935_v10, %v6438_v1 }
 0xb8f   : > { %v2941_v55 = vmul.f32 0.5, %v2925_v58  ;;  %v2952_v60 = vmul.f32 %v2936_v12, %v6441_v29 }
 0xb90   : > { %v2954_v38 = vmul.f32 %v2938_v27, %v6447_v41 }
 0xb91   : > { %v4825_v51 = vpop.eup %4824  ;;  %v2957_v48 = vmul.f32 %v2941_v55, %v6453_v63 }
 0xb92   : > { %v4827_v6 = vpop.eup %4826  ;;  %v2962_v9 = vpack.c.bf16 %v2954_v38, %v2950_v45  ;;  %v2923_v23 = vadd.f32 1.0, %v4825_v51 }
 0xb93   : > { %v2965_v4 = vpack.c.bf16 %v2957_v48, %v2953_v5  ;;  %v2924_v11 = vadd.f32 1.0, %v4827_v6 }
 0xb94   : > { %3239 = vmatmul.bf16.gmra.mxu1 %v2962_v9  ;;  %v2939_v57 = vmul.f32 0.5, %v2923_v23 }
 0xb95   : > { %3296 = vmatmul.bf16.gmra.mxu0 %v2965_v4  ;;  %v2940_v0 = vmul.f32 0.5, %v2924_v11 }
 0xb96   : > { %v2955_v41 = vmul.f32 %v2939_v57, %v2774_v43 }
 0xb97   : > { %v2956_v14 = vmul.f32 %v2940_v0, %v2793_v54 }
 0xb98   : > { %v2963_v47 = vpack.c.bf16 %v2955_v41, %v2951_v32 }
 0xb99   : > { %v2964_v63 = vpack.c.bf16 %v2956_v14, %v2952_v60 }
 0xb9a   : > { %3258 = vmatmul.bf16.gmra.mxu2 %v2963_v47 }
 0xb9b   : > { %3277 = vmatmul.bf16.gmra.mxu3 %v2964_v63 }
 0xbef   : > { %v3235_v17 = vpop.f32.mrf.mxu1 }
 0xbf0   : > { %v3236_v49 = vadd.f32 %v4719_v28, %v3235_v17  ;;  %v3292_v20 = vpop.f32.mrf.mxu0 }
 0xbf7   : > { %v3237_v43 = vpop.f32.mrf.mxu1 }
 0xbf8   : > { %v3238_v29 = vadd.f32 %v4719_v28, %v3237_v43  ;;  %v3294_v26 = vpop.f32.mrf.mxu0 }
 0xbfb   : > { %v3254_v59 = vpop.f32.mrf.mxu2 }
 0xbfc   : > { %v3255_v56 = vadd.f32 %v3254_v59, %v3236_v49  ;;  %v3273_v19 = vpop.f32.mrf.mxu3 }
 0xbfe   : > { %v3274_v1 = vadd.f32 %v3273_v19, %v3255_v56  ;;  %v4720_v56 = vld [vmem:[%s6728_s4] ss:$0 sm:$0xff] }
 0xc00   : > { %v3293_v21 = vadd.f32 %v3292_v20, %v3274_v1  ;;  %v4721_v1 = vld [vmem:[%s1104_s3] ss:$0 sm:$0xff]  ;;  %s6734_s3 = sld [smem:[#allocation69_spill]] (!%p4362_p2) }
 0xc02   : > { %v3302_v54 = vadd.f32 %v3293_v21, %v6305_v35 }
 0xc03   : > { %v3256_v2 = vpop.f32.mrf.mxu2 }
 0xc04   : > { %v3257_v22 = vadd.f32 %v3256_v2, %v3238_v29  ;;  %3308 = vadd.xlane.f32.xlu1 %v3302_v54  ;;  %v3275_v25 = vpop.f32.mrf.mxu3 }
 0xc06   : > { %v3276_v46 = vadd.f32 %v3275_v25, %v3257_v22 }
 0xc08   : > { %v3295_v31 = vadd.f32 %v3294_v26, %v3276_v46 }
 0xc0a   : > { %v3303_v34 = vadd.f32 %v3295_v31, %v6307_v44 }
 0xc0c   : > { %3310 = vadd.xlane.f32.xlu2 %v3303_v34 }
 0xc11   : > { %v3240_v3 = vpop.f32.mrf.mxu1 }
 0xc12   : > { %v3241_v50 = vadd.f32 %v4719_v28, %v3240_v3  ;;  %v3297_v18 = vpop.f32.mrf.mxu0 }
 0xc19   : > { %v3242_v42 = vpop.f32.mrf.mxu1 }
 0xc1a   : > { %v3243_v35 = vadd.f32 %v4719_v28, %v3242_v42  ;;  %v3299_v58 = vpop.f32.mrf.mxu0 }
 0xc1d   : > { %v3259_v39 = vpop.f32.mrf.mxu2 }
 0xc1e   : > { %v3260_v13 = vadd.f32 %v3259_v39, %v3241_v50  ;;  %v3278_v37 = vpop.f32.mrf.mxu3 }
 0xc20   : > { %v3279_v8 = vadd.f32 %v3278_v37, %v3260_v13 }
 0xc22   : > { %v3298_v52 = vadd.f32 %v3297_v18, %v3279_v8 }
 0xc24   : > { %v3304_v30 = vadd.f32 %v3298_v52, %v6314_v15 }
 0xc25   : > { %v3261_v53 = vpop.f32.mrf.mxu2 }
 0xc26   : > { %v3262_v61 = vadd.f32 %v3261_v53, %v3243_v35  ;;  %3312 = vadd.xlane.f32.xlu0 %v3304_v30  ;;  %v3280_v62 = vpop.f32.mrf.mxu3 }
 0xc28   : > { %v3281_v7 = vadd.f32 %v3280_v62, %v3262_v61 }
 0xc2a   : > { %v3300_v44 = vadd.f32 %v3299_v58, %v3281_v7 }
 0xc2c   : > { %v3305_v33 = vadd.f32 %v3300_v44, %v6316_v16 }
 0xc2e   : > { %3314 = vadd.xlane.f32.xlu1 %v3305_v33 }
 0xc77   : > { %v3309_v27 = vpop.xlane.xlu1 %3308 }
 0xc78   : > { %v3316_v24 = vmul.f32 %v3309_v27, %v6204_v36 }
 0xc7a   : > { %v3320_v55 = vsub.f32 %v3302_v54, %v3316_v24 }
 0xc7c   : > { %v3324_v40 = vmul.f32 %v3320_v55, %v3320_v55 }
 0xc7e   : > { %3328 = vadd.xlane.f32.xlu2 %v3324_v40 }
 0xc7f   : > { %v3311_v45 = vpop.xlane.xlu2 %3310 }
 0xc80   : > { %v3317_v38 = vmul.f32 %v3311_v45, %v6204_v36 }
 0xc82   : > { %v3321_v15 = vsub.f32 %v3303_v34, %v3317_v38 }
 0xc84   : > { %v3325_v51 = vmul.f32 %v3321_v15, %v3321_v15 }
 0xc86   : > { %3330 = vadd.xlane.f32.xlu0 %v3325_v51 }
 0xc99   : > { %v3313_v5 = vpop.xlane.xlu0 %3312 }
 0xc9a   : > { %v3318_v48 = vmul.f32 %v3313_v5, %v6204_v36 }
 0xc9c   : > { %v6487_v6 = vsub.f32 %v3304_v30, %v3318_v48 }
 0xc9e   : > { %v3326_v16 = vmul.f32 %v6487_v6, %v6487_v6 }
 0xca0   : > { %3332 = vadd.xlane.f32.xlu1 %v3326_v16 }
 0xca1   : > { %v3315_v9 = vpop.xlane.xlu1 %3314 }
 0xca2   : > { %v3319_v23 = vmul.f32 %v3315_v9, %v6204_v36 }
 0xca4   : > { %v6492_v10 = vsub.f32 %v3305_v33, %v3319_v23 }
 0xca6   : > { %v3327_v4 = vmul.f32 %v6492_v10, %v6492_v10 }
 0xca8   : > { %3334 = vadd.xlane.f32.xlu2 %v3327_v4 }
 0xcf1   : > { %v3329_v11 = vpop.xlane.xlu2 %3328 }
 0xcf2   : > { %v3336_v12 = vmul.f32 %v3329_v11, %v6204_v36 }
 0xcf4   : > { %v3340_v57 = vadd.f32 1e-12, %v3336_v12 }
 0xcf6   : > { %4828 = vrsqrt.f32 %v3340_v57  ;;  %vm3350_vm3 = vweird.f32 %v3340_v57 }
 0xcf9   : > { %v3331_v0 = vpop.xlane.xlu0 %3330 }
 0xcfa   : > { %v3337_v32 = vmul.f32 %v3331_v0, %v6204_v36 }
 0xcfc   : > { %v4829_v41 = vpop.eup %4828  ;;  %v3341_v60 = vadd.f32 1e-12, %v3337_v32 }
 0xcfd   : > { %v3345_v14 = vmul.f32 %v4829_v41, %v3340_v57  ;;  %vm3351_vm2 = vweird.f32 %v4829_v41 }
 0xcfe   : > { %4830 = vrsqrt.f32 %v3341_v60  ;;  %vm3352_vm4 = vmor %vm3350_vm3, %vm3351_vm2  ;;  %vm3360_vm6 = vweird.f32 %v3341_v60 }
 0xcff   : > { %v3346_v47 = vmul.f32 %v4829_v41, %v3345_v14 }
 0xd01   : > { %v3347_v63 = vmul.f32 0.5, %v3346_v47 }
 0xd03   : > { %v3348_v17 = vsub.f32 1.5, %v3347_v63 }
 0xd04   : > { %v4831_v28 = vpop.eup %4830 }
 0xd05   : > { %v3349_v49 = vmul.f32 %v4829_v41, %v3348_v17  ;;  %v3355_v59 = vmul.f32 %v4831_v28, %v3341_v60  ;;  %vm3361_vm5 = vweird.f32 %v4831_v28 }
 0xd06   : > { %vm3362_vm7 = vmor %vm3360_vm6, %vm3361_vm5 }
 0xd07   : > { %v3353_v19 = vsel %vm3352_vm4, %v4829_v41, %v3349_v49  ;;  %v3356_v20 = vmul.f32 %v4831_v28, %v3355_v59 }
 0xd08   : > { %v3384_v43 = vmul.f32 %v3353_v19, %v3320_v55 }
 0xd09   : > { %v3357_v21 = vmul.f32 0.5, %v3356_v20 }
 0xd0a   : > { %v3391_v29 = vmul.f32 %v4720_v56, %v3384_v43 }
 0xd0b   : > { %v3358_v54 = vsub.f32 1.5, %v3357_v21 }
 0xd0c   : > { %v6505_v2 = vadd.f32 %v4721_v1, %v3391_v29 }
 0xd0d   : > { %v3359_v22 = vmul.f32 %v4831_v28, %v3358_v54 }
 0xd0e   : > { %3402 = vst [vmem:[#allocation2 + $0x10] sm:$0xff] %v6505_v2 }
 0xd0f   : > { %v3363_v25 = vsel %vm3362_vm7, %v4831_v28, %v3359_v22 }
 0xd10   : > { %v3385_v46 = vmul.f32 %v3363_v25, %v3321_v15 }
 0xd12   : > { %v3392_v26 = vmul.f32 %v4720_v56, %v3385_v46 }
 0xd13   : > { %v3333_v31 = vpop.xlane.xlu1 %3332 }
 0xd14   : > { %v3399_v34 = vadd.f32 %v4721_v1, %v3392_v26  ;;  %v3338_v3 = vmul.f32 %v3333_v31, %v6204_v36 }
 0xd16   : > { %3403 = vst [vmem:[#allocation2] sm:$0xff] %v3399_v34  ;;  %v3342_v50 = vadd.f32 1e-12, %v3338_v3 }
 0xd18   : > { %4832 = vrsqrt.f32 %v3342_v50  ;;  %vm3370_vm9 = vweird.f32 %v3342_v50 }
 0xd1b   : > { %v3335_v39 = vpop.xlane.xlu2 %3334 }
 0xd1c   : > { %v3339_v13 = vmul.f32 %v3335_v39, %v6204_v36 }
 0xd1e   : > { %v4833_v37 = vpop.eup %4832  ;;  %v3343_v18 = vadd.f32 1e-12, %v3339_v13 }
 0xd1f   : > { %v3365_v8 = vmul.f32 %v4833_v37, %v3342_v50  ;;  %vm3371_vm8 = vweird.f32 %v4833_v37 }
 0xd20   : > { %4834 = vrsqrt.f32 %v3343_v18  ;;  %vm3372_vm10 = vmor %vm3370_vm9, %vm3371_vm8  ;;  %vm3380_vm12 = vweird.f32 %v3343_v18 }
 0xd21   : > { %v3366_v42 = vmul.f32 %v4833_v37, %v3365_v8 }
 0xd23   : > { %v3367_v52 = vmul.f32 0.5, %v3366_v42 }
 0xd25   : > { %v3368_v35 = vsub.f32 1.5, %v3367_v52 }
 0xd26   : > { %v4835_v30 = vpop.eup %4834 }
 0xd27   : > { %v3369_v53 = vmul.f32 %v4833_v37, %v3368_v35  ;;  %v3375_v61 = vmul.f32 %v4835_v30, %v3343_v18  ;;  %vm3381_vm11 = vweird.f32 %v4835_v30 }
 0xd28   : > { %vm3382_vm13 = vmor %vm3380_vm12, %vm3381_vm11 }
 0xd29   : > { %v3373_v62 = vsel %vm3372_vm10, %v4833_v37, %v3369_v53  ;;  %v3376_v7 = vmul.f32 %v4835_v30, %v3375_v61 }
 0xd2a   : > { %v3386_v58 = vmul.f32 %v3373_v62, %v6487_v6 }
 0xd2b   : > { %v3377_v44 = vmul.f32 0.5, %v3376_v7 }
 0xd2c   : > { %v3393_v33 = vmul.f32 %v4720_v56, %v3386_v58 }
 0xd2d   : > { %v3378_v36 = vsub.f32 1.5, %v3377_v44 }
 0xd2e   : > { %v3400_v27 = vadd.f32 %v4721_v1, %v3393_v33 }
 0xd2f   : > { %v3379_v24 = vmul.f32 %v4835_v30, %v3378_v36 }
 0xd30   : > { %3404 = vst [vmem:[#allocation2 + $0x18] sm:$0xff] %v3400_v27 }
 0xd31   : > { %v3383_v55 = vsel %vm3382_vm13, %v4835_v30, %v3379_v24 }
 0xd32   : > { %v3387_v40 = vmul.f32 %v3383_v55, %v6492_v10 }
 0xd34   : > { %v3394_v45 = vmul.f32 %v4720_v56, %v3387_v40  ;;  %3409 = sbr.rel (%p4362_p2) target bundleno = 3805 (0xedd), region = 152 }
 0xd36   : > { %v3401_v38 = vadd.f32 %v4721_v1, %v3394_v45 }
 0xd38   : > { %3405 = vst [vmem:[#allocation2 + $0x8] sm:$0xff] %v3401_v38 }
 0xd39   : > { %v4507_v15 = vld [vmem:[#allocation21 + $0x38] sm:$0xff]  ;;  %v4506_v51 = vld [vmem:[#allocation21 + $0x30] sm:$0xff]  ;;  %v4505_v5 = vld [vmem:[#allocation21 + $0x28] sm:$0xff]  ;;  %v3411_v48 = vpack.c.bf16 %v3399_v34, %v3399_v34  ;;  %v3412_v16 = vpack.c.bf16 %v3400_v27, %v3400_v27  ;;  %v3410_v9 = vpack.c.bf16 %v6505_v2, %v6505_v2  ;;  %v3413_v4 = vpack.c.bf16 %v3401_v38, %v3401_v38 }
 0xd3a   : > { %3501 = vmatpush.bf16.msra.mxu0 %v4507_v15  ;;  %v4504_v6 = vld [vmem:[#allocation21 + $0x20] sm:$0xff]  ;;  %v4503_v10 = vld [vmem:[#allocation21 + $0x18] sm:$0xff]  ;;  %vm3443_vm14 = vcmask 1041409   ;;  %v4502_v0 = vld [vmem:[#allocation21 + $0x10] sm:$0xff]  ;;  %vm3446_vm15 = vcmask 1042434   ;;  %vm3449_vm0 = vcmask 1043459  }
 0xd3b   : > { %v3439_v23 = vunpack.c.l.b16 %v3411_v48  ;;  %v3440_v11 = vunpack.c.l.b16 %v3412_v16  ;;  %v3438_v12 = vunpack.c.l.b16 %v3410_v9  ;;  %v3441_v32 = vunpack.c.l.b16 %v3413_v4  ;;  %v4501_v14 = vld [vmem:[#allocation21 + $0x8] sm:$0xff]  ;;  %v4500_v17 = vld [vmem:[#allocation21] sm:$0xff]  ;;  %v3515_v59 = vld [vmem:[%s6731_s18] sm:$0x1] }
 0xd3c   : > { %v3516_v56 = vld [vmem:[%s6731_s18 + $0x1] sm:$0x1]  ;;  %v3517_v19 = vld [vmem:[%s6731_s18 + $0x2] sm:$0x1]  ;;  %v3518_v20 = vld [vmem:[%s6731_s18 + $0x3] sm:$0x1] }
 0xd3d   : > { %v3442_v57 = vrot.slane %v3439_v23, 7  ;;  %v3445_v41 = vrot.slane %v3440_v11, 6  ;;  %v3448_v47 = vrot.slane %v3441_v32, 5  ;;  %v3524_v1 = vmul.f32 %v3517_v19, %v3515_v59  ;;  %v4844_v43 = vld [vmem:[%s6732_s27] ss:$0 sm:$0xff] }
 0xd3e   : > { %3502 = vmatpush.bf16.msra.mxu0 %v4506_v51  ;;  %v3525_v21 = vmul.f32 %v3518_v20, %v3516_v56  ;;  %v3541_v54 = vrot.slane %v4844_v43, 1  ;;  %v4842_v46 = vld [vmem:[%s6733_s24] ss:$0 sm:$0xff]  ;;  %vm3533_vm1 = vcmask 1041408   ;;  %vm3552_vm2 = vcmask 254976  }
 0xd3f   : > { %v3444_v60 = vsel %vm3443_vm14, %v3442_v57, %v3438_v12  ;;  %v3526_v29 = vmax.f32 %v3524_v1, 0.0  ;;  %v4843_v13 = vld [vmem:[%s6734_s3] ss:$0 sm:$0xff]  ;;  %v5340_v35 = vmov 0   ;;  %v4845_v53 = vld [vmem:[#allocation3] ss:$0 sm:$0xff] }
 0xd40   : > { %v3447_v63 = vsel %vm3446_vm15, %v3445_v41, %v3444_v60  ;;  %v3527_v2 = vmax.f32 %v3525_v21, 0.0  ;;  %4840 = vset.pattern.permute.xlu1 %v5340_v35  ;;  %4841 = vset.pattern.permute.xlu0 %v5340_v35 }
 0xd41   : > { %v3450_v28 = vsel %vm3449_vm0, %v3448_v47, %v3447_v63  ;;  %v3543_v22 = vmul.f32 %v4844_v43, %v3526_v29 }
 0xd42   : > { %3503 = vmatpush.bf16.msra.mxu0 %v4505_v5  ;;  %v3451_v49 = vpack.c.b16 %v3450_v28, %v3450_v28  ;;  %v3544_v25 = vmul.f32 %v3541_v54, %v3527_v2 }
 0xd43   : > { %3547 = vst [vmem:[#allocation1] ss:$9 sm:$0xff] %v3543_v22 }
 0xd44   : > { %3549 = vst [vmem:[#allocation1 + $0x1] ss:$9 sm:$0xff] %v3544_v25 }
 0xd46   : > { %3504 = vmatpush.bf16.msra.mxu0 %v4504_v6 }
 0xd4a   : > { %3505 = vmatpush.bf16.msra.mxu0 %v4503_v10 }
 0xd4b   : > { %v3550_v42 = vld [vmem:[#allocation1] sm:$0xff] }
 0xd4c   : > { %v3553_v52 = vsel %vm3552_vm2, %v3550_v42, 0.0 }
 0xd4e   : > { %3506 = vmatpush.bf16.msra.mxu0 %v4502_v0 }
 0xd52   : > { %3507 = vmatpush.bf16.msra.mxu0 %v4501_v14 }
 0xd56   : > { %3508 = vmatpush.bf16.msra.mxu0 %v4500_v17 }
 0xd59   : > { %3509 = vmatmul.bf16.vlgmr.msra.gmra.mxu0 %v3451_v49 }
 0xdd6   : > { %v3510_v26 = vpop.f32.mrf.mxu0 }
 0xdd7   : > { %v3511_v31 = vadd.f32 %v4842_v46, %v3510_v26 }
 0xdd9   : > { %4846 = vtanh.f32 %v3511_v31 }
 0xdde   : > { %v3512_v34 = vpop.f32.mrf.mxu0 }
 0xddf   : > { %v4847_v3 = vpop.eup %4846 }
 0xde0   : > { %v3520_v50 = vrot.slane %v4847_v3, 2 }
 0xde2   : > { %v3522_v39 = vmul.f32 %v4847_v3, %v3520_v50 }
 0xde4   : > { %v3523_v37 = vmax.f32 %v3522_v39, 0.0 }
 0xde6   : > { %v3532_v18 = vmul.f32 %v4843_v13, %v3523_v37 }
 0xde8   : > { %v3534_v8 = vsel %vm3533_vm1, %v3532_v18, 0.0 }
 0xde9   : > { %3535 = vadd.xlane.f32.xlu0 %v3534_v8 }
 0xdf1   : > { %3554 = vadd.xlane.f32.xlu0 %v3553_v52 }
 0xe5c   : > { %v3536_v30 = vpop.xlane.xlu0 %3535 }
 0xe64   : > { %v3555_v61 = vpop.xlane.xlu0 %3554 }
 0xe65   : > { %v3556_v62 = vadd.f32 %v3555_v61, %v3536_v30 }
 0xe67   : > { %v3561_v7 = vadd.f32 %v4845_v53, %v3556_v62 }
 0xe69   : > { %3564 = vperm.xlu1 %4840, %v3561_v7  }
 0xedb   : > { %v3565_v58 = vpop.permute.xlu1 %3564 }
 0xedc   : > { %3567 = vst [vmem:[%s5817_s17] sm:$0x3] %v3565_v58 }
 0xedd PF: > { %s6735_s9 = sld [smem:[#allocation37_spill]]  ;;  %s3581_s29 = sshll.u32 %s5817_s17, 4  ;;  %s3582_s29 = int_to_ptr.vmem [resolvable:$true] %s3581_s29 }
 0xede   : > { %s6736_s11 = sld [smem:[#allocation50_spill]] }
 0xedf   : > { %s6738_s12 = sld [smem:[#allocation71_spill]] }
 0xee3   : > { %s4396_s28 = sshll.u32 %s6735_s9, 1 }
 0xee4   : > { %s3569_s30 = scalar_lea.sflag [#allocation6], %s6736_s11 }
 0xee5   : > { %s3579_s7 = scalar_lea.hbm %s6738_s12, %s4396_s28  ;;  %s5198_s4 = scalar_lea.hbm %s6738_s12, 4 }
 0xee6   : > { %s3583_s1 = sshll.u32 %s3579_s7, 4  ;;  %s3584_s1 = int_to_ptr.hbm [resolvable:$true] %s3583_s1 }
 0xee7   : > { %s5192_s25 = sshra.s32 %s3584_s1, 4  ;;  %s5193_s25 = int_to_ptr.hbm [resolvable:$true] %s5192_s25 }
 0xee8   : > { %s5194_s23 = scalar_lea.hbm %s5193_s25, 2  ;;  %p5199_p12 = scmp.lt.s32.totalorder %s5193_s25, %s6738_s12 }
 0xee9   : > { %p5195_p7 = scmp.ne.s32.totalorder %s5193_s25, %s5194_s23  ;;  %p5200_p5 = scmp.lt.s32.totalorder %s5198_s4, %s5194_s23 }
 0xeeb   : > { %p5196_p9 = pnand %p5195_p7, %p5576_p13  ;;  %p5201_p3 = por %p5200_p5, %p5199_p12 }
 0xeed   : > { %p5197_p11 = pneg %p5196_p9 }
 0xeef   : > { %p5202_p0 = pnand %p5201_p3, %p5197_p11 }
 0xef1   : > { %5205 = shalt.err (!%p5202_p0)
}
 0xef2   : > { %4538 = dma.vmem_to_hbm [thread:$0]  (%p5576_p13), %s3582_s29, 32, %s3584_s1, %s3569_s30  }
 0xef3 PF: > { %s6739_s17 = sld [smem:[#allocation40_spill]] }
 0xef4   : > { %s6740_s8 = sld [smem:[#allocation33_spill]] }
 0xef9   : > { %p4582_p1 = scmp.ge.s32.totalorder %s6739_s17, 2 }
 0xefa   : > { %s3595_s18 = sand.u32 1, %s6740_s8  }
 0xefb   : > { %p4576_p4 = pnand %p4582_p1, %p5524_p8  ;;  %s3596_s16 = scalar_lea.sflag [#allocation6], %s3595_s18 }
 0xefd   : > { %p4577_p10 = pneg %p4576_p4 }
 0xeff   : > { %5279 = dma.done.wait (%p4577_p10), %s3596_s16, 32  }
 0xf00   : > { %5281 = vsyncadd (%p4577_p10), %s3596_s16, 4294967264  ;;  %s53_s29 = sadd.s32 1, %s6739_s17   ;;  %s6742_s23 = sld [smem:[#allocation31_spill]] }
 0xf01   : > { %p50_p6 = scmp.ge.s32.totalorder %s53_s29, 8   ;;  %s6743_s24 = sld [smem:[#allocation32_spill]] }
 0xf02   : > { %s6744_s19 = sld [smem:[#allocation47_spill]] }
 0xf03   : > { %s6745_s2 = sld [smem:[#allocation34_spill]] }
 0xf04   : > { %s6746_s25 = sld [smem:[#allocation35_spill]] }
 0xf05   : > { %s6747_s3 = sld [smem:[#allocation49_spill]]  ;;  %52 = sbr.rel (!%p50_p6) target bundleno = 40 (0x28), region = 282 }
 0xf06   : > { %s6748_s26 = sld [smem:[#allocation38_spill]] }
 0xf07   : > { %s6749_s27 = sld [smem:[#allocation39_spill]] }
 0xf08   : > { %s6750_s28 = sld [smem:[#allocation45_spill]] }
 0xf09   : > { %s6751_s4 = sld [smem:[#allocation46_spill]] }
 0xf0a   :  { %3602 = vsyncpa [#allocation5], 1 }
 0xf0b   :  { %3604 = vsyncpa [#allocation5 + $0x1], 1 }
 0xf0c   :  { %3605 = vsyncpa [#allocation8], 1 }
 0xf0d   :  { %3607 = vsyncpa [#allocation8 + $0x1], 1 }
 0xf0e   :  { %3608 = vsyncpa [#allocation11], 1 }
 0xf0f   :  { %3610 = vsyncpa [#allocation11 + $0x1], 1 }
 0xf10   :  { %3611 = vsyncpa [#allocation14], 1 }
 0xf11   :  { %3613 = vsyncpa [#allocation14 + $0x1], 1 }
 0xf12   :  { %3614 = vsyncpa [#allocation17], 1 }
 0xf13   :  { %3616 = vsyncpa [#allocation17 + $0x1], 1 }
 0xf14   :  { %3617 = vsyncpa [#allocation20], 1 }
 0xf15   :  { %3619 = vsyncpa [#allocation20 + $0x1], 1 }
 0xf16   :  { %3620 = vsyncpa [#allocation6], 1 }
 0xf17   :  { %3622 = vsyncpa [#allocation6 + $0x1], 1 }

</bundles_post_ra>
